<compile_context>
chip_gen: v7x
topology: tpu7x:2x2x1
jax: 0.10.0
libtpu: 0.0.40
codegen_flags: <defaults>
</compile_context>

<pallas_src>
import functools

import jax
import jax.numpy as jnp
from jax.experimental import pallas as pl
from jax.experimental.pallas import tpu as pltpu


# ----------------------------- Pallas kernel ------------------------------- #

def _encoder_kernel(*refs, hid, num_layers, T, B):
    """Fused bidirectional multi-layer GRU + final Linear for one batch block.

    refs layout (inputs, then outputs, then scratch):
      refs[0]                      : x2d      (T*B, E)    time-major embedded tokens
      per layer l (4 refs each)    : wih_cat  (D_in, 6H)  [W_ih_fwd^T | W_ih_rev^T]
                                     whh_blk  (2H, 6H)    blockdiag(W_hh_f^T, W_hh_r^T)
                                     bgx_cat  (1, 6H)     b_ih + [b_hh_r, b_hh_z, 0] (both dirs)
                                     bhn_cat  (1, 2H)     [b_hh_n_fwd | b_hh_n_rev]
      refs[1+4L]                   : lin_wT   (2H, H)
      refs[2+4L]                   : lin_b    (1, H)
      refs[3+4L]                   : out      (T*B, H)    output
      refs[4+4L]                   : act_scr  (T*B, 2H)   packed [fwd | rev] layer output (VMEM)
      refs[5+4L]                   : gx_scr   (T*B, 6H)   hoisted input projection (VMEM)
    """
    H = hid
    nlw = 4 * num_layers
    x_ref = refs[0]
    lin_w_ref = refs[1 + nlw]
    lin_b_ref = refs[2 + nlw]
    out_ref = refs[3 + nlw]
    act_scr = refs[4 + nlw]
    gx_scr = refs[5 + nlw]

    for layer in range(num_layers):
        wih_ref, whh_ref, bgx_ref, bhn_ref = refs[1 + 4 * layer: 5 + 4 * layer]

        # ---- Hoisted input projection for all T steps, both directions: (T*B, 6H).
        # Layer 0 reads the embedded tokens; layer>0 reads the packed (2H) activations
        # from the previous layer -> a single K=2H matmul (no row-split pair).
        src_ref = x_ref if layer == 0 else act_scr
        gx_scr[...] = (jnp.dot(src_ref[...], wih_ref[...],
                               preferred_element_type=jnp.float32)
                       + bgx_ref[...])

        whh_blk = whh_ref[...]                                  # (2H, 6H) block-diagonal
        # Hoisted broadcasts (JAX does not CSE broadcast_in_dim inside the unrolled loop).
        bhn_f = jnp.broadcast_to(bhn_ref[:, :H], (B, H))
        bhn_r = jnp.broadcast_to(bhn_ref[:, H:], (B, H))

        # ---- Recurrence: one fused h_cat @ blockdiag matmul + gate math per step.
        # Fully unrolled (T static, small) so every slice/store index is static.
        h_f = jnp.zeros((B, H), jnp.float32)
        h_r = jnp.zeros((B, H), jnp.float32)
        for i in range(T):
            tr = T - 1 - i
            gx_f = gx_scr[i * B:(i + 1) * B, :3 * H]            # fwd gates for time i
            gx_r = gx_scr[tr * B:(tr + 1) * B, 3 * H:]          # rev gates for time T-1-i

            h_cat = jnp.concatenate([h_f, h_r], axis=1)         # (B, 2H)
            gh = jnp.dot(h_cat, whh_blk,
                         preferred_element_type=jnp.float32)    # (B, 6H): [fwd 3H | rev 3H]

            # forward direction (PyTorch gate order r, z, n)
            r_f = jax.nn.sigmoid(gx_f[:, :H] + gh[:, :H])
            z_f = jax.nn.sigmoid(gx_f[:, H:2 * H] + gh[:, H:2 * H])
            n_f = jnp.tanh(gx_f[:, 2 * H:] + r_f * (gh[:, 2 * H:3 * H] + bhn_f))
            h_f = (1.0 - z_f) * n_f + z_f * h_f

            # reverse direction
            r_r = jax.nn.sigmoid(gx_r[:, :H] + gh[:, 3 * H:4 * H])
            z_r = jax.nn.sigmoid(gx_r[:, H:2 * H] + gh[:, 4 * H:5 * H])
            n_r = jnp.tanh(gx_r[:, 2 * H:] + r_r * (gh[:, 5 * H:] + bhn_r))
            h_r = (1.0 - z_r) * n_r + z_r * h_r

            # Packed store: fwd half and rev half of the same scratch (disjoint columns).
            act_scr[i * B:(i + 1) * B, :H] = h_f
            act_scr[tr * B:(tr + 1) * B, H:] = h_r

    # ---- Final Linear on the packed bidirectional output: single K=2H matmul.
    out_ref[...] = (jnp.dot(act_scr[...], lin_w_ref[...],
                            preferred_element_type=jnp.float32)
                    + lin_b_ref[...])


# --------------------- One-time weight packing (hoisted) -------------------- #

def pack_params(params, hid, num_layers):
    """Fold / transpose / concat all GRU + Linear weights ONCE (outside the forward)."""
    H = hid
    zeros_h = jnp.zeros((H,), jnp.float32)
    zeros_blk = jnp.zeros((H, 3 * H), jnp.float32)
    weights = []
    for layer in range(num_layers):
        (w_ih_f, w_hh_f, b_ih_f, b_hh_f) = params["gru"][layer][0]
        (w_ih_r, w_hh_r, b_ih_r, b_hh_r) = params["gru"][layer][1]
        # Pre-combined r/z biases go into the hoisted projection; n-gate keeps only b_ih.
        bgx_f = b_ih_f + jnp.concatenate([b_hh_f[:2 * H], zeros_h])
        bgx_r = b_ih_r + jnp.concatenate([b_hh_r[:2 * H], zeros_h])
        wih_cat = jnp.concatenate([w_ih_f.T, w_ih_r.T], axis=1)               # (D_in, 6H)
        whh_blk = jnp.concatenate(                                            # (2H, 6H)
            [jnp.concatenate([w_hh_f.T, zeros_blk], axis=1),
             jnp.concatenate([zeros_blk, w_hh_r.T], axis=1)], axis=0)
        bgx_cat = jnp.concatenate([bgx_f, bgx_r]).reshape(1, 6 * H)           # (1, 6H)
        bhn_cat = jnp.concatenate([b_hh_f[2 * H:], b_hh_r[2 * H:]]).reshape(1, 2 * H)
        weights += [wih_cat, whh_blk, bgx_cat, bhn_cat]
    weights.append(params["hid_lin_w"].T)                                     # (2H, H)
    weights.append(params["hid_lin_b"].reshape(1, H))                         # (1, H)
    return {"emb": params["emb"], "weights": tuple(weights)}


# ------------------------------- Wrapper ----------------------------------- #

@functools.partial(jax.jit, static_argnums=(2, 3, 4))
def encoder_forward(tokens, packed, hid, num_layers, batch_blocks=1):
    B, T = tokens.shape
    H = hid
    nb = batch_blocks
    assert B % nb == 0, "batch must divide batch_blocks"
    Bb = B // nb
    E = packed["emb"].shape[1]
    weights = packed["weights"]

    # Embedding gather directly into per-block time-major layout (nb, T*Bb, E);
    # only the tiny int32 token matrix gets rearranged.
    ids = jnp.transpose(tokens.reshape(nb, Bb, T), (0, 2, 1)).reshape(nb, T * Bb)
    x = jnp.take(packed["emb"], ids, axis=0)                                  # (nb, T*Bb, E)

    # Explicit VMEM budget: double-buffered blocks + resident weights + scratch.
    def nbytes(a):
        return int(a.size) * a.dtype.itemsize
    blk_bytes = 2 * (T * Bb * E * 4 + T * Bb * H * 4)
    w_bytes = 2 * sum(nbytes(w) for w in weights)
    scratch_bytes = T * Bb * (2 * H + 6 * H) * 4
    vmem_limit = int(min(64 << 20,
                         max(32 << 20, blk_bytes + w_bytes + scratch_bytes + (4 << 20))))

    x_spec = pl.BlockSpec((None, T * Bb, E), lambda b: (b, 0, 0))
    w_specs = [pl.BlockSpec(w.shape, lambda b: (0, 0)) for w in weights]      # resident
    out_spec = pl.BlockSpec((None, T * Bb, H), lambda b: (b, 0, 0))

    out3 = pl.pallas_call(
        functools.partial(_encoder_kernel, hid=H, num_layers=num_layers, T=T, B=Bb),
        out_shape=jax.ShapeDtypeStruct((nb, T * Bb, H), jnp.float32),
        grid=(nb,),
        in_specs=[x_spec] + w_specs,
        out_specs=out_spec,
        scratch_shapes=[pltpu.VMEM((T * Bb, 2 * H), jnp.float32),   # packed fwd|rev activations
                        pltpu.VMEM((T * Bb, 6 * H), jnp.float32)],  # hoisted input projection
        compiler_params=pltpu.CompilerParams(
            dimension_semantics=("parallel",),       # batch blocks -> 2nd TC on v7x
            vmem_limit_bytes=vmem_limit),
    )(x, *weights)

    # Cheap rearrangement of the small result back to batch-first (B, T, H).
    return jnp.transpose(out3.reshape(nb, T, Bb, H), (0, 2, 1, 3)).reshape(B, T, H)


# --------------------------- Parameter init -------------------------------- #

def init_params(key, vocab, emb_size, pad_id, hid, num_layers):
    k = 1.0 / float(jnp.sqrt(hid))
    params = {}
    key, sub = jax.random.split(key)
    emb = jax.random.normal(sub, (vocab, emb_size), jnp.float32)
    emb = emb.at[pad_id].set(0.0)  # padding_idx row zeroed (as nn.Embedding does)
    params["emb"] = emb

    gru = []
    for layer in range(num_layers):
        d_in = emb_size if layer == 0 else 2 * hid
        dirs = []
        for _ in range(2):  # forward, reverse directions
            key, k1, k2, k3, k4 = jax.random.split(key, 5)
            w_ih = jax.random.uniform(k1, (3 * hid, d_in), jnp.float32, -k, k)
            w_hh = jax.random.uniform(k2, (3 * hid, hid), jnp.float32, -k, k)
            b_ih = jax.random.uniform(k3, (3 * hid,), jnp.float32, -k, k)
            b_hh = jax.random.uniform(k4, (3 * hid,), jnp.float32, -k, k)
            dirs.append((w_ih, w_hh, b_ih, b_hh))
        gru.append(dirs)
    params["gru"] = gru

    key, k1, k2 = jax.random.split(key, 3)
    kl = 1.0 / float(jnp.sqrt(2 * hid))
    params["hid_lin_w"] = jax.random.uniform(k1, (hid, 2 * hid), jnp.float32, -kl, kl)
    params["hid_lin_b"] = jax.random.uniform(k2, (hid,), jnp.float32, -kl, kl)
    return params


# -------------------------- Pure-JAX reference ----------------------------- #

def _gru_dir_ref(x, w_ih, w_hh, b_ih, b_hh, reverse, hid):
    B = x.shape[0]

    def cell(h, x_t):
        gx = x_t @ w_ih.T + b_ih
        gh = h @ w_hh.T + b_hh
        r = jax.nn.sigmoid(gx[:, :hid] + gh[:, :hid])
        z = jax.nn.sigmoid(gx[:, hid:2 * hid] + gh[:, hid:2 * hid])
        n = jnp.tanh(gx[:, 2 * hid:] + r * gh[:, 2 * hid:])
        h_new = (1.0 - z) * n + z * h
        return h_new, h_new

    xs = jnp.transpose(x, (1, 0, 2))
    if reverse:
        xs = xs[::-1]
    h0 = jnp.zeros((B, hid), jnp.float32)
    _, ys = jax.lax.scan(cell, h0, xs)
    if reverse:
        ys = ys[::-1]
    return jnp.transpose(ys, (1, 0, 2))


def encoder_ref(tokens, params, hid, num_layers):
    seq = jnp.take(params["emb"], tokens, axis=0)
    for layer in range(num_layers):
        outs = []
        for d, reverse in ((0, False), (1, True)):
            w_ih, w_hh, b_ih, b_hh = params["gru"][layer][d]
            outs.append(_gru_dir_ref(seq, w_ih, w_hh, b_ih, b_hh, reverse, hid))
        seq = jnp.concatenate(outs, axis=-1)
    return seq @ params["hid_lin_w"].T + params["hid_lin_b"]


# --------------------------------- Main ------------------------------------ #

if __name__ == "__main__":
    EN_VOCAB, EMB, PAD_ID, HID, LAYERS, DROPOUT = 32, 16, 0, 32, 2, 0.1
    B, T = 2, 8

    key = jax.random.PRNGKey(0)
    pkey, tkey = jax.random.split(key)
    params = init_params(pkey, EN_VOCAB, EMB, PAD_ID, HID, LAYERS)
    tokens = jax.random.randint(tkey, (B, T), 0, EN_VOCAB, dtype=jnp.int32)

    packed = pack_params(params, HID, LAYERS)   # one-time weight prep, outside the forward
    ref = encoder_ref(tokens, params, HID, LAYERS)

    # Single-program path.
    out = jax.block_until_ready(encoder_forward(tokens, packed, HID, LAYERS, 1))
    assert out.shape == (B, T, HID), out.shape
    assert jnp.allclose(out, ref, atol=1e-4, rtol=1e-4), "mismatch (batch_blocks=1)"

    # Batch-split "parallel" grid path (uses v7x's second TensorCore; serial elsewhere).
    out2 = jax.block_until_ready(encoder_forward(tokens, packed, HID, LAYERS, 2))
    assert jnp.allclose(out2, ref, atol=1e-4, rtol=1e-4), "mismatch (batch_blocks=2)"

    print("KERNEL_OK")
</pallas_src>

<mosaic_0001>
module attributes {stable_mosaic.version = 11 : i64} {
  func.func @_encoder_kernel(%arg0: i32, %arg1: memref<1x16x16xf32, #tpu.memory_space<vmem>>, %arg2: memref<16x192xf32, #tpu.memory_space<vmem>>, %arg3: memref<64x192xf32, #tpu.memory_space<vmem>>, %arg4: memref<1x192xf32, #tpu.memory_space<vmem>>, %arg5: memref<1x64xf32, #tpu.memory_space<vmem>>, %arg6: memref<64x192xf32, #tpu.memory_space<vmem>>, %arg7: memref<64x192xf32, #tpu.memory_space<vmem>>, %arg8: memref<1x192xf32, #tpu.memory_space<vmem>>, %arg9: memref<1x64xf32, #tpu.memory_space<vmem>>, %arg10: memref<64x32xf32, #tpu.memory_space<vmem>>, %arg11: memref<1x32xf32, #tpu.memory_space<vmem>>, %arg12: memref<1x16x32xf32, #tpu.memory_space<vmem>>, %arg13: memref<16x64xf32, #tpu.memory_space<vmem>>, %arg14: memref<16x192xf32, #tpu.memory_space<vmem>>) attributes {dimension_semantics = [#tpu.dimension_semantics<parallel>], iteration_bounds = array<i64: 1>, scalar_prefetch = 0 : i64, scratch_operands = 2 : i64, tpu.core_type = #tpu.core_type<tc>, window_params = [{transform_indices = @transform_0, window_bounds = array<i64: 1, 16, 16>}, {pipeline_mode = #tpu.pipeline_mode<synchronous>, transform_indices = @transform_1, window_bounds = array<i64: 16, 192>}, {pipeline_mode = #tpu.pipeline_mode<synchronous>, transform_indices = @transform_2, window_bounds = array<i64: 64, 192>}, {pipeline_mode = #tpu.pipeline_mode<synchronous>, transform_indices = @transform_3, window_bounds = array<i64: 1, 192>}, {pipeline_mode = #tpu.pipeline_mode<synchronous>, transform_indices = @transform_4, window_bounds = array<i64: 1, 64>}, {pipeline_mode = #tpu.pipeline_mode<synchronous>, transform_indices = @transform_5, window_bounds = array<i64: 64, 192>}, {pipeline_mode = #tpu.pipeline_mode<synchronous>, transform_indices = @transform_6, window_bounds = array<i64: 64, 192>}, {pipeline_mode = #tpu.pipeline_mode<synchronous>, transform_indices = @transform_7, window_bounds = array<i64: 1, 192>}, {pipeline_mode = #tpu.pipeline_mode<synchronous>, transform_indices = @transform_8, window_bounds = array<i64: 1, 64>}, {pipeline_mode = #tpu.pipeline_mode<synchronous>, transform_indices = @transform_9, window_bounds = array<i64: 64, 32>}, {pipeline_mode = #tpu.pipeline_mode<synchronous>, transform_indices = @transform_10, window_bounds = array<i64: 1, 32>}, {transform_indices = @transform_11, window_bounds = array<i64: 1, 16, 32>}]} {
    %c0 = arith.constant 0 : index
    %c0_0 = arith.constant 0 : index
    %c0_1 = arith.constant 0 : index
    %0 = vector.load %arg1[%c0, %c0_0, %c0_1] : memref<1x16x16xf32, #tpu.memory_space<vmem>>, vector<1x16x16xf32>
    %1 = vector.shape_cast %0 : vector<1x16x16xf32> to vector<16x16xf32>
    %c0_2 = arith.constant 0 : index
    %c0_3 = arith.constant 0 : index
    %2 = vector.load %arg2[%c0_2, %c0_3] : memref<16x192xf32, #tpu.memory_space<vmem>>, vector<16x192xf32>
    %cst = arith.constant dense<0.000000e+00> : vector<16x192xf32>
    %3 = tpu.matmul %1, %2, %cst {dimension_numbers = #tpu.dot_dimension_numbers<[1], [0], [0], [1], [0, 0, 1, 1], [], []>} : vector<16x16xf32>, vector<16x192xf32>, vector<16x192xf32> -> vector<16x192xf32>
    %c0_4 = arith.constant 0 : index
    %c0_5 = arith.constant 0 : index
    %4 = vector.load %arg4[%c0_4, %c0_5] : memref<1x192xf32, #tpu.memory_space<vmem>>, vector<1x192xf32>
    %5 = vector.broadcast %4 : vector<1x192xf32> to vector<16x192xf32>
    %6 = arith.addf %3, %5 : vector<16x192xf32>
    %c0_6 = arith.constant 0 : index
    %c0_7 = arith.constant 0 : index
    %7 = vector.load %arg14[%c0_6, %c0_7] : memref<16x192xf32, #tpu.memory_space<vmem>>, vector<16x192xf32>
    tpu.vector_store %arg14[%c0_6, %c0_7], %6 {strides = array<i32>} : memref<16x192xf32, #tpu.memory_space<vmem>>, vector<16x192xf32>,
    %c0_8 = arith.constant 0 : index
    %c0_9 = arith.constant 0 : index
    %8 = vector.load %arg3[%c0_8, %c0_9] : memref<64x192xf32, #tpu.memory_space<vmem>>, vector<64x192xf32>
    %c0_10 = arith.constant 0 : index
    %c0_11 = arith.constant 0 : index
    %9 = vector.load %arg5[%c0_10, %c0_11] : memref<1x64xf32, #tpu.memory_space<vmem>>, vector<1x32xf32>
    %10 = vector.shape_cast %9 : vector<1x32xf32> to vector<1x32xf32>
    %11 = vector.broadcast %10 : vector<1x32xf32> to vector<2x32xf32>
    %c0_12 = arith.constant 0 : index
    %c32 = arith.constant 32 : index
    %12 = vector.load %arg5[%c0_12, %c32] : memref<1x64xf32, #tpu.memory_space<vmem>>, vector<1x32xf32>
    %13 = vector.shape_cast %12 : vector<1x32xf32> to vector<1x32xf32>
    %14 = vector.broadcast %13 : vector<1x32xf32> to vector<2x32xf32>
    %cst_13 = arith.constant 0.000000e+00 : f32
    %15 = vector.broadcast %cst_13 : f32 to vector<2x32xf32>
    %cst_14 = arith.constant 0.000000e+00 : f32
    %16 = vector.broadcast %cst_14 : f32 to vector<2x32xf32>
    %c0_15 = arith.constant 0 : index
    %c0_16 = arith.constant 0 : index
    %17 = vector.load %arg14[%c0_15, %c0_16] : memref<16x192xf32, #tpu.memory_space<vmem>>, vector<2x96xf32>
    %c14 = arith.constant 14 : index
    %c96 = arith.constant 96 : index
    %18 = vector.load %arg14[%c14, %c96] : memref<16x192xf32, #tpu.memory_space<vmem>>, vector<2x96xf32>
    %19 = tpu.concatenate %15, %16 in 1 : vector<2x32xf32>, vector<2x32xf32> -> vector<2x64xf32>
    %cst_17 = arith.constant dense<0.000000e+00> : vector<2x192xf32>
    %20 = tpu.matmul %19, %8, %cst_17 {dimension_numbers = #tpu.dot_dimension_numbers<[1], [0], [0], [1], [0, 0, 1, 1], [], []>} : vector<2x64xf32>, vector<64x192xf32>, vector<2x192xf32> -> vector<2x192xf32>
    %21 = vector.extract_strided_slice %17 {offsets = [0, 0], sizes = [2, 32], strides = [1, 1]} : vector<2x96xf32> to vector<2x32xf32>
    %22 = vector.extract_strided_slice %20 {offsets = [0, 0], sizes = [2, 32], strides = [1, 1]} : vector<2x192xf32> to vector<2x32xf32>
    %23 = arith.addf %21, %22 : vector<2x32xf32>
    %24 = arith.negf %23 : vector<2x32xf32>
    %25 = math.exp %24 : vector<2x32xf32>
    %cst_18 = arith.constant 1.000000e+00 : f32
    %26 = vector.broadcast %cst_18 : f32 to vector<2x32xf32>
    %27 = arith.addf %26, %25 : vector<2x32xf32>
    %28 = arith.divf %26, %27 : vector<2x32xf32>
    %29 = vector.extract_strided_slice %17 {offsets = [0, 32], sizes = [2, 32], strides = [1, 1]} : vector<2x96xf32> to vector<2x32xf32>
    %30 = vector.extract_strided_slice %20 {offsets = [0, 32], sizes = [2, 32], strides = [1, 1]} : vector<2x192xf32> to vector<2x32xf32>
    %31 = arith.addf %29, %30 : vector<2x32xf32>
    %32 = arith.negf %31 : vector<2x32xf32>
    %33 = math.exp %32 : vector<2x32xf32>
    %cst_19 = arith.constant 1.000000e+00 : f32
    %34 = vector.broadcast %cst_19 : f32 to vector<2x32xf32>
    %35 = arith.addf %34, %33 : vector<2x32xf32>
    %36 = arith.divf %34, %35 : vector<2x32xf32>
    %37 = vector.extract_strided_slice %17 {offsets = [0, 64], sizes = [2, 32], strides = [1, 1]} : vector<2x96xf32> to vector<2x32xf32>
    %38 = vector.extract_strided_slice %20 {offsets = [0, 64], sizes = [2, 32], strides = [1, 1]} : vector<2x192xf32> to vector<2x32xf32>
    %39 = arith.addf %38, %11 : vector<2x32xf32>
    %40 = arith.mulf %28, %39 : vector<2x32xf32>
    %41 = arith.addf %37, %40 : vector<2x32xf32>
    %42 = math.tanh %41 : vector<2x32xf32>
    %cst_20 = arith.constant 1.000000e+00 : f32
    %43 = vector.broadcast %cst_20 : f32 to vector<2x32xf32>
    %44 = arith.subf %43, %36 : vector<2x32xf32>
    %45 = arith.mulf %44, %42 : vector<2x32xf32>
    %46 = arith.mulf %36, %15 : vector<2x32xf32>
    %47 = arith.addf %45, %46 : vector<2x32xf32>
    %48 = vector.extract_strided_slice %18 {offsets = [0, 0], sizes = [2, 32], strides = [1, 1]} : vector<2x96xf32> to vector<2x32xf32>
    %49 = vector.extract_strided_slice %20 {offsets = [0, 96], sizes = [2, 32], strides = [1, 1]} : vector<2x192xf32> to vector<2x32xf32>
    %50 = arith.addf %48, %49 : vector<2x32xf32>
    %51 = arith.negf %50 : vector<2x32xf32>
    %52 = math.exp %51 : vector<2x32xf32>
    %cst_21 = arith.constant 1.000000e+00 : f32
    %53 = vector.broadcast %cst_21 : f32 to vector<2x32xf32>
    %54 = arith.addf %53, %52 : vector<2x32xf32>
    %55 = arith.divf %53, %54 : vector<2x32xf32>
    %56 = vector.extract_strided_slice %18 {offsets = [0, 32], sizes = [2, 32], strides = [1, 1]} : vector<2x96xf32> to vector<2x32xf32>
    %57 = vector.extract_strided_slice %20 {offsets = [0, 128], sizes = [2, 32], strides = [1, 1]} : vector<2x192xf32> to vector<2x32xf32>
    %58 = arith.addf %56, %57 : vector<2x32xf32>
    %59 = arith.negf %58 : vector<2x32xf32>
    %60 = math.exp %59 : vector<2x32xf32>
    %cst_22 = arith.constant 1.000000e+00 : f32
    %61 = vector.broadcast %cst_22 : f32 to vector<2x32xf32>
    %62 = arith.addf %61, %60 : vector<2x32xf32>
    %63 = arith.divf %61, %62 : vector<2x32xf32>
    %64 = vector.extract_strided_slice %18 {offsets = [0, 64], sizes = [2, 32], strides = [1, 1]} : vector<2x96xf32> to vector<2x32xf32>
    %65 = vector.extract_strided_slice %20 {offsets = [0, 160], sizes = [2, 32], strides = [1, 1]} : vector<2x192xf32> to vector<2x32xf32>
    %66 = arith.addf %65, %14 : vector<2x32xf32>
    %67 = arith.mulf %55, %66 : vector<2x32xf32>
    %68 = arith.addf %64, %67 : vector<2x32xf32>
    %69 = math.tanh %68 : vector<2x32xf32>
    %cst_23 = arith.constant 1.000000e+00 : f32
    %70 = vector.broadcast %cst_23 : f32 to vector<2x32xf32>
    %71 = arith.subf %70, %63 : vector<2x32xf32>
    %72 = arith.mulf %71, %69 : vector<2x32xf32>
    %73 = arith.mulf %63, %16 : vector<2x32xf32>
    %74 = arith.addf %72, %73 : vector<2x32xf32>
    %c0_24 = arith.constant 0 : index
    %c0_25 = arith.constant 0 : index
    %75 = vector.load %arg13[%c0_24, %c0_25] : memref<16x64xf32, #tpu.memory_space<vmem>>, vector<2x32xf32>
    tpu.vector_store %arg13[%c0_24, %c0_25], %47 {strides = array<i32>} : memref<16x64xf32, #tpu.memory_space<vmem>>, vector<2x32xf32>,
    %c14_26 = arith.constant 14 : index
    %c32_27 = arith.constant 32 : index
    %76 = vector.load %arg13[%c14_26, %c32_27] : memref<16x64xf32, #tpu.memory_space<vmem>>, vector<2x32xf32>
    tpu.vector_store %arg13[%c14_26, %c32_27], %74 {strides = array<i32>} : memref<16x64xf32, #tpu.memory_space<vmem>>, vector<2x32xf32>,
    %c2 = arith.constant 2 : index
    %c0_28 = arith.constant 0 : index
    %77 = vector.load %arg14[%c2, %c0_28] : memref<16x192xf32, #tpu.memory_space<vmem>>, vector<2x96xf32>
    %c12 = arith.constant 12 : index
    %c96_29 = arith.constant 96 : index
    %78 = vector.load %arg14[%c12, %c96_29] : memref<16x192xf32, #tpu.memory_space<vmem>>, vector<2x96xf32>
    %79 = tpu.concatenate %47, %74 in 1 : vector<2x32xf32>, vector<2x32xf32> -> vector<2x64xf32>
    %cst_30 = arith.constant dense<0.000000e+00> : vector<2x192xf32>
    %80 = tpu.matmul %79, %8, %cst_30 {dimension_numbers = #tpu.dot_dimension_numbers<[1], [0], [0], [1], [0, 0, 1, 1], [], []>} : vector<2x64xf32>, vector<64x192xf32>, vector<2x192xf32> -> vector<2x192xf32>
    %81 = vector.extract_strided_slice %77 {offsets = [0, 0], sizes = [2, 32], strides = [1, 1]} : vector<2x96xf32> to vector<2x32xf32>
    %82 = vector.extract_strided_slice %80 {offsets = [0, 0], sizes = [2, 32], strides = [1, 1]} : vector<2x192xf32> to vector<2x32xf32>
    %83 = arith.addf %81, %82 : vector<2x32xf32>
    %84 = arith.negf %83 : vector<2x32xf32>
    %85 = math.exp %84 : vector<2x32xf32>
    %cst_31 = arith.constant 1.000000e+00 : f32
    %86 = vector.broadcast %cst_31 : f32 to vector<2x32xf32>
    %87 = arith.addf %86, %85 : vector<2x32xf32>
    %88 = arith.divf %86, %87 : vector<2x32xf32>
    %89 = vector.extract_strided_slice %77 {offsets = [0, 32], sizes = [2, 32], strides = [1, 1]} : vector<2x96xf32> to vector<2x32xf32>
    %90 = vector.extract_strided_slice %80 {offsets = [0, 32], sizes = [2, 32], strides = [1, 1]} : vector<2x192xf32> to vector<2x32xf32>
    %91 = arith.addf %89, %90 : vector<2x32xf32>
    %92 = arith.negf %91 : vector<2x32xf32>
    %93 = math.exp %92 : vector<2x32xf32>
    %cst_32 = arith.constant 1.000000e+00 : f32
    %94 = vector.broadcast %cst_32 : f32 to vector<2x32xf32>
    %95 = arith.addf %94, %93 : vector<2x32xf32>
    %96 = arith.divf %94, %95 : vector<2x32xf32>
    %97 = vector.extract_strided_slice %77 {offsets = [0, 64], sizes = [2, 32], strides = [1, 1]} : vector<2x96xf32> to vector<2x32xf32>
    %98 = vector.extract_strided_slice %80 {offsets = [0, 64], sizes = [2, 32], strides = [1, 1]} : vector<2x192xf32> to vector<2x32xf32>
    %99 = arith.addf %98, %11 : vector<2x32xf32>
    %100 = arith.mulf %88, %99 : vector<2x32xf32>
    %101 = arith.addf %97, %100 : vector<2x32xf32>
    %102 = math.tanh %101 : vector<2x32xf32>
    %cst_33 = arith.constant 1.000000e+00 : f32
    %103 = vector.broadcast %cst_33 : f32 to vector<2x32xf32>
    %104 = arith.subf %103, %96 : vector<2x32xf32>
    %105 = arith.mulf %104, %102 : vector<2x32xf32>
    %106 = arith.mulf %96, %47 : vector<2x32xf32>
    %107 = arith.addf %105, %106 : vector<2x32xf32>
    %108 = vector.extract_strided_slice %78 {offsets = [0, 0], sizes = [2, 32], strides = [1, 1]} : vector<2x96xf32> to vector<2x32xf32>
    %109 = vector.extract_strided_slice %80 {offsets = [0, 96], sizes = [2, 32], strides = [1, 1]} : vector<2x192xf32> to vector<2x32xf32>
    %110 = arith.addf %108, %109 : vector<2x32xf32>
    %111 = arith.negf %110 : vector<2x32xf32>
    %112 = math.exp %111 : vector<2x32xf32>
    %cst_34 = arith.constant 1.000000e+00 : f32
    %113 = vector.broadcast %cst_34 : f32 to vector<2x32xf32>
    %114 = arith.addf %113, %112 : vector<2x32xf32>
    %115 = arith.divf %113, %114 : vector<2x32xf32>
    %116 = vector.extract_strided_slice %78 {offsets = [0, 32], sizes = [2, 32], strides = [1, 1]} : vector<2x96xf32> to vector<2x32xf32>
    %117 = vector.extract_strided_slice %80 {offsets = [0, 128], sizes = [2, 32], strides = [1, 1]} : vector<2x192xf32> to vector<2x32xf32>
    %118 = arith.addf %116, %117 : vector<2x32xf32>
    %119 = arith.negf %118 : vector<2x32xf32>
    %120 = math.exp %119 : vector<2x32xf32>
    %cst_35 = arith.constant 1.000000e+00 : f32
    %121 = vector.broadcast %cst_35 : f32 to vector<2x32xf32>
    %122 = arith.addf %121, %120 : vector<2x32xf32>
    %123 = arith.divf %121, %122 : vector<2x32xf32>
    %124 = vector.extract_strided_slice %78 {offsets = [0, 64], sizes = [2, 32], strides = [1, 1]} : vector<2x96xf32> to vector<2x32xf32>
    %125 = vector.extract_strided_slice %80 {offsets = [0, 160], sizes = [2, 32], strides = [1, 1]} : vector<2x192xf32> to vector<2x32xf32>
    %126 = arith.addf %125, %14 : vector<2x32xf32>
    %127 = arith.mulf %115, %126 : vector<2x32xf32>
    %128 = arith.addf %124, %127 : vector<2x32xf32>
    %129 = math.tanh %128 : vector<2x32xf32>
    %cst_36 = arith.constant 1.000000e+00 : f32
    %130 = vector.broadcast %cst_36 : f32 to vector<2x32xf32>
    %131 = arith.subf %130, %123 : vector<2x32xf32>
    %132 = arith.mulf %131, %129 : vector<2x32xf32>
    %133 = arith.mulf %123, %74 : vector<2x32xf32>
    %134 = arith.addf %132, %133 : vector<2x32xf32>
    %c2_37 = arith.constant 2 : index
    %c0_38 = arith.constant 0 : index
    %135 = vector.load %arg13[%c2_37, %c0_38] : memref<16x64xf32, #tpu.memory_space<vmem>>, vector<2x32xf32>
    tpu.vector_store %arg13[%c2_37, %c0_38], %107 {strides = array<i32>} : memref<16x64xf32, #tpu.memory_space<vmem>>, vector<2x32xf32>,
    %c12_39 = arith.constant 12 : index
    %c32_40 = arith.constant 32 : index
    %136 = vector.load %arg13[%c12_39, %c32_40] : memref<16x64xf32, #tpu.memory_space<vmem>>, vector<2x32xf32>
    tpu.vector_store %arg13[%c12_39, %c32_40], %134 {strides = array<i32>} : memref<16x64xf32, #tpu.memory_space<vmem>>, vector<2x32xf32>,
    %c4 = arith.constant 4 : index
    %c0_41 = arith.constant 0 : index
    %137 = vector.load %arg14[%c4, %c0_41] : memref<16x192xf32, #tpu.memory_space<vmem>>, vector<2x96xf32>
    %c10 = arith.constant 10 : index
    %c96_42 = arith.constant 96 : index
    %138 = vector.load %arg14[%c10, %c96_42] : memref<16x192xf32, #tpu.memory_space<vmem>>, vector<2x96xf32>
    %139 = tpu.concatenate %107, %134 in 1 : vector<2x32xf32>, vector<2x32xf32> -> vector<2x64xf32>
    %cst_43 = arith.constant dense<0.000000e+00> : vector<2x192xf32>
    %140 = tpu.matmul %139, %8, %cst_43 {dimension_numbers = #tpu.dot_dimension_numbers<[1], [0], [0], [1], [0, 0, 1, 1], [], []>} : vector<2x64xf32>, vector<64x192xf32>, vector<2x192xf32> -> vector<2x192xf32>
    %141 = vector.extract_strided_slice %137 {offsets = [0, 0], sizes = [2, 32], strides = [1, 1]} : vector<2x96xf32> to vector<2x32xf32>
    %142 = vector.extract_strided_slice %140 {offsets = [0, 0], sizes = [2, 32], strides = [1, 1]} : vector<2x192xf32> to vector<2x32xf32>
    %143 = arith.addf %141, %142 : vector<2x32xf32>
    %144 = arith.negf %143 : vector<2x32xf32>
    %145 = math.exp %144 : vector<2x32xf32>
    %cst_44 = arith.constant 1.000000e+00 : f32
    %146 = vector.broadcast %cst_44 : f32 to vector<2x32xf32>
    %147 = arith.addf %146, %145 : vector<2x32xf32>
    %148 = arith.divf %146, %147 : vector<2x32xf32>
    %149 = vector.extract_strided_slice %137 {offsets = [0, 32], sizes = [2, 32], strides = [1, 1]} : vector<2x96xf32> to vector<2x32xf32>
    %150 = vector.extract_strided_slice %140 {offsets = [0, 32], sizes = [2, 32], strides = [1, 1]} : vector<2x192xf32> to vector<2x32xf32>
    %151 = arith.addf %149, %150 : vector<2x32xf32>
    %152 = arith.negf %151 : vector<2x32xf32>
    %153 = math.exp %152 : vector<2x32xf32>
    %cst_45 = arith.constant 1.000000e+00 : f32
    %154 = vector.broadcast %cst_45 : f32 to vector<2x32xf32>
    %155 = arith.addf %154, %153 : vector<2x32xf32>
    %156 = arith.divf %154, %155 : vector<2x32xf32>
    %157 = vector.extract_strided_slice %137 {offsets = [0, 64], sizes = [2, 32], strides = [1, 1]} : vector<2x96xf32> to vector<2x32xf32>
    %158 = vector.extract_strided_slice %140 {offsets = [0, 64], sizes = [2, 32], strides = [1, 1]} : vector<2x192xf32> to vector<2x32xf32>
    %159 = arith.addf %158, %11 : vector<2x32xf32>
    %160 = arith.mulf %148, %159 : vector<2x32xf32>
    %161 = arith.addf %157, %160 : vector<2x32xf32>
    %162 = math.tanh %161 : vector<2x32xf32>
    %cst_46 = arith.constant 1.000000e+00 : f32
    %163 = vector.broadcast %cst_46 : f32 to vector<2x32xf32>
    %164 = arith.subf %163, %156 : vector<2x32xf32>
    %165 = arith.mulf %164, %162 : vector<2x32xf32>
    %166 = arith.mulf %156, %107 : vector<2x32xf32>
    %167 = arith.addf %165, %166 : vector<2x32xf32>
    %168 = vector.extract_strided_slice %138 {offsets = [0, 0], sizes = [2, 32], strides = [1, 1]} : vector<2x96xf32> to vector<2x32xf32>
    %169 = vector.extract_strided_slice %140 {offsets = [0, 96], sizes = [2, 32], strides = [1, 1]} : vector<2x192xf32> to vector<2x32xf32>
    %170 = arith.addf %168, %169 : vector<2x32xf32>
    %171 = arith.negf %170 : vector<2x32xf32>
    %172 = math.exp %171 : vector<2x32xf32>
    %cst_47 = arith.constant 1.000000e+00 : f32
    %173 = vector.broadcast %cst_47 : f32 to vector<2x32xf32>
    %174 = arith.addf %173, %172 : vector<2x32xf32>
    %175 = arith.divf %173, %174 : vector<2x32xf32>
    %176 = vector.extract_strided_slice %138 {offsets = [0, 32], sizes = [2, 32], strides = [1, 1]} : vector<2x96xf32> to vector<2x32xf32>
    %177 = vector.extract_strided_slice %140 {offsets = [0, 128], sizes = [2, 32], strides = [1, 1]} : vector<2x192xf32> to vector<2x32xf32>
    %178 = arith.addf %176, %177 : vector<2x32xf32>
    %179 = arith.negf %178 : vector<2x32xf32>
    %180 = math.exp %179 : vector<2x32xf32>
    %cst_48 = arith.constant 1.000000e+00 : f32
    %181 = vector.broadcast %cst_48 : f32 to vector<2x32xf32>
    %182 = arith.addf %181, %180 : vector<2x32xf32>
    %183 = arith.divf %181, %182 : vector<2x32xf32>
    %184 = vector.extract_strided_slice %138 {offsets = [0, 64], sizes = [2, 32], strides = [1, 1]} : vector<2x96xf32> to vector<2x32xf32>
    %185 = vector.extract_strided_slice %140 {offsets = [0, 160], sizes = [2, 32], strides = [1, 1]} : vector<2x192xf32> to vector<2x32xf32>
    %186 = arith.addf %185, %14 : vector<2x32xf32>
    %187 = arith.mulf %175, %186 : vector<2x32xf32>
    %188 = arith.addf %184, %187 : vector<2x32xf32>
    %189 = math.tanh %188 : vector<2x32xf32>
    %cst_49 = arith.constant 1.000000e+00 : f32
    %190 = vector.broadcast %cst_49 : f32 to vector<2x32xf32>
    %191 = arith.subf %190, %183 : vector<2x32xf32>
    %192 = arith.mulf %191, %189 : vector<2x32xf32>
    %193 = arith.mulf %183, %134 : vector<2x32xf32>
    %194 = arith.addf %192, %193 : vector<2x32xf32>
    %c4_50 = arith.constant 4 : index
    %c0_51 = arith.constant 0 : index
    %195 = vector.load %arg13[%c4_50, %c0_51] : memref<16x64xf32, #tpu.memory_space<vmem>>, vector<2x32xf32>
    tpu.vector_store %arg13[%c4_50, %c0_51], %167 {strides = array<i32>} : memref<16x64xf32, #tpu.memory_space<vmem>>, vector<2x32xf32>,
    %c10_52 = arith.constant 10 : index
    %c32_53 = arith.constant 32 : index
    %196 = vector.load %arg13[%c10_52, %c32_53] : memref<16x64xf32, #tpu.memory_space<vmem>>, vector<2x32xf32>
    tpu.vector_store %arg13[%c10_52, %c32_53], %194 {strides = array<i32>} : memref<16x64xf32, #tpu.memory_space<vmem>>, vector<2x32xf32>,
    %c6 = arith.constant 6 : index
    %c0_54 = arith.constant 0 : index
    %197 = vector.load %arg14[%c6, %c0_54] : memref<16x192xf32, #tpu.memory_space<vmem>>, vector<2x96xf32>
    %c8 = arith.constant 8 : index
    %c96_55 = arith.constant 96 : index
    %198 = vector.load %arg14[%c8, %c96_55] : memref<16x192xf32, #tpu.memory_space<vmem>>, vector<2x96xf32>
    %199 = tpu.concatenate %167, %194 in 1 : vector<2x32xf32>, vector<2x32xf32> -> vector<2x64xf32>
    %cst_56 = arith.constant dense<0.000000e+00> : vector<2x192xf32>
    %200 = tpu.matmul %199, %8, %cst_56 {dimension_numbers = #tpu.dot_dimension_numbers<[1], [0], [0], [1], [0, 0, 1, 1], [], []>} : vector<2x64xf32>, vector<64x192xf32>, vector<2x192xf32> -> vector<2x192xf32>
    %201 = vector.extract_strided_slice %197 {offsets = [0, 0], sizes = [2, 32], strides = [1, 1]} : vector<2x96xf32> to vector<2x32xf32>
    %202 = vector.extract_strided_slice %200 {offsets = [0, 0], sizes = [2, 32], strides = [1, 1]} : vector<2x192xf32> to vector<2x32xf32>
    %203 = arith.addf %201, %202 : vector<2x32xf32>
    %204 = arith.negf %203 : vector<2x32xf32>
    %205 = math.exp %204 : vector<2x32xf32>
    %cst_57 = arith.constant 1.000000e+00 : f32
    %206 = vector.broadcast %cst_57 : f32 to vector<2x32xf32>
    %207 = arith.addf %206, %205 : vector<2x32xf32>
    %208 = arith.divf %206, %207 : vector<2x32xf32>
    %209 = vector.extract_strided_slice %197 {offsets = [0, 32], sizes = [2, 32], strides = [1, 1]} : vector<2x96xf32> to vector<2x32xf32>
    %210 = vector.extract_strided_slice %200 {offsets = [0, 32], sizes = [2, 32], strides = [1, 1]} : vector<2x192xf32> to vector<2x32xf32>
    %211 = arith.addf %209, %210 : vector<2x32xf32>
    %212 = arith.negf %211 : vector<2x32xf32>
    %213 = math.exp %212 : vector<2x32xf32>
    %cst_58 = arith.constant 1.000000e+00 : f32
    %214 = vector.broadcast %cst_58 : f32 to vector<2x32xf32>
    %215 = arith.addf %214, %213 : vector<2x32xf32>
    %216 = arith.divf %214, %215 : vector<2x32xf32>
    %217 = vector.extract_strided_slice %197 {offsets = [0, 64], sizes = [2, 32], strides = [1, 1]} : vector<2x96xf32> to vector<2x32xf32>
    %218 = vector.extract_strided_slice %200 {offsets = [0, 64], sizes = [2, 32], strides = [1, 1]} : vector<2x192xf32> to vector<2x32xf32>
    %219 = arith.addf %218, %11 : vector<2x32xf32>
    %220 = arith.mulf %208, %219 : vector<2x32xf32>
    %221 = arith.addf %217, %220 : vector<2x32xf32>
    %222 = math.tanh %221 : vector<2x32xf32>
    %cst_59 = arith.constant 1.000000e+00 : f32
    %223 = vector.broadcast %cst_59 : f32 to vector<2x32xf32>
    %224 = arith.subf %223, %216 : vector<2x32xf32>
    %225 = arith.mulf %224, %222 : vector<2x32xf32>
    %226 = arith.mulf %216, %167 : vector<2x32xf32>
    %227 = arith.addf %225, %226 : vector<2x32xf32>
    %228 = vector.extract_strided_slice %198 {offsets = [0, 0], sizes = [2, 32], strides = [1, 1]} : vector<2x96xf32> to vector<2x32xf32>
    %229 = vector.extract_strided_slice %200 {offsets = [0, 96], sizes = [2, 32], strides = [1, 1]} : vector<2x192xf32> to vector<2x32xf32>
    %230 = arith.addf %228, %229 : vector<2x32xf32>
    %231 = arith.negf %230 : vector<2x32xf32>
    %232 = math.exp %231 : vector<2x32xf32>
    %cst_60 = arith.constant 1.000000e+00 : f32
    %233 = vector.broadcast %cst_60 : f32 to vector<2x32xf32>
    %234 = arith.addf %233, %232 : vector<2x32xf32>
    %235 = arith.divf %233, %234 : vector<2x32xf32>
    %236 = vector.extract_strided_slice %198 {offsets = [0, 32], sizes = [2, 32], strides = [1, 1]} : vector<2x96xf32> to vector<2x32xf32>
    %237 = vector.extract_strided_slice %200 {offsets = [0, 128], sizes = [2, 32], strides = [1, 1]} : vector<2x192xf32> to vector<2x32xf32>
    %238 = arith.addf %236, %237 : vector<2x32xf32>
    %239 = arith.negf %238 : vector<2x32xf32>
    %240 = math.exp %239 : vector<2x32xf32>
    %cst_61 = arith.constant 1.000000e+00 : f32
    %241 = vector.broadcast %cst_61 : f32 to vector<2x32xf32>
    %242 = arith.addf %241, %240 : vector<2x32xf32>
    %243 = arith.divf %241, %242 : vector<2x32xf32>
    %244 = vector.extract_strided_slice %198 {offsets = [0, 64], sizes = [2, 32], strides = [1, 1]} : vector<2x96xf32> to vector<2x32xf32>
    %245 = vector.extract_strided_slice %200 {offsets = [0, 160], sizes = [2, 32], strides = [1, 1]} : vector<2x192xf32> to vector<2x32xf32>
    %246 = arith.addf %245, %14 : vector<2x32xf32>
    %247 = arith.mulf %235, %246 : vector<2x32xf32>
    %248 = arith.addf %244, %247 : vector<2x32xf32>
    %249 = math.tanh %248 : vector<2x32xf32>
    %cst_62 = arith.constant 1.000000e+00 : f32
    %250 = vector.broadcast %cst_62 : f32 to vector<2x32xf32>
    %251 = arith.subf %250, %243 : vector<2x32xf32>
    %252 = arith.mulf %251, %249 : vector<2x32xf32>
    %253 = arith.mulf %243, %194 : vector<2x32xf32>
    %254 = arith.addf %252, %253 : vector<2x32xf32>
    %c6_63 = arith.constant 6 : index
    %c0_64 = arith.constant 0 : index
    %255 = vector.load %arg13[%c6_63, %c0_64] : memref<16x64xf32, #tpu.memory_space<vmem>>, vector<2x32xf32>
    tpu.vector_store %arg13[%c6_63, %c0_64], %227 {strides = array<i32>} : memref<16x64xf32, #tpu.memory_space<vmem>>, vector<2x32xf32>,
    %c8_65 = arith.constant 8 : index
    %c32_66 = arith.constant 32 : index
    %256 = vector.load %arg13[%c8_65, %c32_66] : memref<16x64xf32, #tpu.memory_space<vmem>>, vector<2x32xf32>
    tpu.vector_store %arg13[%c8_65, %c32_66], %254 {strides = array<i32>} : memref<16x64xf32, #tpu.memory_space<vmem>>, vector<2x32xf32>,
    %c8_67 = arith.constant 8 : index
    %c0_68 = arith.constant 0 : index
    %257 = vector.load %arg14[%c8_67, %c0_68] : memref<16x192xf32, #tpu.memory_space<vmem>>, vector<2x96xf32>
    %c6_69 = arith.constant 6 : index
    %c96_70 = arith.constant 96 : index
    %258 = vector.load %arg14[%c6_69, %c96_70] : memref<16x192xf32, #tpu.memory_space<vmem>>, vector<2x96xf32>
    %259 = tpu.concatenate %227, %254 in 1 : vector<2x32xf32>, vector<2x32xf32> -> vector<2x64xf32>
    %cst_71 = arith.constant dense<0.000000e+00> : vector<2x192xf32>
    %260 = tpu.matmul %259, %8, %cst_71 {dimension_numbers = #tpu.dot_dimension_numbers<[1], [0], [0], [1], [0, 0, 1, 1], [], []>} : vector<2x64xf32>, vector<64x192xf32>, vector<2x192xf32> -> vector<2x192xf32>
    %261 = vector.extract_strided_slice %257 {offsets = [0, 0], sizes = [2, 32], strides = [1, 1]} : vector<2x96xf32> to vector<2x32xf32>
    %262 = vector.extract_strided_slice %260 {offsets = [0, 0], sizes = [2, 32], strides = [1, 1]} : vector<2x192xf32> to vector<2x32xf32>
    %263 = arith.addf %261, %262 : vector<2x32xf32>
    %264 = arith.negf %263 : vector<2x32xf32>
    %265 = math.exp %264 : vector<2x32xf32>
    %cst_72 = arith.constant 1.000000e+00 : f32
    %266 = vector.broadcast %cst_72 : f32 to vector<2x32xf32>
    %267 = arith.addf %266, %265 : vector<2x32xf32>
    %268 = arith.divf %266, %267 : vector<2x32xf32>
    %269 = vector.extract_strided_slice %257 {offsets = [0, 32], sizes = [2, 32], strides = [1, 1]} : vector<2x96xf32> to vector<2x32xf32>
    %270 = vector.extract_strided_slice %260 {offsets = [0, 32], sizes = [2, 32], strides = [1, 1]} : vector<2x192xf32> to vector<2x32xf32>
    %271 = arith.addf %269, %270 : vector<2x32xf32>
    %272 = arith.negf %271 : vector<2x32xf32>
    %273 = math.exp %272 : vector<2x32xf32>
    %cst_73 = arith.constant 1.000000e+00 : f32
    %274 = vector.broadcast %cst_73 : f32 to vector<2x32xf32>
    %275 = arith.addf %274, %273 : vector<2x32xf32>
    %276 = arith.divf %274, %275 : vector<2x32xf32>
    %277 = vector.extract_strided_slice %257 {offsets = [0, 64], sizes = [2, 32], strides = [1, 1]} : vector<2x96xf32> to vector<2x32xf32>
    %278 = vector.extract_strided_slice %260 {offsets = [0, 64], sizes = [2, 32], strides = [1, 1]} : vector<2x192xf32> to vector<2x32xf32>
    %279 = arith.addf %278, %11 : vector<2x32xf32>
    %280 = arith.mulf %268, %279 : vector<2x32xf32>
    %281 = arith.addf %277, %280 : vector<2x32xf32>
    %282 = math.tanh %281 : vector<2x32xf32>
    %cst_74 = arith.constant 1.000000e+00 : f32
    %283 = vector.broadcast %cst_74 : f32 to vector<2x32xf32>
    %284 = arith.subf %283, %276 : vector<2x32xf32>
    %285 = arith.mulf %284, %282 : vector<2x32xf32>
    %286 = arith.mulf %276, %227 : vector<2x32xf32>
    %287 = arith.addf %285, %286 : vector<2x32xf32>
    %288 = vector.extract_strided_slice %258 {offsets = [0, 0], sizes = [2, 32], strides = [1, 1]} : vector<2x96xf32> to vector<2x32xf32>
    %289 = vector.extract_strided_slice %260 {offsets = [0, 96], sizes = [2, 32], strides = [1, 1]} : vector<2x192xf32> to vector<2x32xf32>
    %290 = arith.addf %288, %289 : vector<2x32xf32>
    %291 = arith.negf %290 : vector<2x32xf32>
    %292 = math.exp %291 : vector<2x32xf32>
    %cst_75 = arith.constant 1.000000e+00 : f32
    %293 = vector.broadcast %cst_75 : f32 to vector<2x32xf32>
    %294 = arith.addf %293, %292 : vector<2x32xf32>
    %295 = arith.divf %293, %294 : vector<2x32xf32>
    %296 = vector.extract_strided_slice %258 {offsets = [0, 32], sizes = [2, 32], strides = [1, 1]} : vector<2x96xf32> to vector<2x32xf32>
    %297 = vector.extract_strided_slice %260 {offsets = [0, 128], sizes = [2, 32], strides = [1, 1]} : vector<2x192xf32> to vector<2x32xf32>
    %298 = arith.addf %296, %297 : vector<2x32xf32>
    %299 = arith.negf %298 : vector<2x32xf32>
    %300 = math.exp %299 : vector<2x32xf32>
    %cst_76 = arith.constant 1.000000e+00 : f32
    %301 = vector.broadcast %cst_76 : f32 to vector<2x32xf32>
    %302 = arith.addf %301, %300 : vector<2x32xf32>
    %303 = arith.divf %301, %302 : vector<2x32xf32>
    %304 = vector.extract_strided_slice %258 {offsets = [0, 64], sizes = [2, 32], strides = [1, 1]} : vector<2x96xf32> to vector<2x32xf32>
    %305 = vector.extract_strided_slice %260 {offsets = [0, 160], sizes = [2, 32], strides = [1, 1]} : vector<2x192xf32> to vector<2x32xf32>
    %306 = arith.addf %305, %14 : vector<2x32xf32>
    %307 = arith.mulf %295, %306 : vector<2x32xf32>
    %308 = arith.addf %304, %307 : vector<2x32xf32>
    %309 = math.tanh %308 : vector<2x32xf32>
    %cst_77 = arith.constant 1.000000e+00 : f32
    %310 = vector.broadcast %cst_77 : f32 to vector<2x32xf32>
    %311 = arith.subf %310, %303 : vector<2x32xf32>
    %312 = arith.mulf %311, %309 : vector<2x32xf32>
    %313 = arith.mulf %303, %254 : vector<2x32xf32>
    %314 = arith.addf %312, %313 : vector<2x32xf32>
    %c8_78 = arith.constant 8 : index
    %c0_79 = arith.constant 0 : index
    %315 = vector.load %arg13[%c8_78, %c0_79] : memref<16x64xf32, #tpu.memory_space<vmem>>, vector<2x32xf32>
    tpu.vector_store %arg13[%c8_78, %c0_79], %287 {strides = array<i32>} : memref<16x64xf32, #tpu.memory_space<vmem>>, vector<2x32xf32>,
    %c6_80 = arith.constant 6 : index
    %c32_81 = arith.constant 32 : index
    %316 = vector.load %arg13[%c6_80, %c32_81] : memref<16x64xf32, #tpu.memory_space<vmem>>, vector<2x32xf32>
    tpu.vector_store %arg13[%c6_80, %c32_81], %314 {strides = array<i32>} : memref<16x64xf32, #tpu.memory_space<vmem>>, vector<2x32xf32>,
    %c10_82 = arith.constant 10 : index
    %c0_83 = arith.constant 0 : index
    %317 = vector.load %arg14[%c10_82, %c0_83] : memref<16x192xf32, #tpu.memory_space<vmem>>, vector<2x96xf32>
    %c4_84 = arith.constant 4 : index
    %c96_85 = arith.constant 96 : index
    %318 = vector.load %arg14[%c4_84, %c96_85] : memref<16x192xf32, #tpu.memory_space<vmem>>, vector<2x96xf32>
    %319 = tpu.concatenate %287, %314 in 1 : vector<2x32xf32>, vector<2x32xf32> -> vector<2x64xf32>
    %cst_86 = arith.constant dense<0.000000e+00> : vector<2x192xf32>
    %320 = tpu.matmul %319, %8, %cst_86 {dimension_numbers = #tpu.dot_dimension_numbers<[1], [0], [0], [1], [0, 0, 1, 1], [], []>} : vector<2x64xf32>, vector<64x192xf32>, vector<2x192xf32> -> vector<2x192xf32>
    %321 = vector.extract_strided_slice %317 {offsets = [0, 0], sizes = [2, 32], strides = [1, 1]} : vector<2x96xf32> to vector<2x32xf32>
    %322 = vector.extract_strided_slice %320 {offsets = [0, 0], sizes = [2, 32], strides = [1, 1]} : vector<2x192xf32> to vector<2x32xf32>
    %323 = arith.addf %321, %322 : vector<2x32xf32>
    %324 = arith.negf %323 : vector<2x32xf32>
    %325 = math.exp %324 : vector<2x32xf32>
    %cst_87 = arith.constant 1.000000e+00 : f32
    %326 = vector.broadcast %cst_87 : f32 to vector<2x32xf32>
    %327 = arith.addf %326, %325 : vector<2x32xf32>
    %328 = arith.divf %326, %327 : vector<2x32xf32>
    %329 = vector.extract_strided_slice %317 {offsets = [0, 32], sizes = [2, 32], strides = [1, 1]} : vector<2x96xf32> to vector<2x32xf32>
    %330 = vector.extract_strided_slice %320 {offsets = [0, 32], sizes = [2, 32], strides = [1, 1]} : vector<2x192xf32> to vector<2x32xf32>
    %331 = arith.addf %329, %330 : vector<2x32xf32>
    %332 = arith.negf %331 : vector<2x32xf32>
    %333 = math.exp %332 : vector<2x32xf32>
    %cst_88 = arith.constant 1.000000e+00 : f32
    %334 = vector.broadcast %cst_88 : f32 to vector<2x32xf32>
    %335 = arith.addf %334, %333 : vector<2x32xf32>
    %336 = arith.divf %334, %335 : vector<2x32xf32>
    %337 = vector.extract_strided_slice %317 {offsets = [0, 64], sizes = [2, 32], strides = [1, 1]} : vector<2x96xf32> to vector<2x32xf32>
    %338 = vector.extract_strided_slice %320 {offsets = [0, 64], sizes = [2, 32], strides = [1, 1]} : vector<2x192xf32> to vector<2x32xf32>
    %339 = arith.addf %338, %11 : vector<2x32xf32>
    %340 = arith.mulf %328, %339 : vector<2x32xf32>
    %341 = arith.addf %337, %340 : vector<2x32xf32>
    %342 = math.tanh %341 : vector<2x32xf32>
    %cst_89 = arith.constant 1.000000e+00 : f32
    %343 = vector.broadcast %cst_89 : f32 to vector<2x32xf32>
    %344 = arith.subf %343, %336 : vector<2x32xf32>
    %345 = arith.mulf %344, %342 : vector<2x32xf32>
    %346 = arith.mulf %336, %287 : vector<2x32xf32>
    %347 = arith.addf %345, %346 : vector<2x32xf32>
    %348 = vector.extract_strided_slice %318 {offsets = [0, 0], sizes = [2, 32], strides = [1, 1]} : vector<2x96xf32> to vector<2x32xf32>
    %349 = vector.extract_strided_slice %320 {offsets = [0, 96], sizes = [2, 32], strides = [1, 1]} : vector<2x192xf32> to vector<2x32xf32>
    %350 = arith.addf %348, %349 : vector<2x32xf32>
    %351 = arith.negf %350 : vector<2x32xf32>
    %352 = math.exp %351 : vector<2x32xf32>
    %cst_90 = arith.constant 1.000000e+00 : f32
    %353 = vector.broadcast %cst_90 : f32 to vector<2x32xf32>
    %354 = arith.addf %353, %352 : vector<2x32xf32>
    %355 = arith.divf %353, %354 : vector<2x32xf32>
    %356 = vector.extract_strided_slice %318 {offsets = [0, 32], sizes = [2, 32], strides = [1, 1]} : vector<2x96xf32> to vector<2x32xf32>
    %357 = vector.extract_strided_slice %320 {offsets = [0, 128], sizes = [2, 32], strides = [1, 1]} : vector<2x192xf32> to vector<2x32xf32>
    %358 = arith.addf %356, %357 : vector<2x32xf32>
    %359 = arith.negf %358 : vector<2x32xf32>
    %360 = math.exp %359 : vector<2x32xf32>
    %cst_91 = arith.constant 1.000000e+00 : f32
    %361 = vector.broadcast %cst_91 : f32 to vector<2x32xf32>
    %362 = arith.addf %361, %360 : vector<2x32xf32>
    %363 = arith.divf %361, %362 : vector<2x32xf32>
    %364 = vector.extract_strided_slice %318 {offsets = [0, 64], sizes = [2, 32], strides = [1, 1]} : vector<2x96xf32> to vector<2x32xf32>
    %365 = vector.extract_strided_slice %320 {offsets = [0, 160], sizes = [2, 32], strides = [1, 1]} : vector<2x192xf32> to vector<2x32xf32>
    %366 = arith.addf %365, %14 : vector<2x32xf32>
    %367 = arith.mulf %355, %366 : vector<2x32xf32>
    %368 = arith.addf %364, %367 : vector<2x32xf32>
    %369 = math.tanh %368 : vector<2x32xf32>
    %cst_92 = arith.constant 1.000000e+00 : f32
    %370 = vector.broadcast %cst_92 : f32 to vector<2x32xf32>
    %371 = arith.subf %370, %363 : vector<2x32xf32>
    %372 = arith.mulf %371, %369 : vector<2x32xf32>
    %373 = arith.mulf %363, %314 : vector<2x32xf32>
    %374 = arith.addf %372, %373 : vector<2x32xf32>
    %c10_93 = arith.constant 10 : index
    %c0_94 = arith.constant 0 : index
    %375 = vector.load %arg13[%c10_93, %c0_94] : memref<16x64xf32, #tpu.memory_space<vmem>>, vector<2x32xf32>
    tpu.vector_store %arg13[%c10_93, %c0_94], %347 {strides = array<i32>} : memref<16x64xf32, #tpu.memory_space<vmem>>, vector<2x32xf32>,
    %c4_95 = arith.constant 4 : index
    %c32_96 = arith.constant 32 : index
    %376 = vector.load %arg13[%c4_95, %c32_96] : memref<16x64xf32, #tpu.memory_space<vmem>>, vector<2x32xf32>
    tpu.vector_store %arg13[%c4_95, %c32_96], %374 {strides = array<i32>} : memref<16x64xf32, #tpu.memory_space<vmem>>, vector<2x32xf32>,
    %c12_97 = arith.constant 12 : index
    %c0_98 = arith.constant 0 : index
    %377 = vector.load %arg14[%c12_97, %c0_98] : memref<16x192xf32, #tpu.memory_space<vmem>>, vector<2x96xf32>
    %c2_99 = arith.constant 2 : index
    %c96_100 = arith.constant 96 : index
    %378 = vector.load %arg14[%c2_99, %c96_100] : memref<16x192xf32, #tpu.memory_space<vmem>>, vector<2x96xf32>
    %379 = tpu.concatenate %347, %374 in 1 : vector<2x32xf32>, vector<2x32xf32> -> vector<2x64xf32>
    %cst_101 = arith.constant dense<0.000000e+00> : vector<2x192xf32>
    %380 = tpu.matmul %379, %8, %cst_101 {dimension_numbers = #tpu.dot_dimension_numbers<[1], [0], [0], [1], [0, 0, 1, 1], [], []>} : vector<2x64xf32>, vector<64x192xf32>, vector<2x192xf32> -> vector<2x192xf32>
    %381 = vector.extract_strided_slice %377 {offsets = [0, 0], sizes = [2, 32], strides = [1, 1]} : vector<2x96xf32> to vector<2x32xf32>
    %382 = vector.extract_strided_slice %380 {offsets = [0, 0], sizes = [2, 32], strides = [1, 1]} : vector<2x192xf32> to vector<2x32xf32>
    %383 = arith.addf %381, %382 : vector<2x32xf32>
    %384 = arith.negf %383 : vector<2x32xf32>
    %385 = math.exp %384 : vector<2x32xf32>
    %cst_102 = arith.constant 1.000000e+00 : f32
    %386 = vector.broadcast %cst_102 : f32 to vector<2x32xf32>
    %387 = arith.addf %386, %385 : vector<2x32xf32>
    %388 = arith.divf %386, %387 : vector<2x32xf32>
    %389 = vector.extract_strided_slice %377 {offsets = [0, 32], sizes = [2, 32], strides = [1, 1]} : vector<2x96xf32> to vector<2x32xf32>
    %390 = vector.extract_strided_slice %380 {offsets = [0, 32], sizes = [2, 32], strides = [1, 1]} : vector<2x192xf32> to vector<2x32xf32>
    %391 = arith.addf %389, %390 : vector<2x32xf32>
    %392 = arith.negf %391 : vector<2x32xf32>
    %393 = math.exp %392 : vector<2x32xf32>
    %cst_103 = arith.constant 1.000000e+00 : f32
    %394 = vector.broadcast %cst_103 : f32 to vector<2x32xf32>
    %395 = arith.addf %394, %393 : vector<2x32xf32>
    %396 = arith.divf %394, %395 : vector<2x32xf32>
    %397 = vector.extract_strided_slice %377 {offsets = [0, 64], sizes = [2, 32], strides = [1, 1]} : vector<2x96xf32> to vector<2x32xf32>
    %398 = vector.extract_strided_slice %380 {offsets = [0, 64], sizes = [2, 32], strides = [1, 1]} : vector<2x192xf32> to vector<2x32xf32>
    %399 = arith.addf %398, %11 : vector<2x32xf32>
    %400 = arith.mulf %388, %399 : vector<2x32xf32>
    %401 = arith.addf %397, %400 : vector<2x32xf32>
    %402 = math.tanh %401 : vector<2x32xf32>
    %cst_104 = arith.constant 1.000000e+00 : f32
    %403 = vector.broadcast %cst_104 : f32 to vector<2x32xf32>
    %404 = arith.subf %403, %396 : vector<2x32xf32>
    %405 = arith.mulf %404, %402 : vector<2x32xf32>
    %406 = arith.mulf %396, %347 : vector<2x32xf32>
    %407 = arith.addf %405, %406 : vector<2x32xf32>
    %408 = vector.extract_strided_slice %378 {offsets = [0, 0], sizes = [2, 32], strides = [1, 1]} : vector<2x96xf32> to vector<2x32xf32>
    %409 = vector.extract_strided_slice %380 {offsets = [0, 96], sizes = [2, 32], strides = [1, 1]} : vector<2x192xf32> to vector<2x32xf32>
    %410 = arith.addf %408, %409 : vector<2x32xf32>
    %411 = arith.negf %410 : vector<2x32xf32>
    %412 = math.exp %411 : vector<2x32xf32>
    %cst_105 = arith.constant 1.000000e+00 : f32
    %413 = vector.broadcast %cst_105 : f32 to vector<2x32xf32>
    %414 = arith.addf %413, %412 : vector<2x32xf32>
    %415 = arith.divf %413, %414 : vector<2x32xf32>
    %416 = vector.extract_strided_slice %378 {offsets = [0, 32], sizes = [2, 32], strides = [1, 1]} : vector<2x96xf32> to vector<2x32xf32>
    %417 = vector.extract_strided_slice %380 {offsets = [0, 128], sizes = [2, 32], strides = [1, 1]} : vector<2x192xf32> to vector<2x32xf32>
    %418 = arith.addf %416, %417 : vector<2x32xf32>
    %419 = arith.negf %418 : vector<2x32xf32>
    %420 = math.exp %419 : vector<2x32xf32>
    %cst_106 = arith.constant 1.000000e+00 : f32
    %421 = vector.broadcast %cst_106 : f32 to vector<2x32xf32>
    %422 = arith.addf %421, %420 : vector<2x32xf32>
    %423 = arith.divf %421, %422 : vector<2x32xf32>
    %424 = vector.extract_strided_slice %378 {offsets = [0, 64], sizes = [2, 32], strides = [1, 1]} : vector<2x96xf32> to vector<2x32xf32>
    %425 = vector.extract_strided_slice %380 {offsets = [0, 160], sizes = [2, 32], strides = [1, 1]} : vector<2x192xf32> to vector<2x32xf32>
    %426 = arith.addf %425, %14 : vector<2x32xf32>
    %427 = arith.mulf %415, %426 : vector<2x32xf32>
    %428 = arith.addf %424, %427 : vector<2x32xf32>
    %429 = math.tanh %428 : vector<2x32xf32>
    %cst_107 = arith.constant 1.000000e+00 : f32
    %430 = vector.broadcast %cst_107 : f32 to vector<2x32xf32>
    %431 = arith.subf %430, %423 : vector<2x32xf32>
    %432 = arith.mulf %431, %429 : vector<2x32xf32>
    %433 = arith.mulf %423, %374 : vector<2x32xf32>
    %434 = arith.addf %432, %433 : vector<2x32xf32>
    %c12_108 = arith.constant 12 : index
    %c0_109 = arith.constant 0 : index
    %435 = vector.load %arg13[%c12_108, %c0_109] : memref<16x64xf32, #tpu.memory_space<vmem>>, vector<2x32xf32>
    tpu.vector_store %arg13[%c12_108, %c0_109], %407 {strides = array<i32>} : memref<16x64xf32, #tpu.memory_space<vmem>>, vector<2x32xf32>,
    %c2_110 = arith.constant 2 : index
    %c32_111 = arith.constant 32 : index
    %436 = vector.load %arg13[%c2_110, %c32_111] : memref<16x64xf32, #tpu.memory_space<vmem>>, vector<2x32xf32>
    tpu.vector_store %arg13[%c2_110, %c32_111], %434 {strides = array<i32>} : memref<16x64xf32, #tpu.memory_space<vmem>>, vector<2x32xf32>,
    %c14_112 = arith.constant 14 : index
    %c0_113 = arith.constant 0 : index
    %437 = vector.load %arg14[%c14_112, %c0_113] : memref<16x192xf32, #tpu.memory_space<vmem>>, vector<2x96xf32>
    %c0_114 = arith.constant 0 : index
    %c96_115 = arith.constant 96 : index
    %438 = vector.load %arg14[%c0_114, %c96_115] : memref<16x192xf32, #tpu.memory_space<vmem>>, vector<2x96xf32>
    %439 = tpu.concatenate %407, %434 in 1 : vector<2x32xf32>, vector<2x32xf32> -> vector<2x64xf32>
    %cst_116 = arith.constant dense<0.000000e+00> : vector<2x192xf32>
    %440 = tpu.matmul %439, %8, %cst_116 {dimension_numbers = #tpu.dot_dimension_numbers<[1], [0], [0], [1], [0, 0, 1, 1], [], []>} : vector<2x64xf32>, vector<64x192xf32>, vector<2x192xf32> -> vector<2x192xf32>
    %441 = vector.extract_strided_slice %437 {offsets = [0, 0], sizes = [2, 32], strides = [1, 1]} : vector<2x96xf32> to vector<2x32xf32>
    %442 = vector.extract_strided_slice %440 {offsets = [0, 0], sizes = [2, 32], strides = [1, 1]} : vector<2x192xf32> to vector<2x32xf32>
    %443 = arith.addf %441, %442 : vector<2x32xf32>
    %444 = arith.negf %443 : vector<2x32xf32>
    %445 = math.exp %444 : vector<2x32xf32>
    %cst_117 = arith.constant 1.000000e+00 : f32
    %446 = vector.broadcast %cst_117 : f32 to vector<2x32xf32>
    %447 = arith.addf %446, %445 : vector<2x32xf32>
    %448 = arith.divf %446, %447 : vector<2x32xf32>
    %449 = vector.extract_strided_slice %437 {offsets = [0, 32], sizes = [2, 32], strides = [1, 1]} : vector<2x96xf32> to vector<2x32xf32>
    %450 = vector.extract_strided_slice %440 {offsets = [0, 32], sizes = [2, 32], strides = [1, 1]} : vector<2x192xf32> to vector<2x32xf32>
    %451 = arith.addf %449, %450 : vector<2x32xf32>
    %452 = arith.negf %451 : vector<2x32xf32>
    %453 = math.exp %452 : vector<2x32xf32>
    %cst_118 = arith.constant 1.000000e+00 : f32
    %454 = vector.broadcast %cst_118 : f32 to vector<2x32xf32>
    %455 = arith.addf %454, %453 : vector<2x32xf32>
    %456 = arith.divf %454, %455 : vector<2x32xf32>
    %457 = vector.extract_strided_slice %437 {offsets = [0, 64], sizes = [2, 32], strides = [1, 1]} : vector<2x96xf32> to vector<2x32xf32>
    %458 = vector.extract_strided_slice %440 {offsets = [0, 64], sizes = [2, 32], strides = [1, 1]} : vector<2x192xf32> to vector<2x32xf32>
    %459 = arith.addf %458, %11 : vector<2x32xf32>
    %460 = arith.mulf %448, %459 : vector<2x32xf32>
    %461 = arith.addf %457, %460 : vector<2x32xf32>
    %462 = math.tanh %461 : vector<2x32xf32>
    %cst_119 = arith.constant 1.000000e+00 : f32
    %463 = vector.broadcast %cst_119 : f32 to vector<2x32xf32>
    %464 = arith.subf %463, %456 : vector<2x32xf32>
    %465 = arith.mulf %464, %462 : vector<2x32xf32>
    %466 = arith.mulf %456, %407 : vector<2x32xf32>
    %467 = arith.addf %465, %466 : vector<2x32xf32>
    %468 = vector.extract_strided_slice %438 {offsets = [0, 0], sizes = [2, 32], strides = [1, 1]} : vector<2x96xf32> to vector<2x32xf32>
    %469 = vector.extract_strided_slice %440 {offsets = [0, 96], sizes = [2, 32], strides = [1, 1]} : vector<2x192xf32> to vector<2x32xf32>
    %470 = arith.addf %468, %469 : vector<2x32xf32>
    %471 = arith.negf %470 : vector<2x32xf32>
    %472 = math.exp %471 : vector<2x32xf32>
    %cst_120 = arith.constant 1.000000e+00 : f32
    %473 = vector.broadcast %cst_120 : f32 to vector<2x32xf32>
    %474 = arith.addf %473, %472 : vector<2x32xf32>
    %475 = arith.divf %473, %474 : vector<2x32xf32>
    %476 = vector.extract_strided_slice %438 {offsets = [0, 32], sizes = [2, 32], strides = [1, 1]} : vector<2x96xf32> to vector<2x32xf32>
    %477 = vector.extract_strided_slice %440 {offsets = [0, 128], sizes = [2, 32], strides = [1, 1]} : vector<2x192xf32> to vector<2x32xf32>
    %478 = arith.addf %476, %477 : vector<2x32xf32>
    %479 = arith.negf %478 : vector<2x32xf32>
    %480 = math.exp %479 : vector<2x32xf32>
    %cst_121 = arith.constant 1.000000e+00 : f32
    %481 = vector.broadcast %cst_121 : f32 to vector<2x32xf32>
    %482 = arith.addf %481, %480 : vector<2x32xf32>
    %483 = arith.divf %481, %482 : vector<2x32xf32>
    %484 = vector.extract_strided_slice %438 {offsets = [0, 64], sizes = [2, 32], strides = [1, 1]} : vector<2x96xf32> to vector<2x32xf32>
    %485 = vector.extract_strided_slice %440 {offsets = [0, 160], sizes = [2, 32], strides = [1, 1]} : vector<2x192xf32> to vector<2x32xf32>
    %486 = arith.addf %485, %14 : vector<2x32xf32>
    %487 = arith.mulf %475, %486 : vector<2x32xf32>
    %488 = arith.addf %484, %487 : vector<2x32xf32>
    %489 = math.tanh %488 : vector<2x32xf32>
    %cst_122 = arith.constant 1.000000e+00 : f32
    %490 = vector.broadcast %cst_122 : f32 to vector<2x32xf32>
    %491 = arith.subf %490, %483 : vector<2x32xf32>
    %492 = arith.mulf %491, %489 : vector<2x32xf32>
    %493 = arith.mulf %483, %434 : vector<2x32xf32>
    %494 = arith.addf %492, %493 : vector<2x32xf32>
    %c14_123 = arith.constant 14 : index
    %c0_124 = arith.constant 0 : index
    %495 = vector.load %arg13[%c14_123, %c0_124] : memref<16x64xf32, #tpu.memory_space<vmem>>, vector<2x32xf32>
    tpu.vector_store %arg13[%c14_123, %c0_124], %467 {strides = array<i32>} : memref<16x64xf32, #tpu.memory_space<vmem>>, vector<2x32xf32>,
    %c0_125 = arith.constant 0 : index
    %c32_126 = arith.constant 32 : index
    %496 = vector.load %arg13[%c0_125, %c32_126] : memref<16x64xf32, #tpu.memory_space<vmem>>, vector<2x32xf32>
    tpu.vector_store %arg13[%c0_125, %c32_126], %494 {strides = array<i32>} : memref<16x64xf32, #tpu.memory_space<vmem>>, vector<2x32xf32>,
    %c0_127 = arith.constant 0 : index
    %c0_128 = arith.constant 0 : index
    %497 = vector.load %arg13[%c0_127, %c0_128] : memref<16x64xf32, #tpu.memory_space<vmem>>, vector<16x64xf32>
    %c0_129 = arith.constant 0 : index
    %c0_130 = arith.constant 0 : index
    %498 = vector.load %arg6[%c0_129, %c0_130] : memref<64x192xf32, #tpu.memory_space<vmem>>, vector<64x192xf32>
    %cst_131 = arith.constant dense<0.000000e+00> : vector<16x192xf32>
    %499 = tpu.matmul %497, %498, %cst_131 {dimension_numbers = #tpu.dot_dimension_numbers<[1], [0], [0], [1], [0, 0, 1, 1], [], []>} : vector<16x64xf32>, vector<64x192xf32>, vector<16x192xf32> -> vector<16x192xf32>
    %c0_132 = arith.constant 0 : index
    %c0_133 = arith.constant 0 : index
    %500 = vector.load %arg8[%c0_132, %c0_133] : memref<1x192xf32, #tpu.memory_space<vmem>>, vector<1x192xf32>
    %501 = vector.broadcast %500 : vector<1x192xf32> to vector<16x192xf32>
    %502 = arith.addf %499, %501 : vector<16x192xf32>
    %c0_134 = arith.constant 0 : index
    %c0_135 = arith.constant 0 : index
    %503 = vector.load %arg14[%c0_134, %c0_135] : memref<16x192xf32, #tpu.memory_space<vmem>>, vector<16x192xf32>
    tpu.vector_store %arg14[%c0_134, %c0_135], %502 {strides = array<i32>} : memref<16x192xf32, #tpu.memory_space<vmem>>, vector<16x192xf32>,
    %c0_136 = arith.constant 0 : index
    %c0_137 = arith.constant 0 : index
    %504 = vector.load %arg7[%c0_136, %c0_137] : memref<64x192xf32, #tpu.memory_space<vmem>>, vector<64x192xf32>
    %c0_138 = arith.constant 0 : index
    %c0_139 = arith.constant 0 : index
    %505 = vector.load %arg9[%c0_138, %c0_139] : memref<1x64xf32, #tpu.memory_space<vmem>>, vector<1x32xf32>
    %506 = vector.shape_cast %505 : vector<1x32xf32> to vector<1x32xf32>
    %507 = vector.broadcast %506 : vector<1x32xf32> to vector<2x32xf32>
    %c0_140 = arith.constant 0 : index
    %c32_141 = arith.constant 32 : index
    %508 = vector.load %arg9[%c0_140, %c32_141] : memref<1x64xf32, #tpu.memory_space<vmem>>, vector<1x32xf32>
    %509 = vector.shape_cast %508 : vector<1x32xf32> to vector<1x32xf32>
    %510 = vector.broadcast %509 : vector<1x32xf32> to vector<2x32xf32>
    %cst_142 = arith.constant 0.000000e+00 : f32
    %511 = vector.broadcast %cst_142 : f32 to vector<2x32xf32>
    %cst_143 = arith.constant 0.000000e+00 : f32
    %512 = vector.broadcast %cst_143 : f32 to vector<2x32xf32>
    %c0_144 = arith.constant 0 : index
    %c0_145 = arith.constant 0 : index
    %513 = vector.load %arg14[%c0_144, %c0_145] : memref<16x192xf32, #tpu.memory_space<vmem>>, vector<2x96xf32>
    %c14_146 = arith.constant 14 : index
    %c96_147 = arith.constant 96 : index
    %514 = vector.load %arg14[%c14_146, %c96_147] : memref<16x192xf32, #tpu.memory_space<vmem>>, vector<2x96xf32>
    %515 = tpu.concatenate %511, %512 in 1 : vector<2x32xf32>, vector<2x32xf32> -> vector<2x64xf32>
    %cst_148 = arith.constant dense<0.000000e+00> : vector<2x192xf32>
    %516 = tpu.matmul %515, %504, %cst_148 {dimension_numbers = #tpu.dot_dimension_numbers<[1], [0], [0], [1], [0, 0, 1, 1], [], []>} : vector<2x64xf32>, vector<64x192xf32>, vector<2x192xf32> -> vector<2x192xf32>
    %517 = vector.extract_strided_slice %513 {offsets = [0, 0], sizes = [2, 32], strides = [1, 1]} : vector<2x96xf32> to vector<2x32xf32>
    %518 = vector.extract_strided_slice %516 {offsets = [0, 0], sizes = [2, 32], strides = [1, 1]} : vector<2x192xf32> to vector<2x32xf32>
    %519 = arith.addf %517, %518 : vector<2x32xf32>
    %520 = arith.negf %519 : vector<2x32xf32>
    %521 = math.exp %520 : vector<2x32xf32>
    %cst_149 = arith.constant 1.000000e+00 : f32
    %522 = vector.broadcast %cst_149 : f32 to vector<2x32xf32>
    %523 = arith.addf %522, %521 : vector<2x32xf32>
    %524 = arith.divf %522, %523 : vector<2x32xf32>
    %525 = vector.extract_strided_slice %513 {offsets = [0, 32], sizes = [2, 32], strides = [1, 1]} : vector<2x96xf32> to vector<2x32xf32>
    %526 = vector.extract_strided_slice %516 {offsets = [0, 32], sizes = [2, 32], strides = [1, 1]} : vector<2x192xf32> to vector<2x32xf32>
    %527 = arith.addf %525, %526 : vector<2x32xf32>
    %528 = arith.negf %527 : vector<2x32xf32>
    %529 = math.exp %528 : vector<2x32xf32>
    %cst_150 = arith.constant 1.000000e+00 : f32
    %530 = vector.broadcast %cst_150 : f32 to vector<2x32xf32>
    %531 = arith.addf %530, %529 : vector<2x32xf32>
    %532 = arith.divf %530, %531 : vector<2x32xf32>
    %533 = vector.extract_strided_slice %513 {offsets = [0, 64], sizes = [2, 32], strides = [1, 1]} : vector<2x96xf32> to vector<2x32xf32>
    %534 = vector.extract_strided_slice %516 {offsets = [0, 64], sizes = [2, 32], strides = [1, 1]} : vector<2x192xf32> to vector<2x32xf32>
    %535 = arith.addf %534, %507 : vector<2x32xf32>
    %536 = arith.mulf %524, %535 : vector<2x32xf32>
    %537 = arith.addf %533, %536 : vector<2x32xf32>
    %538 = math.tanh %537 : vector<2x32xf32>
    %cst_151 = arith.constant 1.000000e+00 : f32
    %539 = vector.broadcast %cst_151 : f32 to vector<2x32xf32>
    %540 = arith.subf %539, %532 : vector<2x32xf32>
    %541 = arith.mulf %540, %538 : vector<2x32xf32>
    %542 = arith.mulf %532, %511 : vector<2x32xf32>
    %543 = arith.addf %541, %542 : vector<2x32xf32>
    %544 = vector.extract_strided_slice %514 {offsets = [0, 0], sizes = [2, 32], strides = [1, 1]} : vector<2x96xf32> to vector<2x32xf32>
    %545 = vector.extract_strided_slice %516 {offsets = [0, 96], sizes = [2, 32], strides = [1, 1]} : vector<2x192xf32> to vector<2x32xf32>
    %546 = arith.addf %544, %545 : vector<2x32xf32>
    %547 = arith.negf %546 : vector<2x32xf32>
    %548 = math.exp %547 : vector<2x32xf32>
    %cst_152 = arith.constant 1.000000e+00 : f32
    %549 = vector.broadcast %cst_152 : f32 to vector<2x32xf32>
    %550 = arith.addf %549, %548 : vector<2x32xf32>
    %551 = arith.divf %549, %550 : vector<2x32xf32>
    %552 = vector.extract_strided_slice %514 {offsets = [0, 32], sizes = [2, 32], strides = [1, 1]} : vector<2x96xf32> to vector<2x32xf32>
    %553 = vector.extract_strided_slice %516 {offsets = [0, 128], sizes = [2, 32], strides = [1, 1]} : vector<2x192xf32> to vector<2x32xf32>
    %554 = arith.addf %552, %553 : vector<2x32xf32>
    %555 = arith.negf %554 : vector<2x32xf32>
    %556 = math.exp %555 : vector<2x32xf32>
    %cst_153 = arith.constant 1.000000e+00 : f32
    %557 = vector.broadcast %cst_153 : f32 to vector<2x32xf32>
    %558 = arith.addf %557, %556 : vector<2x32xf32>
    %559 = arith.divf %557, %558 : vector<2x32xf32>
    %560 = vector.extract_strided_slice %514 {offsets = [0, 64], sizes = [2, 32], strides = [1, 1]} : vector<2x96xf32> to vector<2x32xf32>
    %561 = vector.extract_strided_slice %516 {offsets = [0, 160], sizes = [2, 32], strides = [1, 1]} : vector<2x192xf32> to vector<2x32xf32>
    %562 = arith.addf %561, %510 : vector<2x32xf32>
    %563 = arith.mulf %551, %562 : vector<2x32xf32>
    %564 = arith.addf %560, %563 : vector<2x32xf32>
    %565 = math.tanh %564 : vector<2x32xf32>
    %cst_154 = arith.constant 1.000000e+00 : f32
    %566 = vector.broadcast %cst_154 : f32 to vector<2x32xf32>
    %567 = arith.subf %566, %559 : vector<2x32xf32>
    %568 = arith.mulf %567, %565 : vector<2x32xf32>
    %569 = arith.mulf %559, %512 : vector<2x32xf32>
    %570 = arith.addf %568, %569 : vector<2x32xf32>
    %c0_155 = arith.constant 0 : index
    %c0_156 = arith.constant 0 : index
    %571 = vector.load %arg13[%c0_155, %c0_156] : memref<16x64xf32, #tpu.memory_space<vmem>>, vector<2x32xf32>
    tpu.vector_store %arg13[%c0_155, %c0_156], %543 {strides = array<i32>} : memref<16x64xf32, #tpu.memory_space<vmem>>, vector<2x32xf32>,
    %c14_157 = arith.constant 14 : index
    %c32_158 = arith.constant 32 : index
    %572 = vector.load %arg13[%c14_157, %c32_158] : memref<16x64xf32, #tpu.memory_space<vmem>>, vector<2x32xf32>
    tpu.vector_store %arg13[%c14_157, %c32_158], %570 {strides = array<i32>} : memref<16x64xf32, #tpu.memory_space<vmem>>, vector<2x32xf32>,
    %c2_159 = arith.constant 2 : index
    %c0_160 = arith.constant 0 : index
    %573 = vector.load %arg14[%c2_159, %c0_160] : memref<16x192xf32, #tpu.memory_space<vmem>>, vector<2x96xf32>
    %c12_161 = arith.constant 12 : index
    %c96_162 = arith.constant 96 : index
    %574 = vector.load %arg14[%c12_161, %c96_162] : memref<16x192xf32, #tpu.memory_space<vmem>>, vector<2x96xf32>
    %575 = tpu.concatenate %543, %570 in 1 : vector<2x32xf32>, vector<2x32xf32> -> vector<2x64xf32>
    %cst_163 = arith.constant dense<0.000000e+00> : vector<2x192xf32>
    %576 = tpu.matmul %575, %504, %cst_163 {dimension_numbers = #tpu.dot_dimension_numbers<[1], [0], [0], [1], [0, 0, 1, 1], [], []>} : vector<2x64xf32>, vector<64x192xf32>, vector<2x192xf32> -> vector<2x192xf32>
    %577 = vector.extract_strided_slice %573 {offsets = [0, 0], sizes = [2, 32], strides = [1, 1]} : vector<2x96xf32> to vector<2x32xf32>
    %578 = vector.extract_strided_slice %576 {offsets = [0, 0], sizes = [2, 32], strides = [1, 1]} : vector<2x192xf32> to vector<2x32xf32>
    %579 = arith.addf %577, %578 : vector<2x32xf32>
    %580 = arith.negf %579 : vector<2x32xf32>
    %581 = math.exp %580 : vector<2x32xf32>
    %cst_164 = arith.constant 1.000000e+00 : f32
    %582 = vector.broadcast %cst_164 : f32 to vector<2x32xf32>
    %583 = arith.addf %582, %581 : vector<2x32xf32>
    %584 = arith.divf %582, %583 : vector<2x32xf32>
    %585 = vector.extract_strided_slice %573 {offsets = [0, 32], sizes = [2, 32], strides = [1, 1]} : vector<2x96xf32> to vector<2x32xf32>
    %586 = vector.extract_strided_slice %576 {offsets = [0, 32], sizes = [2, 32], strides = [1, 1]} : vector<2x192xf32> to vector<2x32xf32>
    %587 = arith.addf %585, %586 : vector<2x32xf32>
    %588 = arith.negf %587 : vector<2x32xf32>
    %589 = math.exp %588 : vector<2x32xf32>
    %cst_165 = arith.constant 1.000000e+00 : f32
    %590 = vector.broadcast %cst_165 : f32 to vector<2x32xf32>
    %591 = arith.addf %590, %589 : vector<2x32xf32>
    %592 = arith.divf %590, %591 : vector<2x32xf32>
    %593 = vector.extract_strided_slice %573 {offsets = [0, 64], sizes = [2, 32], strides = [1, 1]} : vector<2x96xf32> to vector<2x32xf32>
    %594 = vector.extract_strided_slice %576 {offsets = [0, 64], sizes = [2, 32], strides = [1, 1]} : vector<2x192xf32> to vector<2x32xf32>
    %595 = arith.addf %594, %507 : vector<2x32xf32>
    %596 = arith.mulf %584, %595 : vector<2x32xf32>
    %597 = arith.addf %593, %596 : vector<2x32xf32>
    %598 = math.tanh %597 : vector<2x32xf32>
    %cst_166 = arith.constant 1.000000e+00 : f32
    %599 = vector.broadcast %cst_166 : f32 to vector<2x32xf32>
    %600 = arith.subf %599, %592 : vector<2x32xf32>
    %601 = arith.mulf %600, %598 : vector<2x32xf32>
    %602 = arith.mulf %592, %543 : vector<2x32xf32>
    %603 = arith.addf %601, %602 : vector<2x32xf32>
    %604 = vector.extract_strided_slice %574 {offsets = [0, 0], sizes = [2, 32], strides = [1, 1]} : vector<2x96xf32> to vector<2x32xf32>
    %605 = vector.extract_strided_slice %576 {offsets = [0, 96], sizes = [2, 32], strides = [1, 1]} : vector<2x192xf32> to vector<2x32xf32>
    %606 = arith.addf %604, %605 : vector<2x32xf32>
    %607 = arith.negf %606 : vector<2x32xf32>
    %608 = math.exp %607 : vector<2x32xf32>
    %cst_167 = arith.constant 1.000000e+00 : f32
    %609 = vector.broadcast %cst_167 : f32 to vector<2x32xf32>
    %610 = arith.addf %609, %608 : vector<2x32xf32>
    %611 = arith.divf %609, %610 : vector<2x32xf32>
    %612 = vector.extract_strided_slice %574 {offsets = [0, 32], sizes = [2, 32], strides = [1, 1]} : vector<2x96xf32> to vector<2x32xf32>
    %613 = vector.extract_strided_slice %576 {offsets = [0, 128], sizes = [2, 32], strides = [1, 1]} : vector<2x192xf32> to vector<2x32xf32>
    %614 = arith.addf %612, %613 : vector<2x32xf32>
    %615 = arith.negf %614 : vector<2x32xf32>
    %616 = math.exp %615 : vector<2x32xf32>
    %cst_168 = arith.constant 1.000000e+00 : f32
    %617 = vector.broadcast %cst_168 : f32 to vector<2x32xf32>
    %618 = arith.addf %617, %616 : vector<2x32xf32>
    %619 = arith.divf %617, %618 : vector<2x32xf32>
    %620 = vector.extract_strided_slice %574 {offsets = [0, 64], sizes = [2, 32], strides = [1, 1]} : vector<2x96xf32> to vector<2x32xf32>
    %621 = vector.extract_strided_slice %576 {offsets = [0, 160], sizes = [2, 32], strides = [1, 1]} : vector<2x192xf32> to vector<2x32xf32>
    %622 = arith.addf %621, %510 : vector<2x32xf32>
    %623 = arith.mulf %611, %622 : vector<2x32xf32>
    %624 = arith.addf %620, %623 : vector<2x32xf32>
    %625 = math.tanh %624 : vector<2x32xf32>
    %cst_169 = arith.constant 1.000000e+00 : f32
    %626 = vector.broadcast %cst_169 : f32 to vector<2x32xf32>
    %627 = arith.subf %626, %619 : vector<2x32xf32>
    %628 = arith.mulf %627, %625 : vector<2x32xf32>
    %629 = arith.mulf %619, %570 : vector<2x32xf32>
    %630 = arith.addf %628, %629 : vector<2x32xf32>
    %c2_170 = arith.constant 2 : index
    %c0_171 = arith.constant 0 : index
    %631 = vector.load %arg13[%c2_170, %c0_171] : memref<16x64xf32, #tpu.memory_space<vmem>>, vector<2x32xf32>
    tpu.vector_store %arg13[%c2_170, %c0_171], %603 {strides = array<i32>} : memref<16x64xf32, #tpu.memory_space<vmem>>, vector<2x32xf32>,
    %c12_172 = arith.constant 12 : index
    %c32_173 = arith.constant 32 : index
    %632 = vector.load %arg13[%c12_172, %c32_173] : memref<16x64xf32, #tpu.memory_space<vmem>>, vector<2x32xf32>
    tpu.vector_store %arg13[%c12_172, %c32_173], %630 {strides = array<i32>} : memref<16x64xf32, #tpu.memory_space<vmem>>, vector<2x32xf32>,
    %c4_174 = arith.constant 4 : index
    %c0_175 = arith.constant 0 : index
    %633 = vector.load %arg14[%c4_174, %c0_175] : memref<16x192xf32, #tpu.memory_space<vmem>>, vector<2x96xf32>
    %c10_176 = arith.constant 10 : index
    %c96_177 = arith.constant 96 : index
    %634 = vector.load %arg14[%c10_176, %c96_177] : memref<16x192xf32, #tpu.memory_space<vmem>>, vector<2x96xf32>
    %635 = tpu.concatenate %603, %630 in 1 : vector<2x32xf32>, vector<2x32xf32> -> vector<2x64xf32>
    %cst_178 = arith.constant dense<0.000000e+00> : vector<2x192xf32>
    %636 = tpu.matmul %635, %504, %cst_178 {dimension_numbers = #tpu.dot_dimension_numbers<[1], [0], [0], [1], [0, 0, 1, 1], [], []>} : vector<2x64xf32>, vector<64x192xf32>, vector<2x192xf32> -> vector<2x192xf32>
    %637 = vector.extract_strided_slice %633 {offsets = [0, 0], sizes = [2, 32], strides = [1, 1]} : vector<2x96xf32> to vector<2x32xf32>
    %638 = vector.extract_strided_slice %636 {offsets = [0, 0], sizes = [2, 32], strides = [1, 1]} : vector<2x192xf32> to vector<2x32xf32>
    %639 = arith.addf %637, %638 : vector<2x32xf32>
    %640 = arith.negf %639 : vector<2x32xf32>
    %641 = math.exp %640 : vector<2x32xf32>
    %cst_179 = arith.constant 1.000000e+00 : f32
    %642 = vector.broadcast %cst_179 : f32 to vector<2x32xf32>
    %643 = arith.addf %642, %641 : vector<2x32xf32>
    %644 = arith.divf %642, %643 : vector<2x32xf32>
    %645 = vector.extract_strided_slice %633 {offsets = [0, 32], sizes = [2, 32], strides = [1, 1]} : vector<2x96xf32> to vector<2x32xf32>
    %646 = vector.extract_strided_slice %636 {offsets = [0, 32], sizes = [2, 32], strides = [1, 1]} : vector<2x192xf32> to vector<2x32xf32>
    %647 = arith.addf %645, %646 : vector<2x32xf32>
    %648 = arith.negf %647 : vector<2x32xf32>
    %649 = math.exp %648 : vector<2x32xf32>
    %cst_180 = arith.constant 1.000000e+00 : f32
    %650 = vector.broadcast %cst_180 : f32 to vector<2x32xf32>
    %651 = arith.addf %650, %649 : vector<2x32xf32>
    %652 = arith.divf %650, %651 : vector<2x32xf32>
    %653 = vector.extract_strided_slice %633 {offsets = [0, 64], sizes = [2, 32], strides = [1, 1]} : vector<2x96xf32> to vector<2x32xf32>
    %654 = vector.extract_strided_slice %636 {offsets = [0, 64], sizes = [2, 32], strides = [1, 1]} : vector<2x192xf32> to vector<2x32xf32>
    %655 = arith.addf %654, %507 : vector<2x32xf32>
    %656 = arith.mulf %644, %655 : vector<2x32xf32>
    %657 = arith.addf %653, %656 : vector<2x32xf32>
    %658 = math.tanh %657 : vector<2x32xf32>
    %cst_181 = arith.constant 1.000000e+00 : f32
    %659 = vector.broadcast %cst_181 : f32 to vector<2x32xf32>
    %660 = arith.subf %659, %652 : vector<2x32xf32>
    %661 = arith.mulf %660, %658 : vector<2x32xf32>
    %662 = arith.mulf %652, %603 : vector<2x32xf32>
    %663 = arith.addf %661, %662 : vector<2x32xf32>
    %664 = vector.extract_strided_slice %634 {offsets = [0, 0], sizes = [2, 32], strides = [1, 1]} : vector<2x96xf32> to vector<2x32xf32>
    %665 = vector.extract_strided_slice %636 {offsets = [0, 96], sizes = [2, 32], strides = [1, 1]} : vector<2x192xf32> to vector<2x32xf32>
    %666 = arith.addf %664, %665 : vector<2x32xf32>
    %667 = arith.negf %666 : vector<2x32xf32>
    %668 = math.exp %667 : vector<2x32xf32>
    %cst_182 = arith.constant 1.000000e+00 : f32
    %669 = vector.broadcast %cst_182 : f32 to vector<2x32xf32>
    %670 = arith.addf %669, %668 : vector<2x32xf32>
    %671 = arith.divf %669, %670 : vector<2x32xf32>
    %672 = vector.extract_strided_slice %634 {offsets = [0, 32], sizes = [2, 32], strides = [1, 1]} : vector<2x96xf32> to vector<2x32xf32>
    %673 = vector.extract_strided_slice %636 {offsets = [0, 128], sizes = [2, 32], strides = [1, 1]} : vector<2x192xf32> to vector<2x32xf32>
    %674 = arith.addf %672, %673 : vector<2x32xf32>
    %675 = arith.negf %674 : vector<2x32xf32>
    %676 = math.exp %675 : vector<2x32xf32>
    %cst_183 = arith.constant 1.000000e+00 : f32
    %677 = vector.broadcast %cst_183 : f32 to vector<2x32xf32>
    %678 = arith.addf %677, %676 : vector<2x32xf32>
    %679 = arith.divf %677, %678 : vector<2x32xf32>
    %680 = vector.extract_strided_slice %634 {offsets = [0, 64], sizes = [2, 32], strides = [1, 1]} : vector<2x96xf32> to vector<2x32xf32>
    %681 = vector.extract_strided_slice %636 {offsets = [0, 160], sizes = [2, 32], strides = [1, 1]} : vector<2x192xf32> to vector<2x32xf32>
    %682 = arith.addf %681, %510 : vector<2x32xf32>
    %683 = arith.mulf %671, %682 : vector<2x32xf32>
    %684 = arith.addf %680, %683 : vector<2x32xf32>
    %685 = math.tanh %684 : vector<2x32xf32>
    %cst_184 = arith.constant 1.000000e+00 : f32
    %686 = vector.broadcast %cst_184 : f32 to vector<2x32xf32>
    %687 = arith.subf %686, %679 : vector<2x32xf32>
    %688 = arith.mulf %687, %685 : vector<2x32xf32>
    %689 = arith.mulf %679, %630 : vector<2x32xf32>
    %690 = arith.addf %688, %689 : vector<2x32xf32>
    %c4_185 = arith.constant 4 : index
    %c0_186 = arith.constant 0 : index
    %691 = vector.load %arg13[%c4_185, %c0_186] : memref<16x64xf32, #tpu.memory_space<vmem>>, vector<2x32xf32>
    tpu.vector_store %arg13[%c4_185, %c0_186], %663 {strides = array<i32>} : memref<16x64xf32, #tpu.memory_space<vmem>>, vector<2x32xf32>,
    %c10_187 = arith.constant 10 : index
    %c32_188 = arith.constant 32 : index
    %692 = vector.load %arg13[%c10_187, %c32_188] : memref<16x64xf32, #tpu.memory_space<vmem>>, vector<2x32xf32>
    tpu.vector_store %arg13[%c10_187, %c32_188], %690 {strides = array<i32>} : memref<16x64xf32, #tpu.memory_space<vmem>>, vector<2x32xf32>,
    %c6_189 = arith.constant 6 : index
    %c0_190 = arith.constant 0 : index
    %693 = vector.load %arg14[%c6_189, %c0_190] : memref<16x192xf32, #tpu.memory_space<vmem>>, vector<2x96xf32>
    %c8_191 = arith.constant 8 : index
    %c96_192 = arith.constant 96 : index
    %694 = vector.load %arg14[%c8_191, %c96_192] : memref<16x192xf32, #tpu.memory_space<vmem>>, vector<2x96xf32>
    %695 = tpu.concatenate %663, %690 in 1 : vector<2x32xf32>, vector<2x32xf32> -> vector<2x64xf32>
    %cst_193 = arith.constant dense<0.000000e+00> : vector<2x192xf32>
    %696 = tpu.matmul %695, %504, %cst_193 {dimension_numbers = #tpu.dot_dimension_numbers<[1], [0], [0], [1], [0, 0, 1, 1], [], []>} : vector<2x64xf32>, vector<64x192xf32>, vector<2x192xf32> -> vector<2x192xf32>
    %697 = vector.extract_strided_slice %693 {offsets = [0, 0], sizes = [2, 32], strides = [1, 1]} : vector<2x96xf32> to vector<2x32xf32>
    %698 = vector.extract_strided_slice %696 {offsets = [0, 0], sizes = [2, 32], strides = [1, 1]} : vector<2x192xf32> to vector<2x32xf32>
    %699 = arith.addf %697, %698 : vector<2x32xf32>
    %700 = arith.negf %699 : vector<2x32xf32>
    %701 = math.exp %700 : vector<2x32xf32>
    %cst_194 = arith.constant 1.000000e+00 : f32
    %702 = vector.broadcast %cst_194 : f32 to vector<2x32xf32>
    %703 = arith.addf %702, %701 : vector<2x32xf32>
    %704 = arith.divf %702, %703 : vector<2x32xf32>
    %705 = vector.extract_strided_slice %693 {offsets = [0, 32], sizes = [2, 32], strides = [1, 1]} : vector<2x96xf32> to vector<2x32xf32>
    %706 = vector.extract_strided_slice %696 {offsets = [0, 32], sizes = [2, 32], strides = [1, 1]} : vector<2x192xf32> to vector<2x32xf32>
    %707 = arith.addf %705, %706 : vector<2x32xf32>
    %708 = arith.negf %707 : vector<2x32xf32>
    %709 = math.exp %708 : vector<2x32xf32>
    %cst_195 = arith.constant 1.000000e+00 : f32
    %710 = vector.broadcast %cst_195 : f32 to vector<2x32xf32>
    %711 = arith.addf %710, %709 : vector<2x32xf32>
    %712 = arith.divf %710, %711 : vector<2x32xf32>
    %713 = vector.extract_strided_slice %693 {offsets = [0, 64], sizes = [2, 32], strides = [1, 1]} : vector<2x96xf32> to vector<2x32xf32>
    %714 = vector.extract_strided_slice %696 {offsets = [0, 64], sizes = [2, 32], strides = [1, 1]} : vector<2x192xf32> to vector<2x32xf32>
    %715 = arith.addf %714, %507 : vector<2x32xf32>
    %716 = arith.mulf %704, %715 : vector<2x32xf32>
    %717 = arith.addf %713, %716 : vector<2x32xf32>
    %718 = math.tanh %717 : vector<2x32xf32>
    %cst_196 = arith.constant 1.000000e+00 : f32
    %719 = vector.broadcast %cst_196 : f32 to vector<2x32xf32>
    %720 = arith.subf %719, %712 : vector<2x32xf32>
    %721 = arith.mulf %720, %718 : vector<2x32xf32>
    %722 = arith.mulf %712, %663 : vector<2x32xf32>
    %723 = arith.addf %721, %722 : vector<2x32xf32>
    %724 = vector.extract_strided_slice %694 {offsets = [0, 0], sizes = [2, 32], strides = [1, 1]} : vector<2x96xf32> to vector<2x32xf32>
    %725 = vector.extract_strided_slice %696 {offsets = [0, 96], sizes = [2, 32], strides = [1, 1]} : vector<2x192xf32> to vector<2x32xf32>
    %726 = arith.addf %724, %725 : vector<2x32xf32>
    %727 = arith.negf %726 : vector<2x32xf32>
    %728 = math.exp %727 : vector<2x32xf32>
    %cst_197 = arith.constant 1.000000e+00 : f32
    %729 = vector.broadcast %cst_197 : f32 to vector<2x32xf32>
    %730 = arith.addf %729, %728 : vector<2x32xf32>
    %731 = arith.divf %729, %730 : vector<2x32xf32>
    %732 = vector.extract_strided_slice %694 {offsets = [0, 32], sizes = [2, 32], strides = [1, 1]} : vector<2x96xf32> to vector<2x32xf32>
    %733 = vector.extract_strided_slice %696 {offsets = [0, 128], sizes = [2, 32], strides = [1, 1]} : vector<2x192xf32> to vector<2x32xf32>
    %734 = arith.addf %732, %733 : vector<2x32xf32>
    %735 = arith.negf %734 : vector<2x32xf32>
    %736 = math.exp %735 : vector<2x32xf32>
    %cst_198 = arith.constant 1.000000e+00 : f32
    %737 = vector.broadcast %cst_198 : f32 to vector<2x32xf32>
    %738 = arith.addf %737, %736 : vector<2x32xf32>
    %739 = arith.divf %737, %738 : vector<2x32xf32>
    %740 = vector.extract_strided_slice %694 {offsets = [0, 64], sizes = [2, 32], strides = [1, 1]} : vector<2x96xf32> to vector<2x32xf32>
    %741 = vector.extract_strided_slice %696 {offsets = [0, 160], sizes = [2, 32], strides = [1, 1]} : vector<2x192xf32> to vector<2x32xf32>
    %742 = arith.addf %741, %510 : vector<2x32xf32>
    %743 = arith.mulf %731, %742 : vector<2x32xf32>
    %744 = arith.addf %740, %743 : vector<2x32xf32>
    %745 = math.tanh %744 : vector<2x32xf32>
    %cst_199 = arith.constant 1.000000e+00 : f32
    %746 = vector.broadcast %cst_199 : f32 to vector<2x32xf32>
    %747 = arith.subf %746, %739 : vector<2x32xf32>
    %748 = arith.mulf %747, %745 : vector<2x32xf32>
    %749 = arith.mulf %739, %690 : vector<2x32xf32>
    %750 = arith.addf %748, %749 : vector<2x32xf32>
    %c6_200 = arith.constant 6 : index
    %c0_201 = arith.constant 0 : index
    %751 = vector.load %arg13[%c6_200, %c0_201] : memref<16x64xf32, #tpu.memory_space<vmem>>, vector<2x32xf32>
    tpu.vector_store %arg13[%c6_200, %c0_201], %723 {strides = array<i32>} : memref<16x64xf32, #tpu.memory_space<vmem>>, vector<2x32xf32>,
    %c8_202 = arith.constant 8 : index
    %c32_203 = arith.constant 32 : index
    %752 = vector.load %arg13[%c8_202, %c32_203] : memref<16x64xf32, #tpu.memory_space<vmem>>, vector<2x32xf32>
    tpu.vector_store %arg13[%c8_202, %c32_203], %750 {strides = array<i32>} : memref<16x64xf32, #tpu.memory_space<vmem>>, vector<2x32xf32>,
    %c8_204 = arith.constant 8 : index
    %c0_205 = arith.constant 0 : index
    %753 = vector.load %arg14[%c8_204, %c0_205] : memref<16x192xf32, #tpu.memory_space<vmem>>, vector<2x96xf32>
    %c6_206 = arith.constant 6 : index
    %c96_207 = arith.constant 96 : index
    %754 = vector.load %arg14[%c6_206, %c96_207] : memref<16x192xf32, #tpu.memory_space<vmem>>, vector<2x96xf32>
    %755 = tpu.concatenate %723, %750 in 1 : vector<2x32xf32>, vector<2x32xf32> -> vector<2x64xf32>
    %cst_208 = arith.constant dense<0.000000e+00> : vector<2x192xf32>
    %756 = tpu.matmul %755, %504, %cst_208 {dimension_numbers = #tpu.dot_dimension_numbers<[1], [0], [0], [1], [0, 0, 1, 1], [], []>} : vector<2x64xf32>, vector<64x192xf32>, vector<2x192xf32> -> vector<2x192xf32>
    %757 = vector.extract_strided_slice %753 {offsets = [0, 0], sizes = [2, 32], strides = [1, 1]} : vector<2x96xf32> to vector<2x32xf32>
    %758 = vector.extract_strided_slice %756 {offsets = [0, 0], sizes = [2, 32], strides = [1, 1]} : vector<2x192xf32> to vector<2x32xf32>
    %759 = arith.addf %757, %758 : vector<2x32xf32>
    %760 = arith.negf %759 : vector<2x32xf32>
    %761 = math.exp %760 : vector<2x32xf32>
    %cst_209 = arith.constant 1.000000e+00 : f32
    %762 = vector.broadcast %cst_209 : f32 to vector<2x32xf32>
    %763 = arith.addf %762, %761 : vector<2x32xf32>
    %764 = arith.divf %762, %763 : vector<2x32xf32>
    %765 = vector.extract_strided_slice %753 {offsets = [0, 32], sizes = [2, 32], strides = [1, 1]} : vector<2x96xf32> to vector<2x32xf32>
    %766 = vector.extract_strided_slice %756 {offsets = [0, 32], sizes = [2, 32], strides = [1, 1]} : vector<2x192xf32> to vector<2x32xf32>
    %767 = arith.addf %765, %766 : vector<2x32xf32>
    %768 = arith.negf %767 : vector<2x32xf32>
    %769 = math.exp %768 : vector<2x32xf32>
    %cst_210 = arith.constant 1.000000e+00 : f32
    %770 = vector.broadcast %cst_210 : f32 to vector<2x32xf32>
    %771 = arith.addf %770, %769 : vector<2x32xf32>
    %772 = arith.divf %770, %771 : vector<2x32xf32>
    %773 = vector.extract_strided_slice %753 {offsets = [0, 64], sizes = [2, 32], strides = [1, 1]} : vector<2x96xf32> to vector<2x32xf32>
    %774 = vector.extract_strided_slice %756 {offsets = [0, 64], sizes = [2, 32], strides = [1, 1]} : vector<2x192xf32> to vector<2x32xf32>
    %775 = arith.addf %774, %507 : vector<2x32xf32>
    %776 = arith.mulf %764, %775 : vector<2x32xf32>
    %777 = arith.addf %773, %776 : vector<2x32xf32>
    %778 = math.tanh %777 : vector<2x32xf32>
    %cst_211 = arith.constant 1.000000e+00 : f32
    %779 = vector.broadcast %cst_211 : f32 to vector<2x32xf32>
    %780 = arith.subf %779, %772 : vector<2x32xf32>
    %781 = arith.mulf %780, %778 : vector<2x32xf32>
    %782 = arith.mulf %772, %723 : vector<2x32xf32>
    %783 = arith.addf %781, %782 : vector<2x32xf32>
    %784 = vector.extract_strided_slice %754 {offsets = [0, 0], sizes = [2, 32], strides = [1, 1]} : vector<2x96xf32> to vector<2x32xf32>
    %785 = vector.extract_strided_slice %756 {offsets = [0, 96], sizes = [2, 32], strides = [1, 1]} : vector<2x192xf32> to vector<2x32xf32>
    %786 = arith.addf %784, %785 : vector<2x32xf32>
    %787 = arith.negf %786 : vector<2x32xf32>
    %788 = math.exp %787 : vector<2x32xf32>
    %cst_212 = arith.constant 1.000000e+00 : f32
    %789 = vector.broadcast %cst_212 : f32 to vector<2x32xf32>
    %790 = arith.addf %789, %788 : vector<2x32xf32>
    %791 = arith.divf %789, %790 : vector<2x32xf32>
    %792 = vector.extract_strided_slice %754 {offsets = [0, 32], sizes = [2, 32], strides = [1, 1]} : vector<2x96xf32> to vector<2x32xf32>
    %793 = vector.extract_strided_slice %756 {offsets = [0, 128], sizes = [2, 32], strides = [1, 1]} : vector<2x192xf32> to vector<2x32xf32>
    %794 = arith.addf %792, %793 : vector<2x32xf32>
    %795 = arith.negf %794 : vector<2x32xf32>
    %796 = math.exp %795 : vector<2x32xf32>
    %cst_213 = arith.constant 1.000000e+00 : f32
    %797 = vector.broadcast %cst_213 : f32 to vector<2x32xf32>
    %798 = arith.addf %797, %796 : vector<2x32xf32>
    %799 = arith.divf %797, %798 : vector<2x32xf32>
    %800 = vector.extract_strided_slice %754 {offsets = [0, 64], sizes = [2, 32], strides = [1, 1]} : vector<2x96xf32> to vector<2x32xf32>
    %801 = vector.extract_strided_slice %756 {offsets = [0, 160], sizes = [2, 32], strides = [1, 1]} : vector<2x192xf32> to vector<2x32xf32>
    %802 = arith.addf %801, %510 : vector<2x32xf32>
    %803 = arith.mulf %791, %802 : vector<2x32xf32>
    %804 = arith.addf %800, %803 : vector<2x32xf32>
    %805 = math.tanh %804 : vector<2x32xf32>
    %cst_214 = arith.constant 1.000000e+00 : f32
    %806 = vector.broadcast %cst_214 : f32 to vector<2x32xf32>
    %807 = arith.subf %806, %799 : vector<2x32xf32>
    %808 = arith.mulf %807, %805 : vector<2x32xf32>
    %809 = arith.mulf %799, %750 : vector<2x32xf32>
    %810 = arith.addf %808, %809 : vector<2x32xf32>
    %c8_215 = arith.constant 8 : index
    %c0_216 = arith.constant 0 : index
    %811 = vector.load %arg13[%c8_215, %c0_216] : memref<16x64xf32, #tpu.memory_space<vmem>>, vector<2x32xf32>
    tpu.vector_store %arg13[%c8_215, %c0_216], %783 {strides = array<i32>} : memref<16x64xf32, #tpu.memory_space<vmem>>, vector<2x32xf32>,
    %c6_217 = arith.constant 6 : index
    %c32_218 = arith.constant 32 : index
    %812 = vector.load %arg13[%c6_217, %c32_218] : memref<16x64xf32, #tpu.memory_space<vmem>>, vector<2x32xf32>
    tpu.vector_store %arg13[%c6_217, %c32_218], %810 {strides = array<i32>} : memref<16x64xf32, #tpu.memory_space<vmem>>, vector<2x32xf32>,
    %c10_219 = arith.constant 10 : index
    %c0_220 = arith.constant 0 : index
    %813 = vector.load %arg14[%c10_219, %c0_220] : memref<16x192xf32, #tpu.memory_space<vmem>>, vector<2x96xf32>
    %c4_221 = arith.constant 4 : index
    %c96_222 = arith.constant 96 : index
    %814 = vector.load %arg14[%c4_221, %c96_222] : memref<16x192xf32, #tpu.memory_space<vmem>>, vector<2x96xf32>
    %815 = tpu.concatenate %783, %810 in 1 : vector<2x32xf32>, vector<2x32xf32> -> vector<2x64xf32>
    %cst_223 = arith.constant dense<0.000000e+00> : vector<2x192xf32>
    %816 = tpu.matmul %815, %504, %cst_223 {dimension_numbers = #tpu.dot_dimension_numbers<[1], [0], [0], [1], [0, 0, 1, 1], [], []>} : vector<2x64xf32>, vector<64x192xf32>, vector<2x192xf32> -> vector<2x192xf32>
    %817 = vector.extract_strided_slice %813 {offsets = [0, 0], sizes = [2, 32], strides = [1, 1]} : vector<2x96xf32> to vector<2x32xf32>
    %818 = vector.extract_strided_slice %816 {offsets = [0, 0], sizes = [2, 32], strides = [1, 1]} : vector<2x192xf32> to vector<2x32xf32>
    %819 = arith.addf %817, %818 : vector<2x32xf32>
    %820 = arith.negf %819 : vector<2x32xf32>
    %821 = math.exp %820 : vector<2x32xf32>
    %cst_224 = arith.constant 1.000000e+00 : f32
    %822 = vector.broadcast %cst_224 : f32 to vector<2x32xf32>
    %823 = arith.addf %822, %821 : vector<2x32xf32>
    %824 = arith.divf %822, %823 : vector<2x32xf32>
    %825 = vector.extract_strided_slice %813 {offsets = [0, 32], sizes = [2, 32], strides = [1, 1]} : vector<2x96xf32> to vector<2x32xf32>
    %826 = vector.extract_strided_slice %816 {offsets = [0, 32], sizes = [2, 32], strides = [1, 1]} : vector<2x192xf32> to vector<2x32xf32>
    %827 = arith.addf %825, %826 : vector<2x32xf32>
    %828 = arith.negf %827 : vector<2x32xf32>
    %829 = math.exp %828 : vector<2x32xf32>
    %cst_225 = arith.constant 1.000000e+00 : f32
    %830 = vector.broadcast %cst_225 : f32 to vector<2x32xf32>
    %831 = arith.addf %830, %829 : vector<2x32xf32>
    %832 = arith.divf %830, %831 : vector<2x32xf32>
    %833 = vector.extract_strided_slice %813 {offsets = [0, 64], sizes = [2, 32], strides = [1, 1]} : vector<2x96xf32> to vector<2x32xf32>
    %834 = vector.extract_strided_slice %816 {offsets = [0, 64], sizes = [2, 32], strides = [1, 1]} : vector<2x192xf32> to vector<2x32xf32>
    %835 = arith.addf %834, %507 : vector<2x32xf32>
    %836 = arith.mulf %824, %835 : vector<2x32xf32>
    %837 = arith.addf %833, %836 : vector<2x32xf32>
    %838 = math.tanh %837 : vector<2x32xf32>
    %cst_226 = arith.constant 1.000000e+00 : f32
    %839 = vector.broadcast %cst_226 : f32 to vector<2x32xf32>
    %840 = arith.subf %839, %832 : vector<2x32xf32>
    %841 = arith.mulf %840, %838 : vector<2x32xf32>
    %842 = arith.mulf %832, %783 : vector<2x32xf32>
    %843 = arith.addf %841, %842 : vector<2x32xf32>
    %844 = vector.extract_strided_slice %814 {offsets = [0, 0], sizes = [2, 32], strides = [1, 1]} : vector<2x96xf32> to vector<2x32xf32>
    %845 = vector.extract_strided_slice %816 {offsets = [0, 96], sizes = [2, 32], strides = [1, 1]} : vector<2x192xf32> to vector<2x32xf32>
    %846 = arith.addf %844, %845 : vector<2x32xf32>
    %847 = arith.negf %846 : vector<2x32xf32>
    %848 = math.exp %847 : vector<2x32xf32>
    %cst_227 = arith.constant 1.000000e+00 : f32
    %849 = vector.broadcast %cst_227 : f32 to vector<2x32xf32>
    %850 = arith.addf %849, %848 : vector<2x32xf32>
    %851 = arith.divf %849, %850 : vector<2x32xf32>
    %852 = vector.extract_strided_slice %814 {offsets = [0, 32], sizes = [2, 32], strides = [1, 1]} : vector<2x96xf32> to vector<2x32xf32>
    %853 = vector.extract_strided_slice %816 {offsets = [0, 128], sizes = [2, 32], strides = [1, 1]} : vector<2x192xf32> to vector<2x32xf32>
    %854 = arith.addf %852, %853 : vector<2x32xf32>
    %855 = arith.negf %854 : vector<2x32xf32>
    %856 = math.exp %855 : vector<2x32xf32>
    %cst_228 = arith.constant 1.000000e+00 : f32
    %857 = vector.broadcast %cst_228 : f32 to vector<2x32xf32>
    %858 = arith.addf %857, %856 : vector<2x32xf32>
    %859 = arith.divf %857, %858 : vector<2x32xf32>
    %860 = vector.extract_strided_slice %814 {offsets = [0, 64], sizes = [2, 32], strides = [1, 1]} : vector<2x96xf32> to vector<2x32xf32>
    %861 = vector.extract_strided_slice %816 {offsets = [0, 160], sizes = [2, 32], strides = [1, 1]} : vector<2x192xf32> to vector<2x32xf32>
    %862 = arith.addf %861, %510 : vector<2x32xf32>
    %863 = arith.mulf %851, %862 : vector<2x32xf32>
    %864 = arith.addf %860, %863 : vector<2x32xf32>
    %865 = math.tanh %864 : vector<2x32xf32>
    %cst_229 = arith.constant 1.000000e+00 : f32
    %866 = vector.broadcast %cst_229 : f32 to vector<2x32xf32>
    %867 = arith.subf %866, %859 : vector<2x32xf32>
    %868 = arith.mulf %867, %865 : vector<2x32xf32>
    %869 = arith.mulf %859, %810 : vector<2x32xf32>
    %870 = arith.addf %868, %869 : vector<2x32xf32>
    %c10_230 = arith.constant 10 : index
    %c0_231 = arith.constant 0 : index
    %871 = vector.load %arg13[%c10_230, %c0_231] : memref<16x64xf32, #tpu.memory_space<vmem>>, vector<2x32xf32>
    tpu.vector_store %arg13[%c10_230, %c0_231], %843 {strides = array<i32>} : memref<16x64xf32, #tpu.memory_space<vmem>>, vector<2x32xf32>,
    %c4_232 = arith.constant 4 : index
    %c32_233 = arith.constant 32 : index
    %872 = vector.load %arg13[%c4_232, %c32_233] : memref<16x64xf32, #tpu.memory_space<vmem>>, vector<2x32xf32>
    tpu.vector_store %arg13[%c4_232, %c32_233], %870 {strides = array<i32>} : memref<16x64xf32, #tpu.memory_space<vmem>>, vector<2x32xf32>,
    %c12_234 = arith.constant 12 : index
    %c0_235 = arith.constant 0 : index
    %873 = vector.load %arg14[%c12_234, %c0_235] : memref<16x192xf32, #tpu.memory_space<vmem>>, vector<2x96xf32>
    %c2_236 = arith.constant 2 : index
    %c96_237 = arith.constant 96 : index
    %874 = vector.load %arg14[%c2_236, %c96_237] : memref<16x192xf32, #tpu.memory_space<vmem>>, vector<2x96xf32>
    %875 = tpu.concatenate %843, %870 in 1 : vector<2x32xf32>, vector<2x32xf32> -> vector<2x64xf32>
    %cst_238 = arith.constant dense<0.000000e+00> : vector<2x192xf32>
    %876 = tpu.matmul %875, %504, %cst_238 {dimension_numbers = #tpu.dot_dimension_numbers<[1], [0], [0], [1], [0, 0, 1, 1], [], []>} : vector<2x64xf32>, vector<64x192xf32>, vector<2x192xf32> -> vector<2x192xf32>
    %877 = vector.extract_strided_slice %873 {offsets = [0, 0], sizes = [2, 32], strides = [1, 1]} : vector<2x96xf32> to vector<2x32xf32>
    %878 = vector.extract_strided_slice %876 {offsets = [0, 0], sizes = [2, 32], strides = [1, 1]} : vector<2x192xf32> to vector<2x32xf32>
    %879 = arith.addf %877, %878 : vector<2x32xf32>
    %880 = arith.negf %879 : vector<2x32xf32>
    %881 = math.exp %880 : vector<2x32xf32>
    %cst_239 = arith.constant 1.000000e+00 : f32
    %882 = vector.broadcast %cst_239 : f32 to vector<2x32xf32>
    %883 = arith.addf %882, %881 : vector<2x32xf32>
    %884 = arith.divf %882, %883 : vector<2x32xf32>
    %885 = vector.extract_strided_slice %873 {offsets = [0, 32], sizes = [2, 32], strides = [1, 1]} : vector<2x96xf32> to vector<2x32xf32>
    %886 = vector.extract_strided_slice %876 {offsets = [0, 32], sizes = [2, 32], strides = [1, 1]} : vector<2x192xf32> to vector<2x32xf32>
    %887 = arith.addf %885, %886 : vector<2x32xf32>
    %888 = arith.negf %887 : vector<2x32xf32>
    %889 = math.exp %888 : vector<2x32xf32>
    %cst_240 = arith.constant 1.000000e+00 : f32
    %890 = vector.broadcast %cst_240 : f32 to vector<2x32xf32>
    %891 = arith.addf %890, %889 : vector<2x32xf32>
    %892 = arith.divf %890, %891 : vector<2x32xf32>
    %893 = vector.extract_strided_slice %873 {offsets = [0, 64], sizes = [2, 32], strides = [1, 1]} : vector<2x96xf32> to vector<2x32xf32>
    %894 = vector.extract_strided_slice %876 {offsets = [0, 64], sizes = [2, 32], strides = [1, 1]} : vector<2x192xf32> to vector<2x32xf32>
    %895 = arith.addf %894, %507 : vector<2x32xf32>
    %896 = arith.mulf %884, %895 : vector<2x32xf32>
    %897 = arith.addf %893, %896 : vector<2x32xf32>
    %898 = math.tanh %897 : vector<2x32xf32>
    %cst_241 = arith.constant 1.000000e+00 : f32
    %899 = vector.broadcast %cst_241 : f32 to vector<2x32xf32>
    %900 = arith.subf %899, %892 : vector<2x32xf32>
    %901 = arith.mulf %900, %898 : vector<2x32xf32>
    %902 = arith.mulf %892, %843 : vector<2x32xf32>
    %903 = arith.addf %901, %902 : vector<2x32xf32>
    %904 = vector.extract_strided_slice %874 {offsets = [0, 0], sizes = [2, 32], strides = [1, 1]} : vector<2x96xf32> to vector<2x32xf32>
    %905 = vector.extract_strided_slice %876 {offsets = [0, 96], sizes = [2, 32], strides = [1, 1]} : vector<2x192xf32> to vector<2x32xf32>
    %906 = arith.addf %904, %905 : vector<2x32xf32>
    %907 = arith.negf %906 : vector<2x32xf32>
    %908 = math.exp %907 : vector<2x32xf32>
    %cst_242 = arith.constant 1.000000e+00 : f32
    %909 = vector.broadcast %cst_242 : f32 to vector<2x32xf32>
    %910 = arith.addf %909, %908 : vector<2x32xf32>
    %911 = arith.divf %909, %910 : vector<2x32xf32>
    %912 = vector.extract_strided_slice %874 {offsets = [0, 32], sizes = [2, 32], strides = [1, 1]} : vector<2x96xf32> to vector<2x32xf32>
    %913 = vector.extract_strided_slice %876 {offsets = [0, 128], sizes = [2, 32], strides = [1, 1]} : vector<2x192xf32> to vector<2x32xf32>
    %914 = arith.addf %912, %913 : vector<2x32xf32>
    %915 = arith.negf %914 : vector<2x32xf32>
    %916 = math.exp %915 : vector<2x32xf32>
    %cst_243 = arith.constant 1.000000e+00 : f32
    %917 = vector.broadcast %cst_243 : f32 to vector<2x32xf32>
    %918 = arith.addf %917, %916 : vector<2x32xf32>
    %919 = arith.divf %917, %918 : vector<2x32xf32>
    %920 = vector.extract_strided_slice %874 {offsets = [0, 64], sizes = [2, 32], strides = [1, 1]} : vector<2x96xf32> to vector<2x32xf32>
    %921 = vector.extract_strided_slice %876 {offsets = [0, 160], sizes = [2, 32], strides = [1, 1]} : vector<2x192xf32> to vector<2x32xf32>
    %922 = arith.addf %921, %510 : vector<2x32xf32>
    %923 = arith.mulf %911, %922 : vector<2x32xf32>
    %924 = arith.addf %920, %923 : vector<2x32xf32>
    %925 = math.tanh %924 : vector<2x32xf32>
    %cst_244 = arith.constant 1.000000e+00 : f32
    %926 = vector.broadcast %cst_244 : f32 to vector<2x32xf32>
    %927 = arith.subf %926, %919 : vector<2x32xf32>
    %928 = arith.mulf %927, %925 : vector<2x32xf32>
    %929 = arith.mulf %919, %870 : vector<2x32xf32>
    %930 = arith.addf %928, %929 : vector<2x32xf32>
    %c12_245 = arith.constant 12 : index
    %c0_246 = arith.constant 0 : index
    %931 = vector.load %arg13[%c12_245, %c0_246] : memref<16x64xf32, #tpu.memory_space<vmem>>, vector<2x32xf32>
    tpu.vector_store %arg13[%c12_245, %c0_246], %903 {strides = array<i32>} : memref<16x64xf32, #tpu.memory_space<vmem>>, vector<2x32xf32>,
    %c2_247 = arith.constant 2 : index
    %c32_248 = arith.constant 32 : index
    %932 = vector.load %arg13[%c2_247, %c32_248] : memref<16x64xf32, #tpu.memory_space<vmem>>, vector<2x32xf32>
    tpu.vector_store %arg13[%c2_247, %c32_248], %930 {strides = array<i32>} : memref<16x64xf32, #tpu.memory_space<vmem>>, vector<2x32xf32>,
    %c14_249 = arith.constant 14 : index
    %c0_250 = arith.constant 0 : index
    %933 = vector.load %arg14[%c14_249, %c0_250] : memref<16x192xf32, #tpu.memory_space<vmem>>, vector<2x96xf32>
    %c0_251 = arith.constant 0 : index
    %c96_252 = arith.constant 96 : index
    %934 = vector.load %arg14[%c0_251, %c96_252] : memref<16x192xf32, #tpu.memory_space<vmem>>, vector<2x96xf32>
    %935 = tpu.concatenate %903, %930 in 1 : vector<2x32xf32>, vector<2x32xf32> -> vector<2x64xf32>
    %cst_253 = arith.constant dense<0.000000e+00> : vector<2x192xf32>
    %936 = tpu.matmul %935, %504, %cst_253 {dimension_numbers = #tpu.dot_dimension_numbers<[1], [0], [0], [1], [0, 0, 1, 1], [], []>} : vector<2x64xf32>, vector<64x192xf32>, vector<2x192xf32> -> vector<2x192xf32>
    %937 = vector.extract_strided_slice %933 {offsets = [0, 0], sizes = [2, 32], strides = [1, 1]} : vector<2x96xf32> to vector<2x32xf32>
    %938 = vector.extract_strided_slice %936 {offsets = [0, 0], sizes = [2, 32], strides = [1, 1]} : vector<2x192xf32> to vector<2x32xf32>
    %939 = arith.addf %937, %938 : vector<2x32xf32>
    %940 = arith.negf %939 : vector<2x32xf32>
    %941 = math.exp %940 : vector<2x32xf32>
    %cst_254 = arith.constant 1.000000e+00 : f32
    %942 = vector.broadcast %cst_254 : f32 to vector<2x32xf32>
    %943 = arith.addf %942, %941 : vector<2x32xf32>
    %944 = arith.divf %942, %943 : vector<2x32xf32>
    %945 = vector.extract_strided_slice %933 {offsets = [0, 32], sizes = [2, 32], strides = [1, 1]} : vector<2x96xf32> to vector<2x32xf32>
    %946 = vector.extract_strided_slice %936 {offsets = [0, 32], sizes = [2, 32], strides = [1, 1]} : vector<2x192xf32> to vector<2x32xf32>
    %947 = arith.addf %945, %946 : vector<2x32xf32>
    %948 = arith.negf %947 : vector<2x32xf32>
    %949 = math.exp %948 : vector<2x32xf32>
    %cst_255 = arith.constant 1.000000e+00 : f32
    %950 = vector.broadcast %cst_255 : f32 to vector<2x32xf32>
    %951 = arith.addf %950, %949 : vector<2x32xf32>
    %952 = arith.divf %950, %951 : vector<2x32xf32>
    %953 = vector.extract_strided_slice %933 {offsets = [0, 64], sizes = [2, 32], strides = [1, 1]} : vector<2x96xf32> to vector<2x32xf32>
    %954 = vector.extract_strided_slice %936 {offsets = [0, 64], sizes = [2, 32], strides = [1, 1]} : vector<2x192xf32> to vector<2x32xf32>
    %955 = arith.addf %954, %507 : vector<2x32xf32>
    %956 = arith.mulf %944, %955 : vector<2x32xf32>
    %957 = arith.addf %953, %956 : vector<2x32xf32>
    %958 = math.tanh %957 : vector<2x32xf32>
    %cst_256 = arith.constant 1.000000e+00 : f32
    %959 = vector.broadcast %cst_256 : f32 to vector<2x32xf32>
    %960 = arith.subf %959, %952 : vector<2x32xf32>
    %961 = arith.mulf %960, %958 : vector<2x32xf32>
    %962 = arith.mulf %952, %903 : vector<2x32xf32>
    %963 = arith.addf %961, %962 : vector<2x32xf32>
    %964 = vector.extract_strided_slice %934 {offsets = [0, 0], sizes = [2, 32], strides = [1, 1]} : vector<2x96xf32> to vector<2x32xf32>
    %965 = vector.extract_strided_slice %936 {offsets = [0, 96], sizes = [2, 32], strides = [1, 1]} : vector<2x192xf32> to vector<2x32xf32>
    %966 = arith.addf %964, %965 : vector<2x32xf32>
    %967 = arith.negf %966 : vector<2x32xf32>
    %968 = math.exp %967 : vector<2x32xf32>
    %cst_257 = arith.constant 1.000000e+00 : f32
    %969 = vector.broadcast %cst_257 : f32 to vector<2x32xf32>
    %970 = arith.addf %969, %968 : vector<2x32xf32>
    %971 = arith.divf %969, %970 : vector<2x32xf32>
    %972 = vector.extract_strided_slice %934 {offsets = [0, 32], sizes = [2, 32], strides = [1, 1]} : vector<2x96xf32> to vector<2x32xf32>
    %973 = vector.extract_strided_slice %936 {offsets = [0, 128], sizes = [2, 32], strides = [1, 1]} : vector<2x192xf32> to vector<2x32xf32>
    %974 = arith.addf %972, %973 : vector<2x32xf32>
    %975 = arith.negf %974 : vector<2x32xf32>
    %976 = math.exp %975 : vector<2x32xf32>
    %cst_258 = arith.constant 1.000000e+00 : f32
    %977 = vector.broadcast %cst_258 : f32 to vector<2x32xf32>
    %978 = arith.addf %977, %976 : vector<2x32xf32>
    %979 = arith.divf %977, %978 : vector<2x32xf32>
    %980 = vector.extract_strided_slice %934 {offsets = [0, 64], sizes = [2, 32], strides = [1, 1]} : vector<2x96xf32> to vector<2x32xf32>
    %981 = vector.extract_strided_slice %936 {offsets = [0, 160], sizes = [2, 32], strides = [1, 1]} : vector<2x192xf32> to vector<2x32xf32>
    %982 = arith.addf %981, %510 : vector<2x32xf32>
    %983 = arith.mulf %971, %982 : vector<2x32xf32>
    %984 = arith.addf %980, %983 : vector<2x32xf32>
    %985 = math.tanh %984 : vector<2x32xf32>
    %cst_259 = arith.constant 1.000000e+00 : f32
    %986 = vector.broadcast %cst_259 : f32 to vector<2x32xf32>
    %987 = arith.subf %986, %979 : vector<2x32xf32>
    %988 = arith.mulf %987, %985 : vector<2x32xf32>
    %989 = arith.mulf %979, %930 : vector<2x32xf32>
    %990 = arith.addf %988, %989 : vector<2x32xf32>
    %c14_260 = arith.constant 14 : index
    %c0_261 = arith.constant 0 : index
    %991 = vector.load %arg13[%c14_260, %c0_261] : memref<16x64xf32, #tpu.memory_space<vmem>>, vector<2x32xf32>
    tpu.vector_store %arg13[%c14_260, %c0_261], %963 {strides = array<i32>} : memref<16x64xf32, #tpu.memory_space<vmem>>, vector<2x32xf32>,
    %c0_262 = arith.constant 0 : index
    %c32_263 = arith.constant 32 : index
    %992 = vector.load %arg13[%c0_262, %c32_263] : memref<16x64xf32, #tpu.memory_space<vmem>>, vector<2x32xf32>
    tpu.vector_store %arg13[%c0_262, %c32_263], %990 {strides = array<i32>} : memref<16x64xf32, #tpu.memory_space<vmem>>, vector<2x32xf32>,
    %c0_264 = arith.constant 0 : index
    %c0_265 = arith.constant 0 : index
    %993 = vector.load %arg13[%c0_264, %c0_265] : memref<16x64xf32, #tpu.memory_space<vmem>>, vector<16x64xf32>
    %c0_266 = arith.constant 0 : index
    %c0_267 = arith.constant 0 : index
    %994 = vector.load %arg10[%c0_266, %c0_267] : memref<64x32xf32, #tpu.memory_space<vmem>>, vector<64x32xf32>
    %cst_268 = arith.constant dense<0.000000e+00> : vector<16x32xf32>
    %995 = tpu.matmul %993, %994, %cst_268 {dimension_numbers = #tpu.dot_dimension_numbers<[1], [0], [0], [1], [0, 0, 1, 1], [], []>} : vector<16x64xf32>, vector<64x32xf32>, vector<16x32xf32> -> vector<16x32xf32>
    %c0_269 = arith.constant 0 : index
    %c0_270 = arith.constant 0 : index
    %996 = vector.load %arg11[%c0_269, %c0_270] : memref<1x32xf32, #tpu.memory_space<vmem>>, vector<1x32xf32>
    %997 = vector.broadcast %996 : vector<1x32xf32> to vector<16x32xf32>
    %998 = arith.addf %995, %997 : vector<16x32xf32>
    %c0_271 = arith.constant 0 : index
    %c0_272 = arith.constant 0 : index
    %c0_273 = arith.constant 0 : index
    %999 = vector.load %arg12[%c0_271, %c0_272, %c0_273] : memref<1x16x32xf32, #tpu.memory_space<vmem>>, vector<1x16x32xf32>
    %1000 = vector.shape_cast %999 : vector<1x16x32xf32> to vector<16x32xf32>
    %1001 = vector.shape_cast %998 : vector<16x32xf32> to vector<1x16x32xf32>
    tpu.vector_store %arg12[%c0_271, %c0_272, %c0_273], %1001 {strides = array<i32>} : memref<1x16x32xf32, #tpu.memory_space<vmem>>, vector<1x16x32xf32>,
    return
  }
  func.func @transform_0(%arg0: i32) -> (i32, i32, i32) {
    %c0_i32 = arith.constant 0 : i32
    %c0_i32_0 = arith.constant 0 : i32
    %c0_i32_1 = arith.constant 0 : i32
    return %arg0, %c0_i32, %c0_i32_0 : i32, i32, i32
  }
  func.func @transform_1(%arg0: i32) -> (i32, i32) {
    %c0_i32 = arith.constant 0 : i32
    %c0_i32_0 = arith.constant 0 : i32
    %c0_i32_1 = arith.constant 0 : i32
    return %c0_i32, %c0_i32_0 : i32, i32
  }
  func.func @transform_2(%arg0: i32) -> (i32, i32) {
    %c0_i32 = arith.constant 0 : i32
    %c0_i32_0 = arith.constant 0 : i32
    %c0_i32_1 = arith.constant 0 : i32
    return %c0_i32, %c0_i32_0 : i32, i32
  }
  func.func @transform_3(%arg0: i32) -> (i32, i32) {
    %c0_i32 = arith.constant 0 : i32
    %c0_i32_0 = arith.constant 0 : i32
    %c0_i32_1 = arith.constant 0 : i32
    return %c0_i32, %c0_i32_0 : i32, i32
  }
  func.func @transform_4(%arg0: i32) -> (i32, i32) {
    %c0_i32 = arith.constant 0 : i32
    %c0_i32_0 = arith.constant 0 : i32
    %c0_i32_1 = arith.constant 0 : i32
    return %c0_i32, %c0_i32_0 : i32, i32
  }
  func.func @transform_5(%arg0: i32) -> (i32, i32) {
    %c0_i32 = arith.constant 0 : i32
    %c0_i32_0 = arith.constant 0 : i32
    %c0_i32_1 = arith.constant 0 : i32
    return %c0_i32, %c0_i32_0 : i32, i32
  }
  func.func @transform_6(%arg0: i32) -> (i32, i32) {
    %c0_i32 = arith.constant 0 : i32
    %c0_i32_0 = arith.constant 0 : i32
    %c0_i32_1 = arith.constant 0 : i32
    return %c0_i32, %c0_i32_0 : i32, i32
  }
  func.func @transform_7(%arg0: i32) -> (i32, i32) {
    %c0_i32 = arith.constant 0 : i32
    %c0_i32_0 = arith.constant 0 : i32
    %c0_i32_1 = arith.constant 0 : i32
    return %c0_i32, %c0_i32_0 : i32, i32
  }
  func.func @transform_8(%arg0: i32) -> (i32, i32) {
    %c0_i32 = arith.constant 0 : i32
    %c0_i32_0 = arith.constant 0 : i32
    %c0_i32_1 = arith.constant 0 : i32
    return %c0_i32, %c0_i32_0 : i32, i32
  }
  func.func @transform_9(%arg0: i32) -> (i32, i32) {
    %c0_i32 = arith.constant 0 : i32
    %c0_i32_0 = arith.constant 0 : i32
    %c0_i32_1 = arith.constant 0 : i32
    return %c0_i32, %c0_i32_0 : i32, i32
  }
  func.func @transform_10(%arg0: i32) -> (i32, i32) {
    %c0_i32 = arith.constant 0 : i32
    %c0_i32_0 = arith.constant 0 : i32
    %c0_i32_1 = arith.constant 0 : i32
    return %c0_i32, %c0_i32_0 : i32, i32
  }
  func.func @transform_11(%arg0: i32) -> (i32, i32, i32) {
    %c0_i32 = arith.constant 0 : i32
    %c0_i32_0 = arith.constant 0 : i32
    %c0_i32_1 = arith.constant 0 : i32
    return %arg0, %c0_i32, %c0_i32_0 : i32, i32, i32
  }
}

</mosaic_0001>

<bundles_post_ra>
// kernel: encoder_forward.1
= control target key start
LH: loop header
LB: loop body
LE: loop exit
PB: predicated region body
PF: predicated region fallthrough
CT: control target
= control target key end

     0   :  { %16 = vsyncpa [#allocation5], 0  ;;  %s3742_s17 = smov [#allocation4]   ;;  %s4660_s0 = inlined_call_operand.vmem [shape: f32[1,16,16], index: 0, kind: input, shape index: {}]   ;;  %s4661_s1 = inlined_call_operand.hbm [shape: f32[16,192], index: 1, kind: input, shape index: {}]   ;;  %s4662_s2 = inlined_call_operand.vmem [shape: f32[64,192], index: 2, kind: input, shape index: {}]   ;;  %s4663_s3 = inlined_call_operand.vmem [shape: f32[1,192], index: 3, kind: input, shape index: {}]   ;;  %s4664_s4 = inlined_call_operand.vmem [shape: f32[1,64], index: 4, kind: input, shape index: {}]   ;;  %s4665_s5 = inlined_call_operand.vmem [shape: f32[64,192], index: 5, kind: input, shape index: {}]   ;;  %s4666_s6 = inlined_call_operand.vmem [shape: f32[64,192], index: 6, kind: input, shape index: {}]   ;;  %s4667_s7 = inlined_call_operand.vmem [shape: f32[1,192], index: 7, kind: input, shape index: {}]   ;;  %s4668_s8 = inlined_call_operand.vmem [shape: f32[1,64], index: 8, kind: input, shape index: {}]   ;;  %s4669_s9 = inlined_call_operand.vmem [shape: f32[64,32], index: 9, kind: input, shape index: {}]   ;;  %s4670_s10 = inlined_call_operand.vmem [shape: f32[1,32], index: 10, kind: input, shape index: {}]   ;;  %s4671_s11 = inlined_call_operand.vmem [shape: f32[1,16,32], index: 11, kind: output, shape index: {}]  }
   0x1   :  { %s24_s18 = sshll.u32 %s3742_s17, 4  ;;  %s3718_s21 = scalar_lea.hbm %s4661_s1, 512  ;;  %s25_s18 = int_to_ptr.vmem [resolvable:$true] %s24_s18 }
   0x2   :  { %p3719_p0 = scmp.ne.s32.totalorder %s4661_s1, %s3718_s21  ;;  %p3722_p1 = scmp.lt.u32.totalorder %s3718_s21, %s4661_s1 }
   0x4   :  { %p3724_p2 = pnand %p3722_p1, %p3719_p0 }
   0x6   :  { %3727 = shalt.err (!%p3724_p2)
}
   0x7   :  { %s3728_s26 = scalar_lea.vmem %s25_s18, 512  ;;  %p3733_p4 = scmp.lt.s32.totalorder %s25_s18, %s25_s18 }
   0x8   :  { %p3729_p3 = scmp.ne.s32.totalorder %s25_s18, %s3728_s26  ;;  %p3734_p5 = scmp.lt.s32.totalorder %s3728_s26, %s3728_s26 }
   0xa   :  { %p3735_p6 = por %p3734_p5, %p3733_p4 }
   0xc   :  { %p3736_p7 = pnand %p3735_p6, %p3729_p3 }
   0xe   :  { %3739 = shalt.err (!%p3736_p7)
}
   0xf   :  { %s3743_s27 = smov 256   ;;  %s3744_s28 = smov 16  }
  0x10   :  { %30 = dma.hbm_to_vmem [thread:$0]  %s4661_s1, 512, %s25_s18, [#allocation5], %s3743_s27, %s3743_s27, %s3744_s28  }
  0x11   :  { %3740 = dma.done.wait [#allocation5], 512  }
  0x12   :  { %3741 = vsyncadd [#allocation5], 4294966784  ;;  %v3745_v0 = vmov 0.0   ;;  %v55_v1 = vld [vmem:[#allocation4 + $0x8] sm:$0xff]  ;;  %v57_v2 = vld [vmem:[#allocation4 + $0x18] sm:$0xff]  ;;  %vm70_vm0 = vcmask 130048   ;;  %v60_v34 = vlaneseq }
  0x13   :  { %141 = vmatprep.mubr.f32.mxu0 %v3745_v0  ;;  %252 = vmatprep.mubr.f32.mxu1 %v3745_v0  ;;  %v160_v3 = vld [vmem:[%s4662_s2 + $0x8] sm:$0xff]  ;;  %v3161_v4 = vpack.c.bf16 %v57_v2, %v55_v1  ;;  %v162_v5 = vld [vmem:[%s4662_s2 + $0x18] sm:$0xff]  ;;  %v54_v6 = vld [vmem:[#allocation4] sm:$0xff]  ;;  %s3746_s25 = smov 64   ;;  %vm155_vm1 = vcmask 523264   ;;  %s3748_s30 = smov 32  }
  0x14   :  { %v56_v7 = vld [vmem:[#allocation4 + $0x10] sm:$0xff]  ;;  %v3829_v8 = vpack.c.bf16 %v162_v5, %v160_v3  ;;  %v161_v11 = vld [vmem:[%s4662_s2 + $0x10] sm:$0xff]  ;;  %v164_v13 = vld [vmem:[%s4662_s2 + $0x28] sm:$0xff]  ;;  %v3932_v35 = vshrl.u32 %v60_v34, 7  ;;  %vm334_vm2 = vcmask 254976   ;;  %vm349_vm3 = vcmask 261120  }
  0x15   :  { %v3163_v9 = vpack.c.bf16 %v56_v7, %v54_v6  ;;  %v159_v10 = vld [vmem:[%s4662_s2] sm:$0xff]  ;;  %3162 = vmatprep.subr.bf16.mxu0 %v3161_v4  ;;  %v166_v14 = vld [vmem:[%s4662_s2 + $0x38] sm:$0xff]  ;;  %v165_v18 = vld [vmem:[%s4662_s2 + $0x30] sm:$0xff]  ;;  %vm504_vm4 = vcmask 257026   ;;  %vm673_vm5 = vcmask 259076   ;;  %vm837_vm6 = vcmask 261126  }
  0x16   :  { %v3837_v12 = vpack.c.bf16 %v161_v11, %v159_v10  ;;  %v163_v15 = vld [vmem:[%s4662_s2 + $0x20] sm:$0xff]  ;;  %3166 = vmatprep.subr.bf16.mxu1 %v3829_v8  ;;  %v3852_v17 = vpack.c.bf16 %v166_v14, %v164_v13  ;;  %v168_v19 = vld [vmem:[%s4662_s2 + $0x48] sm:$0xff]  ;;  %v170_v21 = vld [vmem:[%s4662_s2 + $0x58] sm:$0xff]  ;;  %v62_v36 = vsub.s32 0, %v3932_v35  ;;  %v66_v38 = vsub.s32 1, %v3932_v35 }
  0x17   :  { %3164 = vmatpush1.bf16.msra.mxu0 %v3163_v9  ;;  %v52_v16 = vld [vmem:[%s4660_s0] sm:$0xff]  ;;  %v3861_v20 = vpack.c.bf16 %v165_v18, %v163_v15  ;;  %v3868_v22 = vpack.c.bf16 %v170_v21, %v168_v19  ;;  %v169_v24 = vld [vmem:[%s4662_s2 + $0x50] sm:$0xff]  ;;  %v172_v25 = vld [vmem:[%s4662_s2 + $0x68] sm:$0xff]  ;;  %vm340_vm7 = vcmask 523526   ;;  %vm510_vm8 = vcmask 521476  }
  0x18   :  { %3168 = vmatpush1.bf16.msra.mxu1 %v3837_v12  ;;  %3182 = vmatprep.subr.bf16.mxu0 %v3829_v8  ;;  %v167_v23 = vld [vmem:[%s4662_s2 + $0x40] sm:$0xff]  ;;  %v174_v26 = vld [vmem:[%s4662_s2 + $0x78] sm:$0xff]  ;;  %v53_v28 = vld [vmem:[%s4660_s0 + $0x8] sm:$0xff]  ;;  %vm679_vm9 = vcmask 519426   ;;  %vm843_vm10 = vcmask 517376  }
  0x19   :  { %3170 = vmatprep.subr.bf16.mxu1 %v3852_v17  ;;  %v3886_v27 = vld [vmem:[%s4664_s4] ss:$0 sm:$0xff]  ;;  %v3895_v29 = vpack.c.bf16 %v169_v24, %v167_v23  ;;  %v3899_v30 = vpack.c.bf16 %v174_v26, %v172_v25  ;;  %v173_v32 = vld [vmem:[%s4662_s2 + $0x70] sm:$0xff] }
  0x1a   :  { %3061 = vmatmul.mubr.msk.f32.vlgmr.msra.gmra.mrb[0].mxu0 %vm70_vm0, %v52_v16  ;;  %266 = vrot.lane.b32.xlu0 %v3886_v27, %s3746_s25  ;;  %v171_v31 = vld [vmem:[%s4662_s2 + $0x60] sm:$0xff] }
  0x1b   :  { %147 = vmatprep.mubr.f32.mxu0 %v3745_v0  ;;  %3184 = vmatpush1.bf16.msra.mxu0 %v3837_v12  ;;  %v3911_v33 = vpack.c.bf16 %v173_v32, %v171_v31  ;;  %v58_v37 = vld [vmem:[%s4663_s3] sm:$0x3]  ;;  %s3747_s3 = smov 96  }
  0x1c   :  { %3172 = vmatpush1.bf16.msra.mxu1 %v3861_v20  ;;  %3186 = vmatprep.subr.bf16.mxu0 %v3852_v17  ;;  %v63_v39 = vrot.slane %v58_v37, %v62_v36  ;;  %v67_v41 = vrot.slane %v58_v37, %v66_v38 }
  0x1d   :  { %3174 = vmatprep.subr.bf16.mxu1 %v3868_v22 }
  0x1e   :  { %3062 = vmatmul.mubr.msk.f32.gmra.mrb[2].mxu0 %vm70_vm0, %v53_v28 }
  0x1f   :  { %418 = vmatprep.mubr.f32.mxu0 %v3745_v0  ;;  %3188 = vmatpush1.bf16.msra.mxu0 %v3861_v20 }
  0x20   :  { %3176 = vmatpush1.bf16.msra.mxu1 %v3895_v29  ;;  %3190 = vmatprep.subr.bf16.mxu0 %v3868_v22 }
  0x21   :  { %3178 = vmatprep.subr.bf16.mxu1 %v3899_v30 }
  0x23   :  { %3192 = vmatpush1.bf16.msra.mxu0 %v3895_v29 }
  0x24   :  { %3180 = vmatpush1.bf16.msra.mxu1 %v3911_v33  ;;  %3194 = vmatprep.subr.bf16.mxu0 %v3899_v30 }
  0x25   :  { %3198 = vmatprep.subr.bf16.mxu1 %v3829_v8 }
  0x27   :  { %253 = vmatmul.mubr.f32.vlgmr.msra.gmra.mrb[0].mxu1 %v3745_v0  ;;  %3196 = vmatpush1.bf16.msra.mxu0 %v3911_v33 }
  0x28   :  { %3200 = vmatpush1.bf16.msra.mxu1 %v3837_v12  ;;  %588 = vmatprep.mubr.f32.mxu1 %v3745_v0 }
  0x29   :  { %3202 = vmatprep.subr.bf16.mxu1 %v3852_v17  ;;  %3214 = vmatprep.subr.bf16.mxu0 %v3829_v8 }
  0x2c   :  { %3204 = vmatpush1.bf16.msra.mxu1 %v3861_v20 }
  0x2d   :  { %3206 = vmatprep.subr.bf16.mxu1 %v3868_v22 }
  0x30   :  { %3208 = vmatpush1.bf16.msra.mxu1 %v3895_v29 }
  0x31   :  { %3210 = vmatprep.subr.bf16.mxu1 %v3899_v30 }
  0x34   :  { %3212 = vmatpush1.bf16.msra.mxu1 %v3911_v33 }
  0x35   :  { %3230 = vmatprep.subr.bf16.mxu1 %v3829_v8 }
  0x8c   :  { %v3945_v49 = vpop.permute.xlu0 %266 }
  0xed   :  { %v143_v40 = vpop.f32.mrb[0].mxu0 }
  0xee   :  { %v144_v42 = vadd.f32 %v143_v40, %v63_v39  ;;  %v145_v43 = vpop.f32.mrb[1].mxu0 }
  0xef   :  { %v146_v44 = vadd.f32 %v145_v43, %v67_v41 }
  0xf0   :  { %154 = vst [vmem:[#allocation3] sm:$0xff] %v144_v42 }
  0xf1   :  { %156 = vst.msk [vmem:[#allocation3 + $0x8] sm:$0xff] %vm155_vm1, %v146_v44  ;;  %v149_v45 = vpop.f32.mrb[2].mxu0 }
  0xf2   :  { %v150_v46 = vadd.f32 %v149_v45, %v63_v39  ;;  %v151_v47 = vpop.f32.mrb[3].mxu0 }
  0xf3   :  { %v152_v48 = vadd.f32 %v151_v47, %v67_v41 }
  0xf4   :  { %157 = vst [vmem:[#allocation3 + $0x10] sm:$0xff] %v150_v46 }
  0xf5   :  { %158 = vst.msk [vmem:[#allocation3 + $0x18] sm:$0xff] %vm155_vm1, %v152_v48 }
  0xf7   :  { %v182_v55 = vld [vmem:[#allocation3] sm:$0x3] }
  0xfa   :  { %v254_v50 = vpop.f32.mrb[0].mxu1 }
  0xfb   :  { %v256_v51 = vpop.f32.mrb[1].mxu1  ;;  %v269_v52 = vadd.f32 %v3945_v49, %v254_v50  ;;  %v290_v56 = vrot.slane %v254_v50, 2  ;;  %v183_v57 = vld [vmem:[#allocation3 + $0x10] sm:$0xc0]  ;;  %v259_v58 = vadd.f32 %v254_v50, %v182_v55 }
  0xfc   :  { %v309_v53 = vadd.f32 %v3886_v27, %v256_v51  ;;  %v184_v13 = vld [vmem:[#allocation3 + $0x18] sm:$0xc0]  ;;  %v300_v19 = vrot.slane %v256_v51, 2 }
  0xfd   :  { %271 = vrot.lane.b32.xlu1 %v269_v52, %s3746_s25  ;;  %v292_v59 = vadd.f32 %v290_v56, %v183_v57  ;;  %v3064_v60 = vmul.f32 -1.442695, %v259_v58  ;;  %v342_v57 = vld [vmem:[#allocation3] sm:$0xc]  ;;  %v343_v58 = vld [vmem:[#allocation3 + $0x10] sm:$0x30] }
  0xfe   :  { %v311_v54 = vrot.slane %v309_v53, 2  ;;  %v302_v21 = vadd.f32 %v300_v19, %v184_v13 }
  0xff   :  { %v3065_v61 = vmul.f32 -1.442695, %v292_v59  ;;  %3460 = vpow2.f32 %v3064_v60 }
 0x100   :  { %312 = vrot.lane.b32.xlu0 %v311_v54, %s3746_s25  ;;  %v3066_v23 = vmul.f32 -1.442695, %v302_v21 }
 0x101   :  { %3462 = vpow2.f32 %v3065_v61 }
 0x109   :  { %v3461_v62 = vpop.eup %3460 }
 0x10a   :  { %v263_v1 = vadd.f32 1.0, %v3461_v62 }
 0x10b   :  { %v3463_v63 = vpop.eup %3462 }
 0x10c   :  { %v296_v2 = vadd.f32 1.0, %v3463_v63  ;;  %3464 = vrcp.f32 %v263_v1 }
 0x10e   :  { %3466 = vrcp.f32 %v296_v2 }
 0x116   :  { %v3465_v3 = vpop.eup %3464 }
 0x117   :  { %v281_v28 = vsub.f32 1.0, %v3465_v3  ;;  %v287_v32 = vmul.f32 0.0, %v3465_v3 }
 0x118   :  { %v3467_v6 = vpop.eup %3466 }
 0x16f   :  { %v272_v4 = vpop.permute.xlu1 %271 }
 0x170   :  { %v274_v5 = vmul.f32 %v3465_v3, %v272_v4 }
 0x172   :  { %v313_v7 = vpop.permute.xlu0 %312  ;;  %276 = vrot.lane.b32.xlu0 %v274_v5, %s3746_s25 }
 0x173   :  { %v315_v9 = vmul.f32 %v3467_v6, %v313_v7 }
 0x175   :  { %317 = vrot.lane.b32.xlu1 %v315_v9, %s3746_s25 }
 0x1e4   :  { %v277_v10 = vpop.permute.xlu0 %276 }
 0x1e5   :  { %v279_v11 = vadd.f32 %v277_v10, %v182_v55 }
 0x1e7   :  { %3468 = vtanh.f32 %v279_v11  ;;  %v318_v14 = vpop.permute.xlu1 %317 }
 0x1e8   :  { %v320_v15 = vadd.f32 %v318_v14, %v184_v13  ;;  %v344_v13 = vld [vmem:[#allocation3 + $0x18] sm:$0x30] }
 0x1ea   :  { %3470 = vtanh.f32 %v320_v15 }
 0x1eb   :  { %3472 = vpow2.f32 %v3066_v23 }
 0x1f1   :  { %v3469_v16 = vpop.eup %3468 }
 0x1f2   :  { %283 = vrot.lane.b32.xlu0 %v3469_v16, %s3747_s3 }
 0x1f4   :  { %v3471_v18 = vpop.eup %3470 }
 0x1f5   :  { %324 = vrot.lane.b32.xlu1 %v3471_v18, %s3747_s3  ;;  %v3473_v24 = vpop.eup %3472 }
 0x1f6   :  { %v306_v25 = vadd.f32 1.0, %v3473_v24 }
 0x1f8   :  { %3474 = vrcp.f32 %v306_v25 }
 0x202   :  { %v3475_v26 = vpop.eup %3474 }
 0x203   :  { %v322_v37 = vsub.f32 1.0, %v3475_v26  ;;  %v328_v41 = vmul.f32 0.0, %v3475_v26 }
 0x264   :  { %v284_v31 = vpop.permute.xlu0 %283 }
 0x265   :  { %v286_v34 = vmul.f32 %v284_v31, %v281_v28 }
 0x267   :  { %v3955_v39 = vadd.f32 %v287_v32, %v286_v34  ;;  %v325_v40 = vpop.permute.xlu1 %324 }
 0x268   :  { %v327_v42 = vmul.f32 %v325_v40, %v322_v37 }
 0x269   :  { %331 = vrot.lane.b32.xlu1 %v3955_v39, %s3747_s3  ;;  %v454_v31 = vrot.slane %v3955_v39, 6 }
 0x26a   :  { %v3959_v43 = vadd.f32 %v328_v41, %v327_v42 }
 0x26c   :  { %v345_v44 = vrot.slane %v3959_v43, 6  ;;  %v496_v37 = vrot.slane %v3959_v43, 2 }
 0x26e   :  { %346 = vrot.lane.b32.xlu0 %v345_v44, %s3748_s30 }
 0x2db   :  { %v332_v45 = vpop.permute.xlu1 %331 }
 0x2dc   :  { %335 = vst.msk [vmem:[#allocation2] sm:$0x3] %vm334_vm2, %v332_v45 }
 0x2e0   :  { %v347_v46 = vpop.permute.xlu0 %346 }
 0x2e1   :  { %v350_v47 = vsel %vm349_vm3, %v332_v45, %v347_v46 }
 0x2e2   :  { %3067 = vmatmul.mubr.msk.f32.vlgmr.msra.gmra.mrb[4].mxu0 %vm155_vm1, %v350_v47 }
 0x2e3   :  { %3216 = vmatpush1.bf16.msra.mxu0 %v3837_v12  ;;  %757 = vmatprep.mubr.f32.mxu0 %v3745_v0 }
 0x2e4   :  { %3218 = vmatprep.subr.bf16.mxu0 %v3852_v17 }
 0x2e7   :  { %3220 = vmatpush1.bf16.msra.mxu0 %v3861_v20 }
 0x2e8   :  { %3222 = vmatprep.subr.bf16.mxu0 %v3868_v22 }
 0x2eb   :  { %3224 = vmatpush1.bf16.msra.mxu0 %v3895_v29 }
 0x2ec   :  { %3226 = vmatprep.subr.bf16.mxu0 %v3899_v30 }
 0x2ef   :  { %3228 = vmatpush1.bf16.msra.mxu0 %v3911_v33 }
 0x2f0   :  { %3246 = vmatprep.subr.bf16.mxu0 %v3829_v8 }
 0x3b5   :  { %v420_v48 = vpop.f32.mrb[4].mxu0 }
 0x3b6   :  { %v435_v50 = vadd.f32 %v420_v48, %v3945_v49  ;;  %v422_v51 = vpop.f32.mrb[5].mxu0  ;;  %v426_v55 = vrot.slane %v420_v48, 6  ;;  %v458_v56 = vrot.slane %v420_v48, 4 }
 0x3b7   :  { %v477_v52 = vadd.f32 %v3886_v27, %v422_v51  ;;  %v468_v21 = vrot.slane %v422_v51, 4 }
 0x3b8   :  { %v437_v53 = vrot.slane %v435_v50, 6  ;;  %v428_v59 = vadd.f32 %v426_v55, %v342_v57  ;;  %v460_v60 = vadd.f32 %v458_v56, %v343_v58 }
 0x3b9   :  { %v479_v54 = vrot.slane %v477_v52, 4  ;;  %v470_v23 = vadd.f32 %v468_v21, %v344_v13 }
 0x3ba   :  { %438 = vrot.lane.b32.xlu0 %v437_v53, %s3746_s25  ;;  %v3068_v61 = vmul.f32 -1.442695, %v428_v59  ;;  %v3069_v62 = vmul.f32 -1.442695, %v460_v60 }
 0x3bb   :  { %480 = vrot.lane.b32.xlu1 %v479_v54, %s3746_s25  ;;  %v3070_v24 = vmul.f32 -1.442695, %v470_v23 }
 0x3bc   :  { %3476 = vpow2.f32 %v3068_v61 }
 0x3bd   :  { %3478 = vpow2.f32 %v3069_v62  ;;  %v512_v62 = vld [vmem:[#allocation3] sm:$0x30] }
 0x3c6   :  { %v3477_v63 = vpop.eup %3476 }
 0x3c7   :  { %v3479_v1 = vpop.eup %3478  ;;  %v432_v2 = vadd.f32 1.0, %v3477_v63  ;;  %v513_v63 = vld [vmem:[#allocation3 + $0x10] sm:$0xc] }
 0x3c8   :  { %v464_v3 = vadd.f32 1.0, %v3479_v1 }
 0x3c9   :  { %3480 = vrcp.f32 %v432_v2 }
 0x3ca   :  { %3482 = vrcp.f32 %v464_v3 }
 0x3d3   :  { %v3481_v4 = vpop.eup %3480 }
 0x3d4   :  { %v3483_v6 = vpop.eup %3482  ;;  %v448_v32 = vsub.f32 1.0, %v3481_v4  ;;  %v456_v41 = vmul.f32 %v3481_v4, %v454_v31 }
 0x42c   :  { %v439_v5 = vpop.permute.xlu0 %438 }
 0x42d   :  { %v441_v7 = vmul.f32 %v3481_v4, %v439_v5  ;;  %v481_v9 = vpop.permute.xlu1 %480 }
 0x42e   :  { %v483_v10 = vmul.f32 %v3483_v6, %v481_v9 }
 0x42f   :  { %443 = vrot.lane.b32.xlu0 %v441_v7, %s3746_s25 }
 0x430   :  { %485 = vrot.lane.b32.xlu1 %v483_v10, %s3746_s25 }
 0x4a1   :  { %v444_v11 = vpop.permute.xlu0 %443 }
 0x4a2   :  { %v446_v14 = vadd.f32 %v444_v11, %v342_v57  ;;  %v486_v15 = vpop.permute.xlu1 %485 }
 0x4a3   :  { %v488_v16 = vadd.f32 %v486_v15, %v344_v13 }
 0x4a4   :  { %3484 = vtanh.f32 %v446_v14 }
 0x4a5   :  { %3486 = vtanh.f32 %v488_v16 }
 0x4a6   :  { %3488 = vpow2.f32 %v3070_v24 }
 0x4ae   :  { %v3485_v18 = vpop.eup %3484 }
 0x4af   :  { %v3487_v19 = vpop.eup %3486  ;;  %450 = vrot.lane.b32.xlu0 %v3485_v18, %s3747_s3 }
 0x4b0   :  { %492 = vrot.lane.b32.xlu1 %v3487_v19, %s3747_s3  ;;  %v3489_v25 = vpop.eup %3488  ;;  %v514_v19 = vld [vmem:[#allocation3 + $0x18] sm:$0xc] }
 0x4b1   :  { %v474_v26 = vadd.f32 1.0, %v3489_v25 }
 0x4b3   :  { %3490 = vrcp.f32 %v474_v26 }
 0x4bd   :  { %v3491_v28 = vpop.eup %3490 }
 0x4be   :  { %v490_v40 = vsub.f32 1.0, %v3491_v28  ;;  %v498_v46 = vmul.f32 %v3491_v28, %v496_v37 }
 0x521   :  { %v451_v34 = vpop.permute.xlu0 %450 }
 0x522   :  { %v453_v42 = vmul.f32 %v451_v34, %v448_v32  ;;  %v493_v44 = vpop.permute.xlu1 %492 }
 0x523   :  { %v495_v45 = vmul.f32 %v493_v44, %v490_v40 }
 0x524   :  { %v3985_v47 = vadd.f32 %v456_v41, %v453_v42 }
 0x525   :  { %v3987_v48 = vadd.f32 %v498_v46, %v495_v45 }
 0x526   :  { %501 = vrot.lane.b32.xlu1 %v3985_v47, %s3747_s3  ;;  %v624_v41 = vrot.slane %v3985_v47, 6 }
 0x527   :  { %v515_v50 = vrot.slane %v3987_v48, 2 }
 0x529   :  { %516 = vrot.lane.b32.xlu0 %v515_v50, %s3748_s30 }
 0x598   :  { %v502_v39 = vpop.permute.xlu1 %501 }
 0x599   :  { %505 = vst.msk [vmem:[#allocation2] sm:$0xc] %vm504_vm4, %v502_v39 }
 0x59b   :  { %v517_v51 = vpop.permute.xlu0 %516 }
 0x59c   :  { %v519_v52 = vsel %vm349_vm3, %v502_v39, %v517_v51 }
 0x59d   :  { %v521_v53 = vrot.slane %v519_v52, 2 }
 0x59f   :  { %3071 = vmatmul.mubr.msk.f32.vlgmr.msra.gmra.mrb[2].mxu1 %vm155_vm1, %v521_v53 }
 0x5a0   :  { %3232 = vmatpush1.bf16.msra.mxu1 %v3837_v12  ;;  %921 = vmatprep.mubr.f32.mxu1 %v3745_v0 }
 0x5a1   :  { %3234 = vmatprep.subr.bf16.mxu1 %v3852_v17 }
 0x5a4   :  { %3236 = vmatpush1.bf16.msra.mxu1 %v3861_v20 }
 0x5a5   :  { %3238 = vmatprep.subr.bf16.mxu1 %v3868_v22 }
 0x5a8   :  { %3240 = vmatpush1.bf16.msra.mxu1 %v3895_v29 }
 0x5a9   :  { %3242 = vmatprep.subr.bf16.mxu1 %v3899_v30 }
 0x5ac   :  { %3244 = vmatpush1.bf16.msra.mxu1 %v3911_v33 }
 0x5ad   :  { %3262 = vmatprep.subr.bf16.mxu1 %v3829_v8 }
 0x672   :  { %v590_v54 = vpop.f32.mrb[2].mxu1 }
 0x673   :  { %v605_v55 = vadd.f32 %v590_v54, %v3945_v49  ;;  %v592_v56 = vpop.f32.mrb[3].mxu1  ;;  %v596_v60 = vrot.slane %v590_v54, 4  ;;  %v628_v61 = vrot.slane %v590_v54, 6 }
 0x674   :  { %v647_v57 = vadd.f32 %v3886_v27, %v592_v56  ;;  %v638_v28 = vrot.slane %v592_v56, 6 }
 0x675   :  { %v607_v58 = vrot.slane %v605_v55, 4  ;;  %v598_v1 = vadd.f32 %v596_v60, %v512_v62  ;;  %v630_v2 = vadd.f32 %v628_v61, %v513_v63 }
 0x676   :  { %v649_v59 = vrot.slane %v647_v57, 6  ;;  %v640_v31 = vadd.f32 %v638_v28, %v514_v19 }
 0x677   :  { %608 = vrot.lane.b32.xlu0 %v607_v58, %s3746_s25  ;;  %v3072_v3 = vmul.f32 -1.442695, %v598_v1  ;;  %v3073_v4 = vmul.f32 -1.442695, %v630_v2  ;;  %v682_v2 = vld [vmem:[#allocation3 + $0x10] sm:$0x3] }
 0x678   :  { %650 = vrot.lane.b32.xlu1 %v649_v59, %s3746_s25  ;;  %v3074_v32 = vmul.f32 -1.442695, %v640_v31 }
 0x679   :  { %3492 = vpow2.f32 %v3072_v3  ;;  %v681_v3 = vld [vmem:[#allocation3] sm:$0xc0] }
 0x67a   :  { %3494 = vpow2.f32 %v3073_v4 }
 0x683   :  { %v3493_v5 = vpop.eup %3492 }
 0x684   :  { %v3495_v6 = vpop.eup %3494  ;;  %v602_v7 = vadd.f32 1.0, %v3493_v5 }
 0x685   :  { %v634_v9 = vadd.f32 1.0, %v3495_v6 }
 0x686   :  { %3496 = vrcp.f32 %v602_v7 }
 0x687   :  { %3498 = vrcp.f32 %v634_v9 }
 0x690   :  { %v3497_v10 = vpop.eup %3496 }
 0x691   :  { %v3499_v13 = vpop.eup %3498  ;;  %v618_v42 = vsub.f32 1.0, %v3497_v10  ;;  %v626_v46 = vmul.f32 %v3497_v10, %v624_v41 }
 0x6e9   :  { %v609_v11 = vpop.permute.xlu0 %608 }
 0x6ea   :  { %v611_v14 = vmul.f32 %v3497_v10, %v609_v11  ;;  %v651_v15 = vpop.permute.xlu1 %650 }
 0x6eb   :  { %v653_v16 = vmul.f32 %v3499_v13, %v651_v15 }
 0x6ec   :  { %613 = vrot.lane.b32.xlu0 %v611_v14, %s3746_s25 }
 0x6ed   :  { %655 = vrot.lane.b32.xlu1 %v653_v16, %s3746_s25 }
 0x75e   :  { %v614_v18 = vpop.permute.xlu0 %613 }
 0x75f   :  { %v616_v21 = vadd.f32 %v614_v18, %v512_v62  ;;  %v656_v23 = vpop.permute.xlu1 %655 }
 0x760   :  { %v658_v24 = vadd.f32 %v656_v23, %v514_v19 }
 0x761   :  { %3500 = vtanh.f32 %v616_v21  ;;  %v683_v21 = vld [vmem:[#allocation3 + $0x18] sm:$0x3] }
 0x762   :  { %3502 = vtanh.f32 %v658_v24 }
 0x763   :  { %3504 = vpow2.f32 %v3074_v32 }
 0x76b   :  { %v3501_v25 = vpop.eup %3500 }
 0x76c   :  { %v3503_v26 = vpop.eup %3502  ;;  %620 = vrot.lane.b32.xlu0 %v3501_v25, %s3747_s3 }
 0x76d   :  { %662 = vrot.lane.b32.xlu1 %v3503_v26, %s3747_s3  ;;  %v3505_v34 = vpop.eup %3504 }
 0x76e   :  { %v644_v37 = vadd.f32 1.0, %v3505_v34 }
 0x770   :  { %3506 = vrcp.f32 %v644_v37 }
 0x77a   :  { %v3507_v40 = vpop.eup %3506 }
 0x77b   :  { %v660_v45 = vsub.f32 1.0, %v3507_v40  ;;  %v667_v53 = vmul.f32 %v3507_v40, %v515_v50 }
 0x7de   :  { %v621_v44 = vpop.permute.xlu0 %620 }
 0x7df   :  { %v623_v39 = vmul.f32 %v621_v44, %v618_v42  ;;  %v663_v51 = vpop.permute.xlu1 %662 }
 0x7e0   :  { %v665_v52 = vmul.f32 %v663_v51, %v660_v45 }
 0x7e1   :  { %v4018_v54 = vadd.f32 %v626_v46, %v623_v39 }
 0x7e2   :  { %v4020_v55 = vadd.f32 %v667_v53, %v665_v52 }
 0x7e3   :  { %670 = vrot.lane.b32.xlu1 %v4018_v54, %s3747_s3  ;;  %v793_v45 = vrot.slane %v4018_v54, 6 }
 0x7e4   :  { %v684_v56 = vrot.slane %v4020_v55, 6  ;;  %v829_v42 = vrot.slane %v4020_v55, 2 }
 0x7e6   :  { %685 = vrot.lane.b32.xlu0 %v684_v56, %s3748_s30 }
 0x855   :  { %v671_v47 = vpop.permute.xlu1 %670 }
 0x856   :  { %674 = vst.msk [vmem:[#allocation2] sm:$0x30] %vm673_vm5, %v671_v47 }
 0x858   :  { %v686_v57 = vpop.permute.xlu0 %685 }
 0x859   :  { %v688_v58 = vsel %vm349_vm3, %v671_v47, %v686_v57 }
 0x85a   :  { %v690_v59 = vrot.slane %v688_v58, 4 }
 0x85c   :  { %3075 = vmatmul.mubr.msk.f32.vlgmr.msra.gmra.mrb[6].mxu0 %vm155_vm1, %v690_v59 }
 0x85d   :  { %3248 = vmatpush1.bf16.msra.mxu0 %v3837_v12  ;;  %1084 = vmatprep.mubr.f32.mxu0 %v3745_v0 }
 0x85e   :  { %3250 = vmatprep.subr.bf16.mxu0 %v3852_v17 }
 0x861   :  { %3252 = vmatpush1.bf16.msra.mxu0 %v3861_v20 }
 0x862   :  { %3254 = vmatprep.subr.bf16.mxu0 %v3868_v22 }
 0x865   :  { %3256 = vmatpush1.bf16.msra.mxu0 %v3895_v29 }
 0x866   :  { %3258 = vmatprep.subr.bf16.mxu0 %v3899_v30 }
 0x869   :  { %3260 = vmatpush1.bf16.msra.mxu0 %v3911_v33 }
 0x86a   :  { %3278 = vmatprep.subr.bf16.mxu0 %v3829_v8 }
 0x92f   :  { %v759_v50 = vpop.f32.mrb[6].mxu0 }
 0x930   :  { %v774_v60 = vadd.f32 %v759_v50, %v3945_v49  ;;  %v761_v61 = vpop.f32.mrb[7].mxu0  ;;  %v765_v1 = vrot.slane %v759_v50, 2  ;;  %v797_v4 = vadd.f32 %v759_v50, %v682_v2 }
 0x931   :  { %v811_v62 = vadd.f32 %v3886_v27, %v761_v61  ;;  %v804_v32 = vadd.f32 %v761_v61, %v683_v21 }
 0x932   :  { %v776_v63 = vrot.slane %v774_v60, 2  ;;  %v767_v5 = vadd.f32 %v765_v1, %v681_v3  ;;  %v3077_v6 = vmul.f32 -1.442695, %v797_v4  ;;  %v845_v4 = vld [vmem:[#allocation3 + $0x10] sm:$0x3] }
 0x933   :  { %813 = vrot.lane.b32.xlu1 %v811_v62, %s3746_s25  ;;  %v3078_v34 = vmul.f32 -1.442695, %v804_v32 }
 0x934   :  { %777 = vrot.lane.b32.xlu0 %v776_v63, %s3746_s25  ;;  %v3076_v7 = vmul.f32 -1.442695, %v767_v5  ;;  %3508 = vpow2.f32 %v3077_v6 }
 0x936   :  { %3510 = vpow2.f32 %v3076_v7  ;;  %v846_v7 = vld [vmem:[#allocation3] sm:$0xc0] }
 0x93e   :  { %v3509_v8 = vpop.eup %3508 }
 0x93f   :  { %v801_v10 = vadd.f32 1.0, %v3509_v8 }
 0x940   :  { %v3511_v9 = vpop.eup %3510 }
 0x941   :  { %v771_v11 = vadd.f32 1.0, %v3511_v9  ;;  %3512 = vrcp.f32 %v801_v10 }
 0x943   :  { %3514 = vrcp.f32 %v771_v11 }
 0x94b   :  { %v3513_v13 = vpop.eup %3512 }
 0x94d   :  { %v3515_v15 = vpop.eup %3514 }
 0x94e   :  { %v787_v39 = vsub.f32 1.0, %v3515_v15  ;;  %v795_v56 = vmul.f32 %v3515_v15, %v793_v45 }
 0x9a5   :  { %v814_v14 = vpop.permute.xlu1 %813 }
 0x9a6   :  { %v816_v16 = vmul.f32 %v3513_v13, %v814_v14  ;;  %v778_v18 = vpop.permute.xlu0 %777 }
 0x9a7   :  { %v780_v19 = vmul.f32 %v3515_v15, %v778_v18 }
 0x9a8   :  { %818 = vrot.lane.b32.xlu1 %v816_v16, %s3746_s25 }
 0x9a9   :  { %782 = vrot.lane.b32.xlu0 %v780_v19, %s3746_s25 }
 0xa1a   :  { %v819_v23 = vpop.permute.xlu1 %818 }
 0xa1b   :  { %v821_v24 = vadd.f32 %v819_v23, %v683_v21  ;;  %v783_v25 = vpop.permute.xlu0 %782 }
 0xa1c   :  { %v785_v26 = vadd.f32 %v783_v25, %v681_v3 }
 0xa1d   :  { %3516 = vtanh.f32 %v821_v24 }
 0xa1e   :  { %3518 = vtanh.f32 %v785_v26 }
 0xa1f   :  { %3520 = vpow2.f32 %v3078_v34 }
 0xa27   :  { %v3517_v28 = vpop.eup %3516 }
 0xa28   :  { %v3519_v31 = vpop.eup %3518  ;;  %825 = vrot.lane.b32.xlu1 %v3517_v28, %s3747_s3  ;;  %v847_v28 = vld [vmem:[#allocation3 + $0x8] sm:$0xc0] }
 0xa29   :  { %789 = vrot.lane.b32.xlu0 %v3519_v31, %s3747_s3  ;;  %v3521_v37 = vpop.eup %3520 }
 0xa2a   :  { %v808_v40 = vadd.f32 1.0, %v3521_v37 }
 0xa2c   :  { %3522 = vrcp.f32 %v808_v40 }
 0xa36   :  { %v3523_v41 = vpop.eup %3522 }
 0xa37   :  { %v823_v44 = vsub.f32 1.0, %v3523_v41  ;;  %v831_v52 = vmul.f32 %v3523_v41, %v829_v42 }
 0xa9a   :  { %v826_v46 = vpop.permute.xlu1 %825 }
 0xa9b   :  { %v828_v51 = vmul.f32 %v826_v46, %v823_v44  ;;  %v790_v53 = vpop.permute.xlu0 %789 }
 0xa9c   :  { %v792_v47 = vmul.f32 %v790_v53, %v787_v39 }
 0xa9d   :  { %v4048_v57 = vadd.f32 %v831_v52, %v828_v51 }
 0xa9e   :  { %v4050_v58 = vadd.f32 %v795_v56, %v792_v47 }
 0xa9f   :  { %v848_v59 = vrot.slane %v4048_v57, 2 }
 0xaa0   :  { %834 = vrot.lane.b32.xlu1 %v4050_v58, %s3747_s3  ;;  %v953_v39 = vrot.slane %v4050_v58, 6 }
 0xaa1   :  { %849 = vrot.lane.b32.xlu0 %v848_v59, %s3748_s30 }
 0xb12   :  { %v835_v54 = vpop.permute.xlu1 %834 }
 0xb13   :  { %838 = vst.msk [vmem:[#allocation2] sm:$0xc0] %vm837_vm6, %v835_v54  ;;  %v850_v50 = vpop.permute.xlu0 %849 }
 0xb14   :  { %v852_v60 = vsel %vm349_vm3, %v835_v54, %v850_v50 }
 0xb15   :  { %v854_v61 = vrot.slane %v852_v60, 6 }
 0xb17   :  { %3079 = vmatmul.mubr.msk.f32.vlgmr.msra.gmra.mrb[4].mxu1 %vm155_vm1, %v854_v61 }
 0xb18   :  { %3264 = vmatpush1.bf16.msra.mxu1 %v3837_v12  ;;  %1252 = vmatprep.mubr.f32.mxu1 %v3745_v0 }
 0xb19   :  { %3266 = vmatprep.subr.bf16.mxu1 %v3852_v17 }
 0xb1c   :  { %3268 = vmatpush1.bf16.msra.mxu1 %v3861_v20 }
 0xb1d   :  { %3270 = vmatprep.subr.bf16.mxu1 %v3868_v22 }
 0xb20   :  { %3272 = vmatpush1.bf16.msra.mxu1 %v3895_v29 }
 0xb21   :  { %3274 = vmatprep.subr.bf16.mxu1 %v3899_v30 }
 0xb24   :  { %3276 = vmatpush1.bf16.msra.mxu1 %v3911_v33 }
 0xbea   :  { %v923_v62 = vpop.f32.mrb[4].mxu1 }
 0xbeb   :  { %v935_v63 = vadd.f32 %v923_v62, %v3945_v49  ;;  %v925_v1 = vpop.f32.mrb[5].mxu1  ;;  %v958_v5 = vrot.slane %v923_v62, 2  ;;  %v928_v6 = vadd.f32 %v923_v62, %v845_v4 }
 0xbec   :  { %v977_v2 = vadd.f32 %v3886_v27, %v925_v1  ;;  %v968_v40 = vrot.slane %v925_v1, 2 }
 0xbed   :  { %937 = vrot.lane.b32.xlu0 %v935_v63, %s3746_s25  ;;  %v960_v8 = vadd.f32 %v958_v5, %v846_v7  ;;  %v3080_v9 = vmul.f32 -1.442695, %v928_v6 }
 0xbee   :  { %v979_v3 = vrot.slane %v977_v2, 2  ;;  %v970_v41 = vadd.f32 %v968_v40, %v847_v28 }
 0xbef   :  { %v3081_v10 = vmul.f32 -1.442695, %v960_v8  ;;  %3524 = vpow2.f32 %v3080_v9 }
 0xbf0   :  { %980 = vrot.lane.b32.xlu1 %v979_v3, %s3746_s25  ;;  %v3082_v42 = vmul.f32 -1.442695, %v970_v41 }
 0xbf1   :  { %3526 = vpow2.f32 %v3081_v10 }
 0xbf9   :  { %v3525_v11 = vpop.eup %3524 }
 0xbfa   :  { %v932_v14 = vadd.f32 1.0, %v3525_v11 }
 0xbfb   :  { %v3527_v13 = vpop.eup %3526 }
 0xbfc   :  { %v964_v15 = vadd.f32 1.0, %v3527_v13  ;;  %3528 = vrcp.f32 %v932_v14 }
 0xbfe   :  { %3530 = vrcp.f32 %v964_v15 }
 0xc06   :  { %v3529_v16 = vpop.eup %3528 }
 0xc07   :  { %v947_v51 = vsub.f32 1.0, %v3529_v16  ;;  %v955_v53 = vmul.f32 %v3529_v16, %v953_v39 }
 0xc08   :  { %v3531_v21 = vpop.eup %3530 }
 0xc5f   :  { %v938_v18 = vpop.permute.xlu0 %937 }
 0xc60   :  { %v940_v19 = vmul.f32 %v3529_v16, %v938_v18 }
 0xc62   :  { %942 = vrot.lane.b32.xlu0 %v940_v19, %s3746_s25  ;;  %v981_v23 = vpop.permute.xlu1 %980 }
 0xc63   :  { %v983_v24 = vmul.f32 %v3531_v21, %v981_v23  ;;  %v1011_v23 = vld [vmem:[#allocation3 + $0x8] sm:$0x30] }
 0xc65   :  { %985 = vrot.lane.b32.xlu1 %v983_v24, %s3746_s25 }
 0xcd4   :  { %v943_v25 = vpop.permute.xlu0 %942 }
 0xcd5   :  { %v945_v26 = vadd.f32 %v943_v25, %v845_v4 }
 0xcd7   :  { %3532 = vtanh.f32 %v945_v26  ;;  %v986_v31 = vpop.permute.xlu1 %985 }
 0xcd8   :  { %v988_v32 = vadd.f32 %v986_v31, %v847_v28 }
 0xcda   :  { %3534 = vtanh.f32 %v988_v32 }
 0xcdb   :  { %3536 = vpow2.f32 %v3082_v42 }
 0xce1   :  { %v3533_v34 = vpop.eup %3532 }
 0xce2   :  { %949 = vrot.lane.b32.xlu0 %v3533_v34, %s3747_s3 }
 0xce4   :  { %v3535_v37 = vpop.eup %3534 }
 0xce5   :  { %992 = vrot.lane.b32.xlu1 %v3535_v37, %s3747_s3  ;;  %v3537_v44 = vpop.eup %3536 }
 0xce6   :  { %v974_v45 = vadd.f32 1.0, %v3537_v44 }
 0xce8   :  { %3538 = vrcp.f32 %v974_v45 }
 0xcf2   :  { %v3539_v46 = vpop.eup %3538 }
 0xcf3   :  { %v990_v47 = vsub.f32 1.0, %v3539_v46  ;;  %v997_v61 = vmul.f32 %v3539_v46, %v848_v59 }
 0xd54   :  { %v950_v52 = vpop.permute.xlu0 %949 }
 0xd55   :  { %v952_v56 = vmul.f32 %v950_v52, %v947_v51 }
 0xd57   :  { %v4078_v54 = vadd.f32 %v955_v53, %v952_v56  ;;  %v993_v50 = vpop.permute.xlu1 %992 }
 0xd58   :  { %v995_v60 = vmul.f32 %v993_v50, %v990_v47 }
 0xd59   :  { %1000 = vrot.lane.b32.xlu1 %v4078_v54, %s3747_s3  ;;  %v1120_v44 = vrot.slane %v4078_v54, 6 }
 0xd5a   :  { %v4084_v62 = vadd.f32 %v997_v61, %v995_v60 }
 0xd5c   :  { %v1012_v63 = vrot.slane %v4084_v62, 6  ;;  %v1162_v39 = vrot.slane %v4084_v62, 2 }
 0xd5e   :  { %1013 = vrot.lane.b32.xlu0 %v1012_v63, %s3748_s30 }
 0xdcb   :  { %v4088_v58 = vpop.permute.xlu1 %1000 }
 0xdd0   :  { %v1014_v1 = vpop.permute.xlu0 %1013 }
 0xdd1   :  { %v1016_v2 = vsel %vm349_vm3, %v4088_v58, %v1014_v1 }
 0xdd2   :  { %3083 = vmatmul.mubr.msk.f32.vlgmr.msra.gmra.mrb[8].mxu0 %vm155_vm1, %v1016_v2 }
 0xdd3   :  { %3280 = vmatpush1.bf16.msra.mxu0 %v3837_v12  ;;  %1419 = vmatprep.mubr.f32.mxu0 %v3745_v0 }
 0xdd4   :  { %3282 = vmatprep.subr.bf16.mxu0 %v3852_v17 }
 0xdd7   :  { %3284 = vmatpush1.bf16.msra.mxu0 %v3861_v20 }
 0xdd8   :  { %3286 = vmatprep.subr.bf16.mxu0 %v3868_v22  ;;  %v1009_v22 = vld [vmem:[#allocation3 + $0x10] sm:$0xc] }
 0xddb   :  { %3288 = vmatpush1.bf16.msra.mxu0 %v3895_v29  ;;  %v1010_v29 = vld [vmem:[#allocation3] sm:$0x30] }
 0xddc   :  { %3290 = vmatprep.subr.bf16.mxu0 %v3899_v30 }
 0xddf   :  { %3292 = vmatpush1.bf16.msra.mxu0 %v3911_v33 }
 0xea5   :  { %v1086_v59 = vpop.f32.mrb[8].mxu0 }
 0xea6   :  { %v1101_v3 = vadd.f32 %v1086_v59, %v3945_v49  ;;  %v1088_v4 = vpop.f32.mrb[9].mxu0  ;;  %v1092_v17 = vrot.slane %v1086_v59, 6  ;;  %v1124_v20 = vrot.slane %v1086_v59, 4 }
 0xea7   :  { %v1143_v12 = vadd.f32 %v3886_v27, %v1088_v4  ;;  %v1134_v32 = vrot.slane %v1088_v4, 4 }
 0xea8   :  { %v1103_v5 = vrot.slane %v1101_v3, 6  ;;  %v1094_v7 = vadd.f32 %v1092_v17, %v1009_v22  ;;  %v1126_v30 = vadd.f32 %v1124_v20, %v1010_v29 }
 0xea9   :  { %v1145_v6 = vrot.slane %v1143_v12, 4  ;;  %v1136_v34 = vadd.f32 %v1134_v32, %v1011_v23 }
 0xeaa   :  { %1104 = vrot.lane.b32.xlu0 %v1103_v5, %s3746_s25  ;;  %v3084_v8 = vmul.f32 -1.442695, %v1094_v7  ;;  %v3085_v33 = vmul.f32 -1.442695, %v1126_v30  ;;  %v4131_v5 = vld [vmem:[%s4664_s4] ss:$0 sm:$0xff] }
 0xeab   :  { %1146 = vrot.lane.b32.xlu1 %v1145_v6, %s3746_s25  ;;  %v3086_v37 = vmul.f32 -1.442695, %v1136_v34  ;;  %v1176_v7 = vld [vmem:[#allocation3 + $0x10] sm:$0x30]  ;;  %v1177_v30 = vld [vmem:[#allocation3] sm:$0xc] }
 0xeac   :  { %3540 = vpow2.f32 %v3084_v8 }
 0xead   :  { %3542 = vpow2.f32 %v3085_v33 }
 0xeb6   :  { %v3541_v9 = vpop.eup %3540 }
 0xeb7   :  { %v3543_v10 = vpop.eup %3542  ;;  %v1098_v11 = vadd.f32 1.0, %v3541_v9 }
 0xeb8   :  { %v1130_v27 = vadd.f32 1.0, %v3543_v10 }
 0xeb9   :  { %3544 = vrcp.f32 %v1098_v11 }
 0xeba   :  { %3546 = vrcp.f32 %v1130_v27 }
 0xec3   :  { %v3545_v13 = vpop.eup %3544 }
 0xec4   :  { %v3547_v15 = vpop.eup %3546  ;;  %v1114_v45 = vsub.f32 1.0, %v3545_v13  ;;  %v1122_v52 = vmul.f32 %v3545_v13, %v1120_v44 }
 0xf1c   :  { %v1105_v14 = vpop.permute.xlu0 %1104 }
 0xf1d   :  { %v1107_v16 = vmul.f32 %v3545_v13, %v1105_v14  ;;  %v1147_v18 = vpop.permute.xlu1 %1146 }
 0xf1e   :  { %v1149_v19 = vmul.f32 %v3547_v15, %v1147_v18 }
 0xf1f   :  { %1109 = vrot.lane.b32.xlu0 %v1107_v16, %s3746_s25 }
 0xf20   :  { %1151 = vrot.lane.b32.xlu1 %v1149_v19, %s3746_s25 }
 0xf91   :  { %v1110_v21 = vpop.permute.xlu0 %1109 }
 0xf92   :  { %v1112_v24 = vadd.f32 %v1110_v21, %v1009_v22  ;;  %v1152_v25 = vpop.permute.xlu1 %1151 }
 0xf93   :  { %v1154_v26 = vadd.f32 %v1152_v25, %v1011_v23 }
 0xf94   :  { %3548 = vtanh.f32 %v1112_v24 }
 0xf95   :  { %3550 = vtanh.f32 %v1154_v26  ;;  %v1178_v26 = vld [vmem:[#allocation3 + $0x8] sm:$0xc] }
 0xf96   :  { %3552 = vpow2.f32 %v3086_v37 }
 0xf9e   :  { %v3549_v28 = vpop.eup %3548 }
 0xf9f   :  { %v3551_v31 = vpop.eup %3550  ;;  %1116 = vrot.lane.b32.xlu0 %v3549_v28, %s3747_s3 }
 0xfa0   :  { %1158 = vrot.lane.b32.xlu1 %v3551_v31, %s3747_s3  ;;  %v3553_v40 = vpop.eup %3552 }
 0xfa1   :  { %v1140_v41 = vadd.f32 1.0, %v3553_v40 }
 0xfa3   :  { %3554 = vrcp.f32 %v1140_v41 }
 0xfad   :  { %v3555_v42 = vpop.eup %3554 }
 0xfae   :  { %v1156_v51 = vsub.f32 1.0, %v3555_v42  ;;  %v1164_v50 = vmul.f32 %v3555_v42, %v1162_v39 }
0x1011   :  { %v1117_v46 = vpop.permute.xlu0 %1116 }
0x1012   :  { %v1119_v53 = vmul.f32 %v1117_v46, %v1114_v45  ;;  %v1159_v56 = vpop.permute.xlu1 %1158 }
0x1013   :  { %v1161_v47 = vmul.f32 %v1159_v56, %v1156_v51 }
0x1014   :  { %v4111_v60 = vadd.f32 %v1122_v52, %v1119_v53 }
0x1015   :  { %v4113_v61 = vadd.f32 %v1164_v50, %v1161_v47 }
0x1016   :  { %1167 = vrot.lane.b32.xlu1 %v4111_v60, %s3747_s3  ;;  %v1288_v46 = vrot.slane %v4111_v60, 6 }
0x1017   :  { %v1179_v63 = vrot.slane %v4113_v61, 2 }
0x1019   :  { %1180 = vrot.lane.b32.xlu0 %v1179_v63, %s3748_s30 }
0x1088   :  { %v4121_v54 = vpop.permute.xlu1 %1167 }
0x108b   :  { %v1181_v1 = vpop.permute.xlu0 %1180 }
0x108c   :  { %v1183_v2 = vsel %vm349_vm3, %v4121_v54, %v1181_v1 }
0x108d   :  { %v1185_v59 = vrot.slane %v1183_v2, 2 }
0x108f   :  { %3087 = vmatmul.mubr.msk.f32.vlgmr.msra.gmra.mrb[6].mxu1 %vm155_vm1, %v1185_v59 }
0x1090   :  { %1605 = vmatprep.mubr.f32.mxu1 %v3745_v0 }
0x1162   :  { %v1254_v3 = vpop.f32.mrb[6].mxu1 }
0x1163   :  { %v1269_v4 = vadd.f32 %v1254_v3, %v3945_v49  ;;  %v1256_v12 = vpop.f32.mrb[7].mxu1  ;;  %v1260_v22 = vrot.slane %v1254_v3, 4  ;;  %v1292_v29 = vrot.slane %v1254_v3, 6 }
0x1164   :  { %v1311_v6 = vadd.f32 %v4131_v5, %v1256_v12  ;;  %v1302_v37 = vrot.slane %v1256_v12, 6 }
0x1165   :  { %v1271_v17 = vrot.slane %v1269_v4, 4  ;;  %v1262_v8 = vadd.f32 %v1260_v22, %v1176_v7  ;;  %v1294_v33 = vadd.f32 %v1292_v29, %v1177_v30  ;;  %v1344_v30 = vld [vmem:[#allocation3] sm:$0x3] }
0x1166   :  { %v1313_v20 = vrot.slane %v1311_v6, 6  ;;  %v1304_v40 = vadd.f32 %v1302_v37, %v1178_v26  ;;  %v1625_v37 = vld [vmem:[%s4666_s6 + $0x18] sm:$0xff] }
0x1167   :  { %1272 = vrot.lane.b32.xlu0 %v1271_v17, %s3746_s25  ;;  %v3088_v9 = vmul.f32 -1.442695, %v1262_v8  ;;  %v3089_v10 = vmul.f32 -1.442695, %v1294_v33  ;;  %v1343_v8 = vld [vmem:[#allocation3 + $0x10] sm:$0xc0] }
0x1168   :  { %1314 = vrot.lane.b32.xlu1 %v1313_v20, %s3746_s25  ;;  %v3090_v41 = vmul.f32 -1.442695, %v1304_v40  ;;  %v1622_v40 = vld [vmem:[%s4666_s6] sm:$0xff] }
0x1169   :  { %3556 = vpow2.f32 %v3088_v9 }
0x116a   :  { %3558 = vpow2.f32 %v3089_v10 }
0x1173   :  { %v3557_v11 = vpop.eup %3556 }
0x1174   :  { %v3559_v27 = vpop.eup %3558  ;;  %v1266_v13 = vadd.f32 1.0, %v3557_v11 }
0x1175   :  { %v1298_v14 = vadd.f32 1.0, %v3559_v27 }
0x1176   :  { %3560 = vrcp.f32 %v1266_v13 }
0x1177   :  { %3562 = vrcp.f32 %v1298_v14 }
0x1180   :  { %v3561_v15 = vpop.eup %3560 }
0x1181   :  { %v3563_v18 = vpop.eup %3562  ;;  %v1282_v39 = vsub.f32 1.0, %v3561_v15  ;;  %v1290_v53 = vmul.f32 %v3561_v15, %v1288_v46 }
0x11d9   :  { %v1273_v16 = vpop.permute.xlu0 %1272 }
0x11da   :  { %v1275_v19 = vmul.f32 %v3561_v15, %v1273_v16  ;;  %v1315_v21 = vpop.permute.xlu1 %1314 }
0x11db   :  { %v1317_v23 = vmul.f32 %v3563_v18, %v1315_v21 }
0x11dc   :  { %1277 = vrot.lane.b32.xlu0 %v1275_v19, %s3746_s25 }
0x11dd   :  { %1319 = vrot.lane.b32.xlu1 %v1317_v23, %s3746_s25  ;;  %v4169_v23 = vld [vmem:[#allocation3 + $0x8] sm:$0x3] }
0x124e   :  { %v1278_v24 = vpop.permute.xlu0 %1277 }
0x124f   :  { %v1280_v25 = vadd.f32 %v1278_v24, %v1176_v7  ;;  %v1320_v28 = vpop.permute.xlu1 %1319 }
0x1250   :  { %v1322_v31 = vadd.f32 %v1320_v28, %v1178_v26 }
0x1251   :  { %3564 = vtanh.f32 %v1280_v25 }
0x1252   :  { %3566 = vtanh.f32 %v1322_v31 }
0x1253   :  { %3568 = vpow2.f32 %v3090_v41 }
0x125b   :  { %v3565_v32 = vpop.eup %3564 }
0x125c   :  { %v3567_v34 = vpop.eup %3566  ;;  %1284 = vrot.lane.b32.xlu0 %v3565_v32, %s3747_s3 }
0x125d   :  { %1326 = vrot.lane.b32.xlu1 %v3567_v34, %s3747_s3  ;;  %v3569_v42 = vpop.eup %3568  ;;  %v1623_v34 = vld [vmem:[%s4666_s6 + $0x8] sm:$0xff] }
0x125e   :  { %v1308_v44 = vadd.f32 1.0, %v3569_v42  ;;  %v4187_v41 = vpack.c.bf16 %v1625_v37, %v1623_v34  ;;  %v1627_v42 = vld [vmem:[%s4666_s6 + $0x28] sm:$0xff] }
0x1260   :  { %3570 = vrcp.f32 %v1308_v44  ;;  %v1629_v44 = vld [vmem:[%s4666_s6 + $0x38] sm:$0xff]  ;;  %3310 = vmatprep.subr.bf16.mxu0 %v4187_v41 }
0x1261   :  { %v4200_v46 = vpack.c.bf16 %v1629_v44, %v1627_v42 }
0x126a   :  { %v3571_v45 = vpop.eup %3570 }
0x126b   :  { %v1324_v52 = vsub.f32 1.0, %v3571_v45  ;;  %v1331_v1 = vmul.f32 %v3571_v45, %v1179_v63 }
0x12ce   :  { %v1285_v51 = vpop.permute.xlu0 %1284 }
0x12cf   :  { %v1287_v56 = vmul.f32 %v1285_v51, %v1282_v39  ;;  %v1327_v47 = vpop.permute.xlu1 %1326  ;;  %v1628_v39 = vld [vmem:[%s4666_s6 + $0x30] sm:$0xff]  ;;  %v1631_v51 = vld [vmem:[%s4666_s6 + $0x48] sm:$0xff] }
0x12d0   :  { %v1329_v50 = vmul.f32 %v1327_v47, %v1324_v52  ;;  %v1633_v52 = vld [vmem:[%s4666_s6 + $0x58] sm:$0xff]  ;;  %v1632_v47 = vld [vmem:[%s4666_s6 + $0x50] sm:$0xff] }
0x12d1   :  { %v4143_v2 = vadd.f32 %v1290_v53, %v1287_v56  ;;  %v1630_v56 = vld [vmem:[%s4666_s6 + $0x40] sm:$0xff] }
0x12d2   :  { %v4145_v59 = vadd.f32 %v1331_v1, %v1329_v50  ;;  %v1635_v50 = vld [vmem:[%s4666_s6 + $0x68] sm:$0xff]  ;;  %v4232_v1 = vpack.c.bf16 %v1633_v52, %v1631_v51 }
0x12d3   :  { %1334 = vrot.lane.b32.xlu1 %v4143_v2, %s3747_s3 }
0x12d4   :  { %v1346_v3 = vrot.slane %v4145_v59, 6  ;;  %v1491_v34 = vrot.slane %v4145_v59, 2 }
0x12d6   :  { %1347 = vrot.lane.b32.xlu0 %v1346_v3, %s3748_s30  ;;  %v1637_v3 = vld [vmem:[%s4666_s6 + $0x78] sm:$0xff] }
0x1345   :  { %v4151_v60 = vpop.permute.xlu1 %1334 }
0x1348   :  { %v1348_v4 = vpop.permute.xlu0 %1347 }
0x1349   :  { %v1350_v12 = vsel %vm349_vm3, %v4151_v60, %v1348_v4  ;;  %v1508_v4 = vld [vmem:[%s4665_s5 + $0x8] sm:$0xff] }
0x134a   :  { %v1352_v6 = vrot.slane %v1350_v12, 4  ;;  %v1510_v12 = vld [vmem:[%s4665_s5 + $0x18] sm:$0xff] }
0x134c   :  { %3091 = vmatmul.mubr.msk.f32.vlgmr.msra.gmra.mrb[10].mxu0 %vm155_vm1, %v1352_v6  ;;  %v3293_v6 = vpack.c.bf16 %v1510_v12, %v1508_v4 }
0x134d   :  { %1712 = vmatprep.mubr.f32.mxu0 %v3745_v0 }
0x134e   :  { %3294 = vmatprep.subr.bf16.mxu1 %v3293_v6 }
0x141f   :  { %v1421_v63 = vpop.f32.mrb[10].mxu0 }
0x1420   :  { %v1436_v17 = vadd.f32 %v1421_v63, %v3945_v49  ;;  %v4158_v20 = vpop.f32.mrb[11].mxu0  ;;  %v1427_v7 = vrot.slane %v1421_v63, 2  ;;  %v1459_v33 = vadd.f32 %v1421_v63, %v1344_v30  ;;  %v1509_v63 = vld [vmem:[%s4665_s5 + $0x10] sm:$0xff] }
0x1421   :  { %v1473_v22 = vadd.f32 %v4131_v5, %v4158_v20  ;;  %v1513_v30 = vld [vmem:[%s4665_s5 + $0x30] sm:$0xff] }
0x1422   :  { %v1438_v29 = vrot.slane %v1436_v17, 2  ;;  %v1429_v9 = vadd.f32 %v1427_v7, %v1343_v8  ;;  %v3093_v10 = vmul.f32 -1.442695, %v1459_v33  ;;  %v1512_v17 = vld [vmem:[%s4665_s5 + $0x28] sm:$0xff]  ;;  %v1511_v7 = vld [vmem:[%s4665_s5 + $0x20] sm:$0xff] }
0x1423   :  { %1475 = vrot.lane.b32.xlu1 %v1473_v22, %s3746_s25 }
0x1424   :  { %1439 = vrot.lane.b32.xlu0 %v1438_v29, %s3746_s25  ;;  %v3092_v11 = vmul.f32 -1.442695, %v1429_v9  ;;  %3572 = vpow2.f32 %v3093_v10  ;;  %v1514_v29 = vld [vmem:[%s4665_s5 + $0x38] sm:$0xff]  ;;  %v4267_v9 = vpack.c.bf16 %v1637_v3, %v1635_v50  ;;  %v1634_v10 = vld [vmem:[%s4666_s6 + $0x60] sm:$0xff] }
0x1425   :  { %v3297_v33 = vpack.c.bf16 %v1514_v29, %v1512_v17  ;;  %v4335_v3 = vld [vmem:[%s4668_s8] ss:$0 sm:$0xff] }
0x1426   :  { %3574 = vpow2.f32 %v3092_v11  ;;  %v1636_v11 = vld [vmem:[%s4666_s6 + $0x70] sm:$0xff] }
0x142e   :  { %v3573_v49 = vpop.eup %3572 }
0x142f   :  { %v1463_v13 = vadd.f32 1.0, %v3573_v49  ;;  %v4278_v49 = vpack.c.bf16 %v1636_v11, %v1634_v10 }
0x1430   :  { %v3575_v27 = vpop.eup %3574 }
0x1431   :  { %v1433_v14 = vadd.f32 1.0, %v3575_v27  ;;  %3576 = vrcp.f32 %v1463_v13 }
0x1433   :  { %3578 = vrcp.f32 %v1433_v14 }
0x143b   :  { %v3577_v5 = vpop.eup %3576 }
0x143d   :  { %v4164_v16 = vpop.eup %3578 }
0x143e   :  { %v1449_v42 = vsub.f32 1.0, %v4164_v16 }
0x1495   :  { %v1476_v15 = vpop.permute.xlu1 %1475 }
0x1496   :  { %v1478_v18 = vmul.f32 %v3577_v5, %v1476_v15  ;;  %v1440_v19 = vpop.permute.xlu0 %1439  ;;  %v1516_v5 = vld [vmem:[%s4665_s5 + $0x48] sm:$0xff]  ;;  %v1518_v15 = vld [vmem:[%s4665_s5 + $0x58] sm:$0xff] }
0x1497   :  { %v1442_v21 = vmul.f32 %v4164_v16, %v1440_v19  ;;  %v1515_v19 = vld [vmem:[%s4665_s5 + $0x40] sm:$0xff] }
0x1498   :  { %1480 = vrot.lane.b32.xlu1 %v1478_v18, %s3746_s25  ;;  %v3301_v18 = vpack.c.bf16 %v1518_v15, %v1516_v5 }
0x1499   :  { %1444 = vrot.lane.b32.xlu0 %v1442_v21, %s3746_s25 }
0x150a   :  { %v1481_v24 = vpop.permute.xlu1 %1480 }
0x150b   :  { %v1483_v25 = vadd.f32 %v1481_v24, %v4169_v23  ;;  %v1445_v26 = vpop.permute.xlu0 %1444  ;;  %v1522_v24 = vld [vmem:[%s4665_s5 + $0x78] sm:$0xff] }
0x150c   :  { %v1447_v28 = vadd.f32 %v1445_v26, %v1343_v8  ;;  %v4264_v8 = vpack.c.bf16 %v1632_v47, %v1630_v56  ;;  %v1519_v26 = vld [vmem:[%s4665_s5 + $0x60] sm:$0xff] }
0x150d   :  { %3580 = vtanh.f32 %v1483_v25 }
0x150e   :  { %3582 = vtanh.f32 %v1447_v28  ;;  %v1521_v28 = vld [vmem:[%s4665_s5 + $0x70] sm:$0xff] }
0x1517   :  { %v3581_v31 = vpop.eup %3580 }
0x1518   :  { %v3583_v32 = vpop.eup %3582  ;;  %1487 = vrot.lane.b32.xlu1 %v3581_v31, %s3747_s3 }
0x1519   :  { %1451 = vrot.lane.b32.xlu0 %v3583_v32, %s3747_s3  ;;  %v3307_v32 = vpack.c.bf16 %v1521_v28, %v1519_v26 }
0x151c   :  { %1005 = vrot.lane.b32.xlu1 %v4084_v62, %s3748_s30  ;;  %v1624_v62 = vld [vmem:[%s4666_s6 + $0x10] sm:$0xff] }
0x151d   :  { %1172 = vrot.lane.b32.xlu0 %v4113_v61, %s3748_s30  ;;  %v4198_v45 = vpack.c.bf16 %v1624_v62, %v1622_v40  ;;  %v1626_v61 = vld [vmem:[%s4666_s6 + $0x20] sm:$0xff]  ;;  %v1455_v40 = vrot.slane %v4143_v2, 6 }
0x151e   :  { %v4218_v53 = vpack.c.bf16 %v1628_v39, %v1626_v61 }
0x151f   :  { %3312 = vmatpush1.bf16.msra.mxu0 %v4198_v45  ;;  %v1457_v51 = vmul.f32 %v4164_v16, %v1455_v40 }
0x1520   :  { %1339 = vrot.lane.b32.xlu1 %v4145_v59, %s3748_s30  ;;  %3314 = vmatprep.subr.bf16.mxu0 %v4200_v46 }
0x1521   :  { %507 = vrot.lane.b32.xlu0 %v3987_v48, %s3748_s30  ;;  %v1507_v48 = vld [vmem:[%s4665_s5] sm:$0xff] }
0x1522   :  { %v3295_v22 = vpack.c.bf16 %v1509_v63, %v1507_v48 }
0x1523   :  { %3316 = vmatpush1.bf16.msra.mxu0 %v4218_v53 }
0x1524   :  { %337 = vrot.lane.b32.xlu1 %v3959_v43, %s3748_s30  ;;  %3318 = vmatprep.subr.bf16.mxu0 %v4232_v1  ;;  %v3299_v43 = vpack.c.bf16 %v1513_v30, %v1511_v7 }
0x1525   :  { %3296 = vmatpush1.bf16.msra.mxu1 %v3295_v22 }
0x1526   :  { %3298 = vmatprep.subr.bf16.mxu1 %v3297_v33 }
0x1527   :  { %3320 = vmatpush1.bf16.msra.mxu0 %v4264_v8 }
0x1528   :  { %676 = vrot.lane.b32.xlu1 %v4020_v55, %s3748_s30  ;;  %3322 = vmatprep.subr.bf16.mxu0 %v4267_v9  ;;  %v1466_v55 = vadd.f32 %v4158_v20, %v4169_v23  ;;  %v1517_v20 = vld [vmem:[%s4665_s5 + $0x50] sm:$0xff]  ;;  %v1520_v23 = vld [vmem:[%s4665_s5 + $0x68] sm:$0xff] }
0x1529   :  { %3300 = vmatpush1.bf16.msra.mxu1 %v3299_v43  ;;  %v3303_v21 = vpack.c.bf16 %v1517_v20, %v1515_v19  ;;  %v3305_v25 = vpack.c.bf16 %v1522_v24, %v1520_v23 }
0x152a   :  { %v3094_v27 = vmul.f32 -1.442695, %v1466_v55  ;;  %3302 = vmatprep.subr.bf16.mxu1 %v3301_v18 }
0x152b   :  { %3324 = vmatpush1.bf16.msra.mxu0 %v4278_v49 }
0x152c   :  { %3342 = vmatprep.subr.bf16.mxu0 %v4187_v41  ;;  %3584 = vpow2.f32 %v3094_v27 }
0x152d   :  { %3304 = vmatpush1.bf16.msra.mxu1 %v3303_v21 }
0x152e   :  { %1713 = vmatmul.mubr.f32.vlgmr.msra.gmra.mrb[12].mxu0 %v3745_v0  ;;  %3306 = vmatprep.subr.bf16.mxu1 %v3305_v25 }
0x152f   :  { %3344 = vmatpush1.bf16.msra.mxu0 %v4198_v45  ;;  %2043 = vmatprep.mubr.f32.mxu0 %v3745_v0 }
0x1530   :  { %3346 = vmatprep.subr.bf16.mxu0 %v4200_v46 }
0x1531   :  { %3308 = vmatpush1.bf16.msra.mxu1 %v3307_v32 }
0x1532   :  { %3326 = vmatprep.subr.bf16.mxu1 %v4187_v41 }
0x1533   :  { %3348 = vmatpush1.bf16.msra.mxu0 %v4218_v53 }
0x1534   :  { %3350 = vmatprep.subr.bf16.mxu0 %v4232_v1 }
0x1536   :  { %v3585_v13 = vpop.eup %3584 }
0x1537   :  { %3352 = vmatpush1.bf16.msra.mxu0 %v4264_v8  ;;  %v1470_v14 = vadd.f32 1.0, %v3585_v13 }
0x1538   :  { %3354 = vmatprep.subr.bf16.mxu0 %v4267_v9 }
0x1539   :  { %3586 = vrcp.f32 %v1470_v14 }
0x153b   :  { %3356 = vmatpush1.bf16.msra.mxu0 %v4278_v49 }
0x153c   :  { %3374 = vmatprep.subr.bf16.mxu0 %v4187_v41 }
0x1543   :  { %v3587_v31 = vpop.eup %3586 }
0x1544   :  { %v1485_v37 = vsub.f32 1.0, %v3587_v31  ;;  %v1493_v61 = vmul.f32 %v3587_v31, %v1491_v34 }
0x158a   :  { %v1488_v62 = vpop.permute.xlu1 %1487 }
0x158b   :  { %v1490_v44 = vmul.f32 %v1488_v62, %v1485_v37  ;;  %v1452_v39 = vpop.permute.xlu0 %1451 }
0x158c   :  { %v1454_v52 = vmul.f32 %v1452_v39, %v1449_v42 }
0x158d   :  { %v1494_v56 = vadd.f32 %v1493_v61, %v1490_v44 }
0x158e   :  { %v1458_v47 = vadd.f32 %v1457_v51, %v1454_v52  ;;  %v1006_v50 = vpop.permute.xlu1 %1005 }
0x158f   :  { %1008 = vst.msk [vmem:[#allocation2] sm:$0xc0] %vm340_vm7, %v1006_v50  ;;  %v1173_v59 = vpop.permute.xlu0 %1172  ;;  %1501 = vrot.lane.b32.xlu0 %v1494_v56, %s3748_s30 }
0x1590   :  { %1175 = vst.msk [vmem:[#allocation2] sm:$0x30] %vm510_vm8, %v1173_v59  ;;  %1496 = vrot.lane.b32.xlu1 %v1458_v47, %s3747_s3 }
0x1592   :  { %v1340_v2 = vpop.permute.xlu1 %1339 }
0x1593   :  { %1342 = vst.msk [vmem:[#allocation2] sm:$0xc] %vm679_vm9, %v1340_v2  ;;  %v508_v16 = vpop.permute.xlu0 %507  ;;  %840 = vrot.lane.b32.xlu0 %v4048_v57, %s3748_s30 }
0x1594   :  { %511 = vst.msk [vmem:[#allocation2 + $0x8] sm:$0x30] %vm510_vm8, %v508_v16 }
0x1595   :  { %1337 = vst.msk [vmem:[#allocation2 + $0x8] sm:$0x30] %vm673_vm5, %v4151_v60 }
0x1596   :  { %v338_v4 = vpop.permute.xlu1 %337 }
0x1597   :  { %341 = vst.msk [vmem:[#allocation2 + $0x8] sm:$0xc0] %vm340_vm7, %v338_v4  ;;  %1726 = vrot.lane.b32.xlu0 %v4335_v3, %s3746_s25 }
0x159a   :  { %v677_v12 = vpop.permute.xlu1 %676 }
0x159b   :  { %680 = vst.msk [vmem:[#allocation2 + $0x8] sm:$0xc] %vm679_vm9, %v677_v12 }
0x159c   :  { %1170 = vst.msk [vmem:[#allocation2 + $0x8] sm:$0xc] %vm504_vm4, %v4121_v54 }
0x1601   :  { %v1502_v57 = vpop.permute.xlu0 %1501  ;;  %v1714_v48 = vpop.f32.mrb[12].mxu0 }
0x1602   :  { %1504 = vst.msk [vmem:[#allocation2] sm:$0x3] %vm843_vm10, %v1502_v57  ;;  %v1497_v6 = vpop.permute.xlu1 %1496  ;;  %v4347_v60 = vpop.f32.mrb[13].mxu0  ;;  %v1750_v20 = vrot.slane %v1714_v48, 2 }
0x1603   :  { %1499 = vst.msk [vmem:[#allocation2 + $0x8] sm:$0xc0] %vm837_vm6, %v1497_v6  ;;  %v1769_v63 = vadd.f32 %v4335_v3, %v4347_v60  ;;  %v1760_v56 = vrot.slane %v4347_v60, 2 }
0x1605   :  { %v841_v17 = vpop.permute.xlu0 %840  ;;  %v1771_v22 = vrot.slane %v1769_v63, 2 }
0x1606   :  { %844 = vst.msk [vmem:[#allocation2 + $0x8] sm:$0x3] %vm843_vm10, %v841_v17 }
0x1607   :  { %1003 = vst.msk [vmem:[#allocation2 + $0x8] sm:$0x3] %vm334_vm2, %v4088_v58  ;;  %1772 = vrot.lane.b32.xlu1 %v1771_v22, %s3746_s25  ;;  %v1523_v58 = vld [vmem:[%s4667_s7] sm:$0x3] }
0x1608   :  { %v1528_v33 = vrot.slane %v1523_v58, %v62_v36  ;;  %v1532_v10 = vrot.slane %v1523_v58, %v66_v38 }
0x1609   :  { %v1505_v54 = vld [vmem:[#allocation2] sm:$0xff]  ;;  %v4355_v29 = vpop.permute.xlu0 %1726 }
0x160a   :  { %3095 = vmatmul.mubr.msk.f32.vlgmr.msra.gmra.mrb[8].mxu1 %vm155_vm1, %v1505_v54  ;;  %v1729_v7 = vadd.f32 %v4355_v29, %v1714_v48 }
0x160b   :  { %1611 = vmatprep.mubr.f32.mxu1 %v3745_v0  ;;  %3328 = vmatpush1.bf16.msra.mxu1 %v4198_v45 }
0x160c   :  { %1731 = vrot.lane.b32.xlu0 %v1729_v7, %s3746_s25  ;;  %3330 = vmatprep.subr.bf16.mxu1 %v4200_v46 }
0x160e   :  { %v1506_v30 = vld [vmem:[#allocation2 + $0x8] sm:$0xff] }
0x160f   :  { %3096 = vmatmul.mubr.msk.f32.gmra.mrb[10].mxu1 %vm155_vm1, %v1506_v30 }
0x1610   :  { %3332 = vmatpush1.bf16.msra.mxu1 %v4218_v53  ;;  %1875 = vmatprep.mubr.f32.mxu1 %v3745_v0 }
0x1611   :  { %3334 = vmatprep.subr.bf16.mxu1 %v4232_v1 }
0x1614   :  { %3336 = vmatpush1.bf16.msra.mxu1 %v4264_v8 }
0x1615   :  { %3338 = vmatprep.subr.bf16.mxu1 %v4267_v9 }
0x1618   :  { %3340 = vmatpush1.bf16.msra.mxu1 %v4278_v49 }
0x1619   :  { %3358 = vmatprep.subr.bf16.mxu1 %v4187_v41 }
0x1679   :  { %v1773_v34 = vpop.permute.xlu1 %1772 }
0x167e   :  { %v1732_v28 = vpop.permute.xlu0 %1731 }
0x16dd   :  { %v1607_v11 = vpop.f32.mrb[8].mxu1 }
0x16de   :  { %v1608_v43 = vadd.f32 %v1607_v11, %v1528_v33  ;;  %v1609_v55 = vpop.f32.mrb[9].mxu1 }
0x16df   :  { %v1610_v27 = vadd.f32 %v1609_v55, %v1532_v10 }
0x16e0   :  { %1618 = vst [vmem:[#allocation3] sm:$0xff] %v1608_v43 }
0x16e1   :  { %1619 = vst.msk [vmem:[#allocation3 + $0x8] sm:$0xff] %vm155_vm1, %v1610_v27 }
0x16e2   :  { %v1613_v13 = vpop.f32.mrb[10].mxu1 }
0x16e3   :  { %v1614_v14 = vadd.f32 %v1613_v13, %v1528_v33  ;;  %v1615_v5 = vpop.f32.mrb[11].mxu1 }
0x16e4   :  { %v1616_v15 = vadd.f32 %v1615_v5, %v1532_v10 }
0x16e5   :  { %1620 = vst [vmem:[#allocation3 + $0x10] sm:$0xff] %v1614_v14 }
0x16e6   :  { %1621 = vst.msk [vmem:[#allocation3 + $0x18] sm:$0xff] %vm155_vm1, %v1616_v15 }
0x16e7   :  { %v1645_v18 = vld [vmem:[#allocation3] sm:$0x3]  ;;  %v1800_v15 = vld [vmem:[#allocation3] sm:$0xc] }
0x16e8   :  { %v1719_v19 = vadd.f32 %v1714_v48, %v1645_v18 }
0x16ea   :  { %v3098_v36 = vmul.f32 -1.442695, %v1719_v19 }
0x16ec   :  { %3588 = vpow2.f32 %v3098_v36  ;;  %v1646_v35 = vld [vmem:[#allocation3 + $0x10] sm:$0xc0] }
0x16ed   :  { %v1752_v38 = vadd.f32 %v1750_v20, %v1646_v35  ;;  %v1647_v44 = vld [vmem:[#allocation3 + $0x18] sm:$0xc0] }
0x16ee   :  { %v1762_v47 = vadd.f32 %v1760_v56, %v1647_v44 }
0x16ef   :  { %v3099_v21 = vmul.f32 -1.442695, %v1752_v38 }
0x16f0   :  { %v3100_v50 = vmul.f32 -1.442695, %v1762_v47 }
0x16f1   :  { %3590 = vpow2.f32 %v3099_v21 }
0x16f6   :  { %v3589_v23 = vpop.eup %3588 }
0x16f7   :  { %v1723_v24 = vadd.f32 1.0, %v3589_v23 }
0x16f9   :  { %3592 = vrcp.f32 %v1723_v24 }
0x16fb   :  { %v3591_v25 = vpop.eup %3590 }
0x16fc   :  { %v1756_v26 = vadd.f32 1.0, %v3591_v25 }
0x16fe   :  { %3594 = vrcp.f32 %v1756_v26 }
0x1703   :  { %v3593_v31 = vpop.eup %3592 }
0x1704   :  { %v1734_v32 = vmul.f32 %v3593_v31, %v1732_v28  ;;  %v1741_v16 = vsub.f32 1.0, %v3593_v31  ;;  %v1747_v57 = vmul.f32 0.0, %v3593_v31 }
0x1706   :  { %1736 = vrot.lane.b32.xlu0 %v1734_v32, %s3746_s25 }
0x1708   :  { %v3595_v37 = vpop.eup %3594 }
0x1709   :  { %v1775_v40 = vmul.f32 %v3595_v37, %v1773_v34 }
0x170b   :  { %1777 = vrot.lane.b32.xlu1 %v1775_v40, %s3746_s25 }
0x1778   :  { %v1737_v62 = vpop.permute.xlu0 %1736 }
0x1779   :  { %v1739_v42 = vadd.f32 %v1737_v62, %v1645_v18  ;;  %v1801_v18 = vld [vmem:[#allocation3 + $0x10] sm:$0x30]  ;;  %v1802_v62 = vld [vmem:[#allocation3 + $0x18] sm:$0x30] }
0x177b   :  { %3596 = vtanh.f32 %v1739_v42 }
0x177d   :  { %v1778_v61 = vpop.permute.xlu1 %1777 }
0x177e   :  { %v1780_v39 = vadd.f32 %v1778_v61, %v1647_v44 }
0x1780   :  { %3598 = vtanh.f32 %v1780_v39 }
0x1781   :  { %3600 = vpow2.f32 %v3100_v50 }
0x1785   :  { %v3597_v51 = vpop.eup %3596 }
0x1786   :  { %1743 = vrot.lane.b32.xlu0 %v3597_v51, %s3747_s3 }
0x178a   :  { %v3599_v52 = vpop.eup %3598 }
0x178b   :  { %1784 = vrot.lane.b32.xlu1 %v3599_v52, %s3747_s3  ;;  %v3601_v59 = vpop.eup %3600 }
0x178c   :  { %v1766_v2 = vadd.f32 1.0, %v3601_v59 }
0x178e   :  { %3602 = vrcp.f32 %v1766_v2 }
0x1798   :  { %v3603_v12 = vpop.eup %3602 }
0x1799   :  { %v1782_v63 = vsub.f32 1.0, %v3603_v12  ;;  %v1788_v22 = vmul.f32 0.0, %v3603_v12 }
0x17f8   :  { %v1744_v4 = vpop.permute.xlu0 %1743 }
0x17f9   :  { %v1746_v6 = vmul.f32 %v1744_v4, %v1741_v16 }
0x17fb   :  { %v4385_v48 = vadd.f32 %v1747_v57, %v1746_v6 }
0x17fd   :  { %v1785_v17 = vpop.permute.xlu1 %1784  ;;  %1791 = vrot.lane.b32.xlu1 %v4385_v48, %s3747_s3  ;;  %v1911_v2 = vrot.slane %v4385_v48, 6 }
0x17fe   :  { %v1787_v60 = vmul.f32 %v1785_v17, %v1782_v63 }
0x1800   :  { %v4389_v54 = vadd.f32 %v1788_v22, %v1787_v60 }
0x1802   :  { %v1803_v7 = vrot.slane %v4389_v54, 6  ;;  %v1953_v12 = vrot.slane %v4389_v54, 2 }
0x1804   :  { %1804 = vrot.lane.b32.xlu0 %v1803_v7, %s3748_s30 }
0x186f   :  { %v1792_v30 = vpop.permute.xlu1 %1791 }
0x1870   :  { %1794 = vst.msk [vmem:[#allocation2] sm:$0x3] %vm334_vm2, %v1792_v30 }
0x1876   :  { %v1805_v58 = vpop.permute.xlu0 %1804 }
0x1877   :  { %v1807_v33 = vsel %vm349_vm3, %v1792_v30, %v1805_v58 }
0x1878   :  { %3101 = vmatmul.mubr.msk.f32.vlgmr.msra.gmra.mrb[12].mxu1 %vm155_vm1, %v1807_v33 }
0x1879   :  { %3360 = vmatpush1.bf16.msra.mxu1 %v4198_v45  ;;  %2210 = vmatprep.mubr.f32.mxu1 %v3745_v0 }
0x187a   :  { %3362 = vmatprep.subr.bf16.mxu1 %v4200_v46 }
0x187d   :  { %3364 = vmatpush1.bf16.msra.mxu1 %v4218_v53 }
0x187e   :  { %3366 = vmatprep.subr.bf16.mxu1 %v4232_v1 }
0x1881   :  { %3368 = vmatpush1.bf16.msra.mxu1 %v4264_v8 }
0x1882   :  { %3370 = vmatprep.subr.bf16.mxu1 %v4267_v9 }
0x1885   :  { %3372 = vmatpush1.bf16.msra.mxu1 %v4278_v49 }
0x1886   :  { %3390 = vmatprep.subr.bf16.mxu1 %v4187_v41 }
0x194b   :  { %v1877_v10 = vpop.f32.mrb[12].mxu1 }
0x194c   :  { %v1892_v11 = vadd.f32 %v1877_v10, %v4355_v29  ;;  %v1879_v43 = vpop.f32.mrb[13].mxu1  ;;  %v1883_v14 = vrot.slane %v1877_v10, 6  ;;  %v1915_v5 = vrot.slane %v1877_v10, 4 }
0x194d   :  { %v1934_v55 = vadd.f32 %v4335_v3, %v1879_v43  ;;  %v1925_v51 = vrot.slane %v1879_v43, 4 }
0x194e   :  { %v1894_v27 = vrot.slane %v1892_v11, 6  ;;  %v1885_v19 = vadd.f32 %v1883_v14, %v1800_v15  ;;  %v1917_v36 = vadd.f32 %v1915_v5, %v1801_v18 }
0x194f   :  { %v1936_v13 = vrot.slane %v1934_v55, 4  ;;  %v1927_v52 = vadd.f32 %v1925_v51, %v1802_v62 }
0x1950   :  { %1895 = vrot.lane.b32.xlu0 %v1894_v27, %s3746_s25  ;;  %v3102_v20 = vmul.f32 -1.442695, %v1885_v19  ;;  %v3103_v35 = vmul.f32 -1.442695, %v1917_v36  ;;  %v1967_v19 = vld [vmem:[#allocation3] sm:$0x30] }
0x1951   :  { %1937 = vrot.lane.b32.xlu1 %v1936_v13, %s3746_s25  ;;  %v3104_v56 = vmul.f32 -1.442695, %v1927_v52  ;;  %v1968_v36 = vld [vmem:[#allocation3 + $0x10] sm:$0xc] }
0x1952   :  { %3604 = vpow2.f32 %v3102_v20 }
0x1953   :  { %3606 = vpow2.f32 %v3103_v35 }
0x195c   :  { %v3605_v38 = vpop.eup %3604 }
0x195d   :  { %v3607_v21 = vpop.eup %3606  ;;  %v1889_v23 = vadd.f32 1.0, %v3605_v38 }
0x195e   :  { %v1921_v24 = vadd.f32 1.0, %v3607_v21 }
0x195f   :  { %3608 = vrcp.f32 %v1889_v23 }
0x1960   :  { %3610 = vrcp.f32 %v1921_v24 }
0x1969   :  { %v3609_v25 = vpop.eup %3608 }
0x196a   :  { %v3611_v28 = vpop.eup %3610  ;;  %v1905_v16 = vsub.f32 1.0, %v3609_v25  ;;  %v1913_v6 = vmul.f32 %v3609_v25, %v1911_v2 }
0x19c2   :  { %v1896_v26 = vpop.permute.xlu0 %1895 }
0x19c3   :  { %v1898_v31 = vmul.f32 %v3609_v25, %v1896_v26  ;;  %v1938_v32 = vpop.permute.xlu1 %1937 }
0x19c4   :  { %v1940_v34 = vmul.f32 %v3611_v28, %v1938_v32 }
0x19c5   :  { %1900 = vrot.lane.b32.xlu0 %v1898_v31, %s3746_s25 }
0x19c6   :  { %1942 = vrot.lane.b32.xlu1 %v1940_v34, %s3746_s25 }
0x1a37   :  { %v1901_v37 = vpop.permute.xlu0 %1900 }
0x1a38   :  { %v1903_v40 = vadd.f32 %v1901_v37, %v1800_v15  ;;  %v1943_v42 = vpop.permute.xlu1 %1942 }
0x1a39   :  { %v1945_v44 = vadd.f32 %v1943_v42, %v1802_v62 }
0x1a3a   :  { %3612 = vtanh.f32 %v1903_v40 }
0x1a3b   :  { %3614 = vtanh.f32 %v1945_v44  ;;  %v1969_v44 = vld [vmem:[#allocation3 + $0x18] sm:$0xc] }
0x1a3c   :  { %3616 = vpow2.f32 %v3104_v56 }
0x1a44   :  { %v3613_v61 = vpop.eup %3612 }
0x1a45   :  { %v3615_v39 = vpop.eup %3614  ;;  %1907 = vrot.lane.b32.xlu0 %v3613_v61, %s3747_s3 }
0x1a46   :  { %1949 = vrot.lane.b32.xlu1 %v3615_v39, %s3747_s3  ;;  %v3617_v47 = vpop.eup %3616 }
0x1a47   :  { %v1931_v50 = vadd.f32 1.0, %v3617_v47 }
0x1a49   :  { %3618 = vrcp.f32 %v1931_v50 }
0x1a53   :  { %v3619_v59 = vpop.eup %3618 }
0x1a54   :  { %v1947_v57 = vsub.f32 1.0, %v3619_v59  ;;  %v1955_v60 = vmul.f32 %v3619_v59, %v1953_v12 }
0x1ab7   :  { %v1908_v4 = vpop.permute.xlu0 %1907 }
0x1ab8   :  { %v1910_v63 = vmul.f32 %v1908_v4, %v1905_v16  ;;  %v1950_v17 = vpop.permute.xlu1 %1949 }
0x1ab9   :  { %v1952_v22 = vmul.f32 %v1950_v17, %v1947_v57 }
0x1aba   :  { %v4415_v7 = vadd.f32 %v1913_v6, %v1910_v63 }
0x1abb   :  { %v4417_v30 = vadd.f32 %v1955_v60, %v1952_v22 }
0x1abc   :  { %1958 = vrot.lane.b32.xlu1 %v4415_v7, %s3747_s3  ;;  %v2079_v4 = vrot.slane %v4415_v7, 6 }
0x1abd   :  { %v1970_v58 = vrot.slane %v4417_v30, 2 }
0x1abf   :  { %1971 = vrot.lane.b32.xlu0 %v1970_v58, %s3748_s30 }
0x1b2e   :  { %v1959_v48 = vpop.permute.xlu1 %1958 }
0x1b2f   :  { %1961 = vst.msk [vmem:[#allocation2] sm:$0xc] %vm504_vm4, %v1959_v48 }
0x1b31   :  { %v1972_v33 = vpop.permute.xlu0 %1971 }
0x1b32   :  { %v1974_v10 = vsel %vm349_vm3, %v1959_v48, %v1972_v33 }
0x1b33   :  { %v1976_v11 = vrot.slane %v1974_v10, 2 }
0x1b35   :  { %3105 = vmatmul.mubr.msk.f32.vlgmr.msra.gmra.mrb[14].mxu0 %vm155_vm1, %v1976_v11 }
0x1b36   :  { %3376 = vmatpush1.bf16.msra.mxu0 %v4198_v45  ;;  %2372 = vmatprep.mubr.f32.mxu0 %v3745_v0 }
0x1b37   :  { %3378 = vmatprep.subr.bf16.mxu0 %v4200_v46 }
0x1b3a   :  { %3380 = vmatpush1.bf16.msra.mxu0 %v4218_v53 }
0x1b3b   :  { %3382 = vmatprep.subr.bf16.mxu0 %v4232_v1 }
0x1b3e   :  { %3384 = vmatpush1.bf16.msra.mxu0 %v4264_v8 }
0x1b3f   :  { %3386 = vmatprep.subr.bf16.mxu0 %v4267_v9 }
0x1b42   :  { %3388 = vmatpush1.bf16.msra.mxu0 %v4278_v49 }
0x1b43   :  { %3406 = vmatprep.subr.bf16.mxu0 %v4187_v41 }
0x1c08   :  { %v2045_v43 = vpop.f32.mrb[14].mxu0 }
0x1c09   :  { %v2060_v55 = vadd.f32 %v2045_v43, %v4355_v29  ;;  %v2047_v27 = vpop.f32.mrb[15].mxu0  ;;  %v2051_v15 = vrot.slane %v2045_v43, 4  ;;  %v2083_v18 = vrot.slane %v2045_v43, 6 }
0x1c0a   :  { %v2102_v13 = vadd.f32 %v4335_v3, %v2047_v27  ;;  %v2093_v56 = vrot.slane %v2047_v27, 6 }
0x1c0b   :  { %v2062_v14 = vrot.slane %v2060_v55, 4  ;;  %v2053_v20 = vadd.f32 %v2051_v15, %v1967_v19  ;;  %v2085_v35 = vadd.f32 %v2083_v18, %v1968_v36  ;;  %v2134_v36 = vld [vmem:[#allocation3] sm:$0xc0] }
0x1c0c   :  { %v2104_v5 = vrot.slane %v2102_v13, 6  ;;  %v2095_v47 = vadd.f32 %v2093_v56, %v1969_v44 }
0x1c0d   :  { %2063 = vrot.lane.b32.xlu0 %v2062_v14, %s3746_s25  ;;  %v3106_v38 = vmul.f32 -1.442695, %v2053_v20  ;;  %v3107_v21 = vmul.f32 -1.442695, %v2085_v35 }
0x1c0e   :  { %2105 = vrot.lane.b32.xlu1 %v2104_v5, %s3746_s25  ;;  %v3108_v50 = vmul.f32 -1.442695, %v2095_v47 }
0x1c0f   :  { %3620 = vpow2.f32 %v3106_v38 }
0x1c10   :  { %3622 = vpow2.f32 %v3107_v21 }
0x1c19   :  { %v3621_v23 = vpop.eup %3620 }
0x1c1a   :  { %v3623_v24 = vpop.eup %3622  ;;  %v2057_v25 = vadd.f32 1.0, %v3621_v23 }
0x1c1b   :  { %v2089_v26 = vadd.f32 1.0, %v3623_v24 }
0x1c1c   :  { %3624 = vrcp.f32 %v2057_v25 }
0x1c1d   :  { %3626 = vrcp.f32 %v2089_v26 }
0x1c26   :  { %v3625_v28 = vpop.eup %3624 }
0x1c27   :  { %v3627_v32 = vpop.eup %3626  ;;  %v2073_v12 = vsub.f32 1.0, %v3625_v28  ;;  %v2081_v63 = vmul.f32 %v3625_v28, %v2079_v4 }
0x1c7f   :  { %v2064_v31 = vpop.permute.xlu0 %2063 }
0x1c80   :  { %v2066_v34 = vmul.f32 %v3625_v28, %v2064_v31  ;;  %v2106_v37 = vpop.permute.xlu1 %2105 }
0x1c81   :  { %v2108_v40 = vmul.f32 %v3627_v32, %v2106_v37 }
0x1c82   :  { %2068 = vrot.lane.b32.xlu0 %v2066_v34, %s3746_s25 }
0x1c83   :  { %2110 = vrot.lane.b32.xlu1 %v2108_v40, %s3746_s25  ;;  %v2136_v40 = vld [vmem:[#allocation3 + $0x18] sm:$0x3] }
0x1cf4   :  { %v2069_v62 = vpop.permute.xlu0 %2068 }
0x1cf5   :  { %v2071_v42 = vadd.f32 %v2069_v62, %v1967_v19  ;;  %v2111_v61 = vpop.permute.xlu1 %2110  ;;  %v2135_v19 = vld [vmem:[#allocation3 + $0x10] sm:$0x3] }
0x1cf6   :  { %v2113_v39 = vadd.f32 %v2111_v61, %v1969_v44 }
0x1cf7   :  { %3628 = vtanh.f32 %v2071_v42 }
0x1cf8   :  { %3630 = vtanh.f32 %v2113_v39 }
0x1cf9   :  { %3632 = vpow2.f32 %v3108_v50 }
0x1d01   :  { %v3629_v51 = vpop.eup %3628 }
0x1d02   :  { %v3631_v52 = vpop.eup %3630  ;;  %2075 = vrot.lane.b32.xlu0 %v3629_v51, %s3747_s3 }
0x1d03   :  { %2117 = vrot.lane.b32.xlu1 %v3631_v52, %s3747_s3  ;;  %v3633_v59 = vpop.eup %3632 }
0x1d04   :  { %v2099_v2 = vadd.f32 1.0, %v3633_v59 }
0x1d06   :  { %3634 = vrcp.f32 %v2099_v2 }
0x1d10   :  { %v3635_v16 = vpop.eup %3634 }
0x1d11   :  { %v2115_v6 = vsub.f32 1.0, %v3635_v16  ;;  %v2122_v48 = vmul.f32 %v3635_v16, %v1970_v58 }
0x1d74   :  { %v2076_v57 = vpop.permute.xlu0 %2075 }
0x1d75   :  { %v2078_v17 = vmul.f32 %v2076_v57, %v2073_v12  ;;  %v2118_v22 = vpop.permute.xlu1 %2117 }
0x1d76   :  { %v2120_v60 = vmul.f32 %v2118_v22, %v2115_v6 }
0x1d77   :  { %v4448_v33 = vadd.f32 %v2081_v63, %v2078_v17 }
0x1d78   :  { %v4450_v10 = vadd.f32 %v2122_v48, %v2120_v60 }
0x1d79   :  { %2125 = vrot.lane.b32.xlu1 %v4448_v33, %s3747_s3  ;;  %v2246_v4 = vrot.slane %v4448_v33, 6 }
0x1d7a   :  { %v2137_v11 = vrot.slane %v4450_v10, 6  ;;  %v2282_v2 = vrot.slane %v4450_v10, 2 }
0x1d7c   :  { %2138 = vrot.lane.b32.xlu0 %v2137_v11, %s3748_s30 }
0x1deb   :  { %v2126_v7 = vpop.permute.xlu1 %2125 }
0x1dec   :  { %2128 = vst.msk [vmem:[#allocation2] sm:$0x30] %vm673_vm5, %v2126_v7 }
0x1dee   :  { %v2139_v43 = vpop.permute.xlu0 %2138 }
0x1def   :  { %v2141_v55 = vsel %vm349_vm3, %v2126_v7, %v2139_v43 }
0x1df0   :  { %v2143_v27 = vrot.slane %v2141_v55, 4 }
0x1df2   :  { %3109 = vmatmul.mubr.msk.f32.vlgmr.msra.gmra.mrb[14].mxu1 %vm155_vm1, %v2143_v27 }
0x1df3   :  { %3392 = vmatpush1.bf16.msra.mxu1 %v4198_v45  ;;  %2535 = vmatprep.mubr.f32.mxu1 %v3745_v0 }
0x1df4   :  { %3394 = vmatprep.subr.bf16.mxu1 %v4200_v46 }
0x1df7   :  { %3396 = vmatpush1.bf16.msra.mxu1 %v4218_v53 }
0x1df8   :  { %3398 = vmatprep.subr.bf16.mxu1 %v4232_v1 }
0x1dfb   :  { %3400 = vmatpush1.bf16.msra.mxu1 %v4264_v8 }
0x1dfc   :  { %3402 = vmatprep.subr.bf16.mxu1 %v4267_v9 }
0x1dff   :  { %3404 = vmatpush1.bf16.msra.mxu1 %v4278_v49 }
0x1e00   :  { %3422 = vmatprep.subr.bf16.mxu1 %v4187_v41 }
0x1ec5   :  { %v2212_v58 = vpop.f32.mrb[14].mxu1 }
0x1ec6   :  { %v2227_v13 = vadd.f32 %v2212_v58, %v4355_v29  ;;  %v2214_v14 = vpop.f32.mrb[15].mxu1  ;;  %v2218_v18 = vrot.slane %v2212_v58, 2  ;;  %v2250_v20 = vadd.f32 %v2212_v58, %v2135_v19 }
0x1ec7   :  { %v2264_v5 = vadd.f32 %v4335_v3, %v2214_v14  ;;  %v2257_v52 = vadd.f32 %v2214_v14, %v2136_v40 }
0x1ec8   :  { %v2229_v15 = vrot.slane %v2227_v13, 2  ;;  %v2220_v35 = vadd.f32 %v2218_v18, %v2134_v36  ;;  %v3111_v38 = vmul.f32 -1.442695, %v2250_v20  ;;  %v2296_v18 = vld [vmem:[#allocation3 + $0x10] sm:$0x3] }
0x1ec9   :  { %2266 = vrot.lane.b32.xlu1 %v2264_v5, %s3746_s25  ;;  %v3112_v56 = vmul.f32 -1.442695, %v2257_v52  ;;  %v2297_v20 = vld [vmem:[#allocation3] sm:$0xc0] }
0x1eca   :  { %2230 = vrot.lane.b32.xlu0 %v2229_v15, %s3746_s25  ;;  %v3110_v21 = vmul.f32 -1.442695, %v2220_v35  ;;  %3636 = vpow2.f32 %v3111_v38 }
0x1ecc   :  { %3638 = vpow2.f32 %v3110_v21 }
0x1ed4   :  { %v3637_v41 = vpop.eup %3636 }
0x1ed5   :  { %v2254_v24 = vadd.f32 1.0, %v3637_v41 }
0x1ed6   :  { %v3639_v23 = vpop.eup %3638 }
0x1ed7   :  { %v2224_v25 = vadd.f32 1.0, %v3639_v23  ;;  %3640 = vrcp.f32 %v2254_v24 }
0x1ed9   :  { %3642 = vrcp.f32 %v2224_v25 }
0x1ee1   :  { %v3641_v26 = vpop.eup %3640 }
0x1ee3   :  { %v3643_v31 = vpop.eup %3642 }
0x1ee4   :  { %v2240_v57 = vsub.f32 1.0, %v3643_v31  ;;  %v2248_v22 = vmul.f32 %v3643_v31, %v2246_v4 }
0x1f3b   :  { %v2267_v28 = vpop.permute.xlu1 %2266 }
0x1f3c   :  { %v2269_v32 = vmul.f32 %v3641_v26, %v2267_v28  ;;  %v2231_v34 = vpop.permute.xlu0 %2230 }
0x1f3d   :  { %v2233_v37 = vmul.f32 %v3643_v31, %v2231_v34 }
0x1f3e   :  { %2271 = vrot.lane.b32.xlu1 %v2269_v32, %s3746_s25 }
0x1f3f   :  { %2235 = vrot.lane.b32.xlu0 %v2233_v37, %s3746_s25 }
0x1fb0   :  { %v2272_v62 = vpop.permute.xlu1 %2271 }
0x1fb1   :  { %v2274_v42 = vadd.f32 %v2272_v62, %v2136_v40  ;;  %v2236_v44 = vpop.permute.xlu0 %2235 }
0x1fb2   :  { %v2238_v61 = vadd.f32 %v2236_v44, %v2134_v36 }
0x1fb3   :  { %3644 = vtanh.f32 %v2274_v42  ;;  %v2298_v42 = vld [vmem:[#allocation3 + $0x8] sm:$0xc0] }
0x1fb4   :  { %3646 = vtanh.f32 %v2238_v61 }
0x1fb5   :  { %3648 = vpow2.f32 %v3112_v56 }
0x1fbd   :  { %v3645_v39 = vpop.eup %3644 }
0x1fbe   :  { %v3647_v51 = vpop.eup %3646  ;;  %2278 = vrot.lane.b32.xlu1 %v3645_v39, %s3747_s3 }
0x1fbf   :  { %2242 = vrot.lane.b32.xlu0 %v3647_v51, %s3747_s3  ;;  %v3649_v47 = vpop.eup %3648 }
0x1fc0   :  { %v2261_v50 = vadd.f32 1.0, %v3649_v47 }
0x1fc2   :  { %3650 = vrcp.f32 %v2261_v50 }
0x1fcc   :  { %v3651_v59 = vpop.eup %3650 }
0x1fcd   :  { %v2276_v16 = vsub.f32 1.0, %v3651_v59  ;;  %v2284_v63 = vmul.f32 %v3651_v59, %v2282_v2 }
0x2030   :  { %v2279_v12 = vpop.permute.xlu1 %2278 }
0x2031   :  { %v2281_v6 = vmul.f32 %v2279_v12, %v2276_v16  ;;  %v2243_v17 = vpop.permute.xlu0 %2242 }
0x2032   :  { %v2245_v60 = vmul.f32 %v2243_v17, %v2240_v57 }
0x2033   :  { %v4478_v48 = vadd.f32 %v2284_v63, %v2281_v6 }
0x2034   :  { %v4480_v11 = vadd.f32 %v2248_v22, %v2245_v60 }
0x2035   :  { %v2299_v7 = vrot.slane %v4478_v48, 2 }
0x2036   :  { %2287 = vrot.lane.b32.xlu1 %v4480_v11, %s3747_s3  ;;  %v2404_v16 = vrot.slane %v4480_v11, 6 }
0x2037   :  { %2300 = vrot.lane.b32.xlu0 %v2299_v7, %s3748_s30 }
0x20a8   :  { %v2288_v33 = vpop.permute.xlu1 %2287 }
0x20a9   :  { %2290 = vst.msk [vmem:[#allocation2] sm:$0xc0] %vm837_vm6, %v2288_v33  ;;  %v2301_v43 = vpop.permute.xlu0 %2300 }
0x20aa   :  { %v2303_v55 = vsel %vm349_vm3, %v2288_v33, %v2301_v43 }
0x20ab   :  { %v2305_v27 = vrot.slane %v2303_v55, 6 }
0x20ad   :  { %3113 = vmatmul.mubr.msk.f32.vlgmr.msra.gmra.mrb[16].mxu0 %vm155_vm1, %v2305_v27 }
0x20ae   :  { %3408 = vmatpush1.bf16.msra.mxu0 %v4198_v45  ;;  %2703 = vmatprep.mubr.f32.mxu0 %v3745_v0 }
0x20af   :  { %3410 = vmatprep.subr.bf16.mxu0 %v4200_v46 }
0x20b2   :  { %3412 = vmatpush1.bf16.msra.mxu0 %v4218_v53 }
0x20b3   :  { %3414 = vmatprep.subr.bf16.mxu0 %v4232_v1 }
0x20b6   :  { %3416 = vmatpush1.bf16.msra.mxu0 %v4264_v8 }
0x20b7   :  { %3418 = vmatprep.subr.bf16.mxu0 %v4267_v9 }
0x20ba   :  { %3420 = vmatpush1.bf16.msra.mxu0 %v4278_v49 }
0x2180   :  { %v2374_v58 = vpop.f32.mrb[16].mxu0 }
0x2181   :  { %v2386_v13 = vadd.f32 %v2374_v58, %v4355_v29  ;;  %v2376_v14 = vpop.f32.mrb[17].mxu0  ;;  %v2409_v19 = vrot.slane %v2374_v58, 2  ;;  %v2379_v36 = vadd.f32 %v2374_v58, %v2296_v18 }
0x2182   :  { %v2428_v5 = vadd.f32 %v4335_v3, %v2376_v14  ;;  %v2419_v52 = vrot.slane %v2376_v14, 2 }
0x2183   :  { %2388 = vrot.lane.b32.xlu0 %v2386_v13, %s3746_s25  ;;  %v2411_v35 = vadd.f32 %v2409_v19, %v2297_v20  ;;  %v3114_v38 = vmul.f32 -1.442695, %v2379_v36 }
0x2184   :  { %v2430_v15 = vrot.slane %v2428_v5, 2  ;;  %v2421_v56 = vadd.f32 %v2419_v52, %v2298_v42 }
0x2185   :  { %v3115_v21 = vmul.f32 -1.442695, %v2411_v35  ;;  %3652 = vpow2.f32 %v3114_v38 }
0x2186   :  { %2431 = vrot.lane.b32.xlu1 %v2430_v15, %s3746_s25  ;;  %v3116_v47 = vmul.f32 -1.442695, %v2421_v56 }
0x2187   :  { %3654 = vpow2.f32 %v3115_v21 }
0x218f   :  { %v3653_v41 = vpop.eup %3652 }
0x2190   :  { %v2383_v24 = vadd.f32 1.0, %v3653_v41 }
0x2191   :  { %v3655_v23 = vpop.eup %3654 }
0x2192   :  { %v2415_v25 = vadd.f32 1.0, %v3655_v23  ;;  %3656 = vrcp.f32 %v2383_v24 }
0x2194   :  { %3658 = vrcp.f32 %v2415_v25 }
0x219c   :  { %v3657_v26 = vpop.eup %3656 }
0x219d   :  { %v2398_v4 = vsub.f32 1.0, %v3657_v26  ;;  %v2406_v57 = vmul.f32 %v3657_v26, %v2404_v16 }
0x219e   :  { %v3659_v32 = vpop.eup %3658 }
0x21f5   :  { %v2389_v28 = vpop.permute.xlu0 %2388 }
0x21f6   :  { %v2391_v31 = vmul.f32 %v3657_v26, %v2389_v28 }
0x21f8   :  { %2393 = vrot.lane.b32.xlu0 %v2391_v31, %s3746_s25  ;;  %v2432_v34 = vpop.permute.xlu1 %2431  ;;  %v2462_v31 = vld [vmem:[#allocation3 + $0x8] sm:$0x30] }
0x21f9   :  { %v2434_v37 = vmul.f32 %v3659_v32, %v2432_v34 }
0x21fb   :  { %2436 = vrot.lane.b32.xlu1 %v2434_v37, %s3746_s25 }
0x226a   :  { %v2394_v40 = vpop.permute.xlu0 %2393 }
0x226b   :  { %v2396_v62 = vadd.f32 %v2394_v40, %v2296_v18 }
0x226d   :  { %3660 = vtanh.f32 %v2396_v62  ;;  %v2437_v44 = vpop.permute.xlu1 %2436 }
0x226e   :  { %v2439_v61 = vadd.f32 %v2437_v44, %v2298_v42 }
0x2270   :  { %3662 = vtanh.f32 %v2439_v61 }
0x2271   :  { %3664 = vpow2.f32 %v3116_v47 }
0x2277   :  { %v3661_v39 = vpop.eup %3660 }
0x2278   :  { %2400 = vrot.lane.b32.xlu0 %v3661_v39, %s3747_s3 }
0x227a   :  { %v3663_v51 = vpop.eup %3662 }
0x227b   :  { %2443 = vrot.lane.b32.xlu1 %v3663_v51, %s3747_s3  ;;  %v3665_v50 = vpop.eup %3664 }
0x227c   :  { %v2425_v59 = vadd.f32 1.0, %v3665_v50 }
0x227e   :  { %3666 = vrcp.f32 %v2425_v59 }
0x2288   :  { %v3667_v2 = vpop.eup %3666 }
0x2289   :  { %v2441_v63 = vsub.f32 1.0, %v3667_v2  ;;  %v2448_v33 = vmul.f32 %v3667_v2, %v2299_v7 }
0x22ea   :  { %v2401_v12 = vpop.permute.xlu0 %2400 }
0x22eb   :  { %v2403_v6 = vmul.f32 %v2401_v12, %v2398_v4 }
0x22ed   :  { %v4508_v17 = vadd.f32 %v2406_v57, %v2403_v6  ;;  %v2444_v22 = vpop.permute.xlu1 %2443 }
0x22ee   :  { %v2446_v60 = vmul.f32 %v2444_v22, %v2441_v63 }
0x22ef   :  { %2451 = vrot.lane.b32.xlu1 %v4508_v17, %s3747_s3  ;;  %v2571_v52 = vrot.slane %v4508_v17, 6 }
0x22f0   :  { %v4514_v43 = vadd.f32 %v2448_v33, %v2446_v60 }
0x22f2   :  { %v2463_v55 = vrot.slane %v4514_v43, 6  ;;  %v2613_v50 = vrot.slane %v4514_v43, 2 }
0x22f4   :  { %2464 = vrot.lane.b32.xlu0 %v2463_v55, %s3748_s30 }
0x2361   :  { %v4518_v11 = vpop.permute.xlu1 %2451 }
0x2366   :  { %v2465_v27 = vpop.permute.xlu0 %2464 }
0x2367   :  { %v2467_v58 = vsel %vm349_vm3, %v4518_v11, %v2465_v27 }
0x2368   :  { %3117 = vmatmul.mubr.msk.f32.vlgmr.msra.gmra.mrb[16].mxu1 %vm155_vm1, %v2467_v58 }
0x2369   :  { %3424 = vmatpush1.bf16.msra.mxu1 %v4198_v45  ;;  %2870 = vmatprep.mubr.f32.mxu1 %v3745_v0 }
0x236a   :  { %3426 = vmatprep.subr.bf16.mxu1 %v4200_v46 }
0x236d   :  { %3428 = vmatpush1.bf16.msra.mxu1 %v4218_v53 }
0x236e   :  { %3430 = vmatprep.subr.bf16.mxu1 %v4232_v1  ;;  %v2460_v1 = vld [vmem:[#allocation3 + $0x10] sm:$0xc] }
0x2371   :  { %3432 = vmatpush1.bf16.msra.mxu1 %v4264_v8  ;;  %v2461_v8 = vld [vmem:[#allocation3] sm:$0x30] }
0x2372   :  { %3434 = vmatprep.subr.bf16.mxu1 %v4267_v9 }
0x2375   :  { %3436 = vmatpush1.bf16.msra.mxu1 %v4278_v49 }
0x243b   :  { %v2537_v7 = vpop.f32.mrb[16].mxu1 }
0x243c   :  { %v2552_v13 = vadd.f32 %v2537_v7, %v4355_v29  ;;  %v2539_v14 = vpop.f32.mrb[17].mxu1  ;;  %v2543_v46 = vrot.slane %v2537_v7, 6  ;;  %v2575_v53 = vrot.slane %v2537_v7, 4 }
0x243d   :  { %v2594_v45 = vadd.f32 %v4335_v3, %v2539_v14  ;;  %v2585_v62 = vrot.slane %v2539_v14, 4 }
0x243e   :  { %v2554_v5 = vrot.slane %v2552_v13, 6  ;;  %v2545_v15 = vadd.f32 %v2543_v46, %v2460_v1  ;;  %v2577_v9 = vadd.f32 %v2575_v53, %v2461_v8  ;;  %v2627_v46 = vld [vmem:[#allocation3 + $0x10] sm:$0x30]  ;;  %v2628_v53 = vld [vmem:[#allocation3] sm:$0xc] }
0x243f   :  { %v2596_v0 = vrot.slane %v2594_v45, 4  ;;  %v2587_v42 = vadd.f32 %v2585_v62, %v2462_v31 }
0x2440   :  { %2555 = vrot.lane.b32.xlu0 %v2554_v5, %s3746_s25  ;;  %v3118_v18 = vmul.f32 -1.442695, %v2545_v15  ;;  %v3119_v49 = vmul.f32 -1.442695, %v2577_v9 }
0x2441   :  { %2597 = vrot.lane.b32.xlu1 %v2596_v0, %s3746_s25  ;;  %v3120_v44 = vmul.f32 -1.442695, %v2587_v42 }
0x2442   :  { %3668 = vpow2.f32 %v3118_v18 }
0x2443   :  { %3670 = vpow2.f32 %v3119_v49 }
0x244c   :  { %v3669_v19 = vpop.eup %3668 }
0x244d   :  { %v3671_v36 = vpop.eup %3670  ;;  %v2549_v20 = vadd.f32 1.0, %v3669_v19 }
0x244e   :  { %v2581_v35 = vadd.f32 1.0, %v3671_v36 }
0x244f   :  { %3672 = vrcp.f32 %v2549_v20 }
0x2450   :  { %3674 = vrcp.f32 %v2581_v35 }
0x2459   :  { %v3673_v38 = vpop.eup %3672 }
0x245a   :  { %v3675_v41 = vpop.eup %3674  ;;  %v2565_v56 = vsub.f32 1.0, %v3673_v38  ;;  %v2573_v2 = vmul.f32 %v3673_v38, %v2571_v52 }
0x24b2   :  { %v2556_v21 = vpop.permute.xlu0 %2555 }
0x24b3   :  { %v2558_v23 = vmul.f32 %v3673_v38, %v2556_v21  ;;  %v2598_v24 = vpop.permute.xlu1 %2597 }
0x24b4   :  { %v2600_v25 = vmul.f32 %v3675_v41, %v2598_v24 }
0x24b5   :  { %2560 = vrot.lane.b32.xlu0 %v2558_v23, %s3746_s25 }
0x24b6   :  { %2602 = vrot.lane.b32.xlu1 %v2600_v25, %s3746_s25  ;;  %v2629_v25 = vld [vmem:[#allocation3 + $0x8] sm:$0xc] }
0x2527   :  { %v2561_v26 = vpop.permute.xlu0 %2560 }
0x2528   :  { %v2563_v28 = vadd.f32 %v2561_v26, %v2460_v1  ;;  %v2603_v32 = vpop.permute.xlu1 %2602 }
0x2529   :  { %v2605_v34 = vadd.f32 %v2603_v32, %v2462_v31 }
0x252a   :  { %3676 = vtanh.f32 %v2563_v28 }
0x252b   :  { %3678 = vtanh.f32 %v2605_v34 }
0x252c   :  { %3680 = vpow2.f32 %v3120_v44 }
0x2534   :  { %v3677_v37 = vpop.eup %3676 }
0x2535   :  { %v3679_v40 = vpop.eup %3678  ;;  %2567 = vrot.lane.b32.xlu0 %v3677_v37, %s3747_s3 }
0x2536   :  { %2609 = vrot.lane.b32.xlu1 %v3679_v40, %s3747_s3  ;;  %v3681_v61 = vpop.eup %3680 }
0x2537   :  { %v2591_v39 = vadd.f32 1.0, %v3681_v61 }
0x2539   :  { %3682 = vrcp.f32 %v2591_v39 }
0x2543   :  { %v3683_v51 = vpop.eup %3682 }
0x2544   :  { %v2607_v59 = vsub.f32 1.0, %v3683_v51  ;;  %v2615_v57 = vmul.f32 %v3683_v51, %v2613_v50 }
0x25a7   :  { %v2568_v47 = vpop.permute.xlu0 %2567 }
0x25a8   :  { %v2570_v16 = vmul.f32 %v2568_v47, %v2565_v56  ;;  %v2610_v4 = vpop.permute.xlu1 %2609 }
0x25a9   :  { %v2612_v12 = vmul.f32 %v2610_v4, %v2607_v59 }
0x25aa   :  { %v4541_v6 = vadd.f32 %v2573_v2, %v2570_v16 }
0x25ab   :  { %v4543_v63 = vadd.f32 %v2615_v57, %v2612_v12 }
0x25ac   :  { %2618 = vrot.lane.b32.xlu1 %v4541_v6, %s3747_s3  ;;  %v2739_v61 = vrot.slane %v4541_v6, 6 }
0x25ad   :  { %v2630_v22 = vrot.slane %v4543_v63, 2 }
0x25af   :  { %2631 = vrot.lane.b32.xlu0 %v2630_v22, %s3748_s30 }
0x261e   :  { %v4551_v17 = vpop.permute.xlu1 %2618 }
0x2621   :  { %v2632_v60 = vpop.permute.xlu0 %2631 }
0x2622   :  { %v2634_v33 = vsel %vm349_vm3, %v4551_v17, %v2632_v60 }
0x2623   :  { %v2636_v55 = vrot.slane %v2634_v33, 2 }
0x2625   :  { %3121 = vmatmul.mubr.msk.f32.vlgmr.msra.gmra.mrb[18].mxu0 %vm155_vm1, %v2636_v55 }
0x26f8   :  { %v2705_v27 = vpop.f32.mrb[18].mxu0 }
0x26f9   :  { %v2720_v58 = vadd.f32 %v2705_v27, %v4355_v29  ;;  %v2707_v7 = vpop.f32.mrb[19].mxu0  ;;  %v2711_v5 = vrot.slane %v2705_v27, 4  ;;  %v2743_v0 = vrot.slane %v2705_v27, 6 }
0x26fa   :  { %v2762_v13 = vadd.f32 %v4335_v3, %v2707_v7  ;;  %v2753_v34 = vrot.slane %v2707_v7, 6 }
0x26fb   :  { %v2722_v14 = vrot.slane %v2720_v58, 4  ;;  %v2713_v1 = vadd.f32 %v2711_v5, %v2627_v46  ;;  %v2745_v8 = vadd.f32 %v2743_v0, %v2628_v53  ;;  %v3717_v58 = vld [vmem:[%s4668_s8] ss:$0 sm:$0xff]  ;;  %v2794_v5 = vld [vmem:[#allocation3 + $0x10] sm:$0xc0] }
0x26fc   :  { %v2764_v45 = vrot.slane %v2762_v13, 6  ;;  %v2755_v37 = vadd.f32 %v2753_v34, %v2629_v25  ;;  %v2961_v34 = vld [vmem:[%s4669_s9 + $0x18] sm:$0xff] }
0x26fd   :  { %2723 = vrot.lane.b32.xlu0 %v2722_v14, %s3746_s25  ;;  %v3122_v15 = vmul.f32 -1.442695, %v2713_v1  ;;  %v3123_v9 = vmul.f32 -1.442695, %v2745_v8 }
0x26fe   :  { %2765 = vrot.lane.b32.xlu1 %v2764_v45, %s3746_s25  ;;  %v3124_v40 = vmul.f32 -1.442695, %v2755_v37  ;;  %v2795_v45 = vld [vmem:[#allocation3] sm:$0x3] }
0x26ff   :  { %3684 = vpow2.f32 %v3122_v15 }
0x2700   :  { %3686 = vpow2.f32 %v3123_v9 }
0x2709   :  { %v3685_v18 = vpop.eup %3684 }
0x270a   :  { %v3687_v49 = vpop.eup %3686  ;;  %v2717_v19 = vadd.f32 1.0, %v3685_v18 }
0x270b   :  { %v2749_v3 = vadd.f32 1.0, %v3687_v49 }
0x270c   :  { %3688 = vrcp.f32 %v2717_v19 }
0x270d   :  { %3690 = vrcp.f32 %v2749_v3 }
0x2716   :  { %v3689_v36 = vpop.eup %3688 }
0x2717   :  { %v3691_v35 = vpop.eup %3690  ;;  %v2733_v39 = vsub.f32 1.0, %v3689_v36  ;;  %v2741_v56 = vmul.f32 %v3689_v36, %v2739_v61 }
0x276f   :  { %v2724_v20 = vpop.permute.xlu0 %2723 }
0x2770   :  { %v2726_v38 = vmul.f32 %v3689_v36, %v2724_v20  ;;  %v2766_v21 = vpop.permute.xlu1 %2765 }
0x2771   :  { %v2768_v41 = vmul.f32 %v3691_v35, %v2766_v21  ;;  %v2796_v35 = vld [vmem:[#allocation3 + $0x8] sm:$0x3] }
0x2772   :  { %2728 = vrot.lane.b32.xlu0 %v2726_v38, %s3746_s25 }
0x2773   :  { %2770 = vrot.lane.b32.xlu1 %v2768_v41, %s3746_s25 }
0x27e4   :  { %v2729_v23 = vpop.permute.xlu0 %2728 }
0x27e5   :  { %v2731_v24 = vadd.f32 %v2729_v23, %v2627_v46  ;;  %v2771_v26 = vpop.permute.xlu1 %2770 }
0x27e6   :  { %v2773_v28 = vadd.f32 %v2771_v26, %v2629_v25  ;;  %v2958_v26 = vld [vmem:[%s4669_s9] sm:$0xff] }
0x27e7   :  { %3692 = vtanh.f32 %v2731_v24 }
0x27e8   :  { %3694 = vtanh.f32 %v2773_v28  ;;  %v2959_v28 = vld [vmem:[%s4669_s9 + $0x8] sm:$0xff] }
0x27e9   :  { %3696 = vpow2.f32 %v3124_v40 }
0x27f1   :  { %v3693_v31 = vpop.eup %3692 }
0x27f2   :  { %v3695_v32 = vpop.eup %3694  ;;  %2735 = vrot.lane.b32.xlu0 %v3693_v31, %s3747_s3  ;;  %v2960_v31 = vld [vmem:[%s4669_s9 + $0x10] sm:$0xff] }
0x27f3   :  { %2777 = vrot.lane.b32.xlu1 %v3695_v32, %s3747_s3  ;;  %v3697_v62 = vpop.eup %3696  ;;  %v3437_v32 = vpack.c.bf16 %v2959_v28, %v2958_v26  ;;  %v3441_v37 = vpack.c.bf16 %v2961_v34, %v2960_v31 }
0x27f4   :  { %v2759_v42 = vadd.f32 1.0, %v3697_v62 }
0x27f5   :  { %3438 = vmatprep.subr.bf16.mxu0 %v3437_v32 }
0x27f6   :  { %3698 = vrcp.f32 %v2759_v42  ;;  %3440 = vmatpush3.bf16.msra.mxu0 %v3437_v32  ;;  %v2965_v42 = vld [vmem:[%s4669_s9 + $0x38] sm:$0xff] }
0x27f7   :  { %3442 = vmatprep.subr.bf16.mxu0 %v3441_v37 }
0x27fa   :  { %3444 = vmatpush3.bf16.msra.mxu0 %v3441_v37 }
0x2800   :  { %v3699_v44 = vpop.eup %3698 }
0x2801   :  { %v2775_v52 = vsub.f32 1.0, %v3699_v44  ;;  %v2782_v2 = vmul.f32 %v3699_v44, %v2630_v22 }
0x2864   :  { %v2736_v51 = vpop.permute.xlu0 %2735 }
0x2865   :  { %v2738_v47 = vmul.f32 %v2736_v51, %v2733_v39  ;;  %v2778_v50 = vpop.permute.xlu1 %2777 }
0x2866   :  { %v2780_v59 = vmul.f32 %v2778_v50, %v2775_v52 }
0x2867   :  { %v4567_v16 = vadd.f32 %v2741_v56, %v2738_v47 }
0x2868   :  { %v4569_v4 = vadd.f32 %v2782_v2, %v2780_v59 }
0x2869   :  { %2785 = vrot.lane.b32.xlu1 %v4567_v16, %s3747_s3  ;;  %v2906_v52 = vrot.slane %v4567_v16, 6 }
0x286a   :  { %v2797_v12 = vrot.slane %v4569_v4, 6  ;;  %v2942_v39 = vrot.slane %v4569_v4, 2 }
0x286c   :  { %2798 = vrot.lane.b32.xlu0 %v2797_v12, %s3748_s30 }
0x28db   :  { %v4575_v57 = vpop.permute.xlu1 %2785 }
0x28de   :  { %v2799_v6 = vpop.permute.xlu0 %2798 }
0x28df   :  { %v2801_v60 = vsel %vm349_vm3, %v4575_v57, %v2799_v6 }
0x28e0   :  { %v2803_v33 = vrot.slane %v2801_v60, 4 }
0x28e2   :  { %3125 = vmatmul.mubr.msk.f32.vlgmr.msra.gmra.mrb[18].mxu1 %vm155_vm1, %v2803_v33 }
0x29b5   :  { %v2872_v22 = vpop.f32.mrb[18].mxu1 }
0x29b6   :  { %v2887_v55 = vadd.f32 %v2872_v22, %v4355_v29  ;;  %v2874_v27 = vpop.f32.mrb[19].mxu1  ;;  %v2878_v14 = vrot.slane %v2872_v22, 2  ;;  %v2910_v0 = vadd.f32 %v2872_v22, %v2795_v45 }
0x29b7   :  { %v2924_v7 = vadd.f32 %v3717_v58, %v2874_v27 }
0x29b8   :  { %v2889_v13 = vrot.slane %v2887_v55, 2  ;;  %v2880_v46 = vadd.f32 %v2878_v14, %v2794_v5  ;;  %v3127_v53 = vmul.f32 -1.442695, %v2910_v0 }
0x29b9   :  { %2926 = vrot.lane.b32.xlu1 %v2924_v7, %s3746_s25 }
0x29ba   :  { %2890 = vrot.lane.b32.xlu0 %v2889_v13, %s3746_s25  ;;  %v3126_v1 = vmul.f32 -1.442695, %v2880_v46  ;;  %3700 = vpow2.f32 %v3127_v53 }
0x29bc   :  { %3702 = vpow2.f32 %v3126_v1 }
0x29c4   :  { %v3701_v29 = vpop.eup %3700 }
0x29c5   :  { %v2914_v15 = vadd.f32 1.0, %v3701_v29 }
0x29c6   :  { %v3703_v8 = vpop.eup %3702 }
0x29c7   :  { %v2884_v9 = vadd.f32 1.0, %v3703_v8  ;;  %3704 = vrcp.f32 %v2914_v15 }
0x29c9   :  { %3706 = vrcp.f32 %v2884_v9 }
0x29d1   :  { %v3705_v18 = vpop.eup %3704 }
0x29d3   :  { %v3707_v19 = vpop.eup %3706 }
0x29d4   :  { %v2900_v47 = vsub.f32 1.0, %v3707_v19  ;;  %v2908_v12 = vmul.f32 %v3707_v19, %v2906_v52 }
0x2a2b   :  { %v2927_v49 = vpop.permute.xlu1 %2926 }
0x2a2c   :  { %v2929_v3 = vmul.f32 %v3705_v18, %v2927_v49  ;;  %v2891_v36 = vpop.permute.xlu0 %2890 }
0x2a2d   :  { %v2893_v20 = vmul.f32 %v3707_v19, %v2891_v36 }
0x2a2e   :  { %2931 = vrot.lane.b32.xlu1 %v2929_v3, %s3746_s25 }
0x2a2f   :  { %2895 = vrot.lane.b32.xlu0 %v2893_v20, %s3746_s25 }
0x2aa0   :  { %v2932_v38 = vpop.permute.xlu1 %2931 }
0x2aa1   :  { %v2934_v21 = vadd.f32 %v2932_v38, %v2796_v35  ;;  %v2896_v41 = vpop.permute.xlu0 %2895 }
0x2aa2   :  { %v2898_v23 = vadd.f32 %v2896_v41, %v2794_v5 }
0x2aa3   :  { %3708 = vtanh.f32 %v2934_v21 }
0x2aa4   :  { %3710 = vtanh.f32 %v2898_v23 }
0x2aad   :  { %v3709_v24 = vpop.eup %3708 }
0x2aae   :  { %v3711_v25 = vpop.eup %3710  ;;  %2938 = vrot.lane.b32.xlu1 %v3709_v24, %s3747_s3 }
0x2aaf   :  { %2902 = vrot.lane.b32.xlu0 %v3711_v25, %s3747_s3 }
0x2ab2   :  { %1796 = vrot.lane.b32.xlu1 %v4389_v54, %s3748_s30  ;;  %v2917_v54 = vadd.f32 %v2874_v27, %v2796_v35 }
0x2ab3   :  { %1963 = vrot.lane.b32.xlu0 %v4417_v30, %s3748_s30 }
0x2ab4   :  { %v3128_v30 = vmul.f32 -1.442695, %v2917_v54 }
0x2ab6   :  { %2130 = vrot.lane.b32.xlu1 %v4450_v10, %s3748_s30  ;;  %3712 = vpow2.f32 %v3128_v30  ;;  %v2962_v10 = vld [vmem:[%s4669_s9 + $0x20] sm:$0xff] }
0x2ab7   :  { %2292 = vrot.lane.b32.xlu0 %v4478_v48, %s3748_s30  ;;  %v2963_v48 = vld [vmem:[%s4669_s9 + $0x28] sm:$0xff] }
0x2aba   :  { %2456 = vrot.lane.b32.xlu1 %v4514_v43, %s3748_s30  ;;  %v2964_v43 = vld [vmem:[%s4669_s9 + $0x30] sm:$0xff] }
0x2abb   :  { %2623 = vrot.lane.b32.xlu0 %v4543_v63, %s3748_s30  ;;  %v3445_v63 = vpack.c.bf16 %v2963_v48, %v2962_v10  ;;  %v3449_v44 = vpack.c.bf16 %v2965_v42, %v2964_v43 }
0x2abd   :  { %3446 = vmatprep.subr.bf16.mxu0 %v3445_v63 }
0x2abe   :  { %2790 = vrot.lane.b32.xlu1 %v4569_v4, %s3748_s30  ;;  %3448 = vmatpush3.bf16.msra.mxu0 %v3445_v63 }
0x2abf   :  { %3450 = vmatprep.subr.bf16.mxu0 %v3449_v44 }
0x2ac0   :  { %v3713_v40 = vpop.eup %3712 }
0x2ac1   :  { %v2921_v62 = vadd.f32 1.0, %v3713_v40 }
0x2ac2   :  { %3452 = vmatpush3.bf16.msra.mxu0 %v3449_v44 }
0x2ac3   :  { %3714 = vrcp.f32 %v2921_v62 }
0x2acd   :  { %v3715_v61 = vpop.eup %3714 }
0x2ace   :  { %v2936_v51 = vsub.f32 1.0, %v3715_v61  ;;  %v2944_v59 = vmul.f32 %v3715_v61, %v2942_v39 }
0x2b20   :  { %v2939_v56 = vpop.permute.xlu1 %2938 }
0x2b21   :  { %v2941_v50 = vmul.f32 %v2939_v56, %v2936_v51  ;;  %v2903_v2 = vpop.permute.xlu0 %2902 }
0x2b22   :  { %v2905_v6 = vmul.f32 %v2903_v2, %v2900_v47 }
0x2b23   :  { %v2945_v60 = vadd.f32 %v2944_v59, %v2941_v50 }
0x2b24   :  { %v2909_v33 = vadd.f32 %v2908_v12, %v2905_v6  ;;  %v1797_v22 = vpop.permute.xlu1 %1796 }
0x2b25   :  { %1799 = vst.msk [vmem:[#allocation2 + $0x8] sm:$0xc0] %vm340_vm7, %v1797_v22  ;;  %v1964_v55 = vpop.permute.xlu0 %1963  ;;  %2952 = vrot.lane.b32.xlu0 %v2945_v60, %s3748_s30 }
0x2b26   :  { %1966 = vst.msk [vmem:[#allocation2 + $0x8] sm:$0x30] %vm510_vm8, %v1964_v55  ;;  %2947 = vrot.lane.b32.xlu1 %v2909_v33, %s3747_s3 }
0x2b27   :  { %2788 = vst.msk [vmem:[#allocation2 + $0x8] sm:$0x30] %vm673_vm5, %v4575_v57 }
0x2b28   :  { %v2131_v16 = vpop.permute.xlu1 %2130 }
0x2b29   :  { %2133 = vst.msk [vmem:[#allocation2 + $0x8] sm:$0xc] %vm679_vm9, %v2131_v16  ;;  %v2293_v4 = vpop.permute.xlu0 %2292 }
0x2b2a   :  { %2621 = vst.msk [vmem:[#allocation2 + $0x8] sm:$0xc] %vm504_vm4, %v4551_v17 }
0x2b2b   :  { %2295 = vst.msk [vmem:[#allocation2 + $0x8] sm:$0x3] %vm843_vm10, %v2293_v4 }
0x2b2c   :  { %2454 = vst.msk [vmem:[#allocation2 + $0x8] sm:$0x3] %vm334_vm2, %v4518_v11  ;;  %v2457_v27 = vpop.permute.xlu1 %2456  ;;  %v3129_v11 = vld [vmem:[%s4670_s10] ss:$0 sm:$0xff] }
0x2b2d   :  { %2459 = vst.msk [vmem:[#allocation2] sm:$0xc0] %vm340_vm7, %v2457_v27  ;;  %v2624_v58 = vpop.permute.xlu0 %2623 }
0x2b2e   :  { %2626 = vst.msk [vmem:[#allocation2] sm:$0x30] %vm510_vm8, %v2624_v58 }
0x2b30   :  { %v2791_v7 = vpop.permute.xlu1 %2790 }
0x2b31   :  { %2793 = vst.msk [vmem:[#allocation2] sm:$0xc] %vm679_vm9, %v2791_v7 }
0x2b97   :  { %v2953_v57 = vpop.permute.xlu0 %2952 }
0x2b98   :  { %2955 = vst.msk [vmem:[#allocation2] sm:$0x3] %vm843_vm10, %v2953_v57  ;;  %v2948_v13 = vpop.permute.xlu1 %2947 }
0x2b99   :  { %2950 = vst.msk [vmem:[#allocation2 + $0x8] sm:$0xc0] %vm837_vm6, %v2948_v13 }
0x2b9f   :  { %v2956_v17 = vld [vmem:[#allocation2] sm:$0xff] }
0x2ba0   :  { %3158 = vmatprep.mubr.msk.f32.mxu0 %vm155_vm1, %v2956_v17  ;;  %v2957_v14 = vld [vmem:[#allocation2 + $0x8] sm:$0xff] }
0x2ba1   :  { %3159 = vmatmul.mubr.msk.f32.vlgmr.msra.gmra.mrb[20].mxu0 %vm155_vm1, %v2957_v14 }
0x2c74   :  { %v3160_v45 = vpop.f32.mrb[20].mxu0 }
0x2c75   :  { %v3051_v5 = vadd.f32 %v3160_v45, %v3129_v11  ;;  %v3045_v0 = vpop.f32.mrb[21].mxu0 }
0x2c76   :  { %v3046_v46 = vadd.f32 %v3129_v11, %v3045_v0 }
0x2c77   :  { %3055 = vst.msk [vmem:[%s4671_s11 + $0x8] sm:$0xff] %vm349_vm3, %v3051_v5 }
0x2c78   :  { %3054 = vst.msk [vmem:[%s4671_s11] sm:$0xff] %vm349_vm3, %v3046_v46 }
0x2c79   :  { %3060 = vsyncpa [#allocation5], 1 }

</bundles_post_ra>
